<compile_context>
chip_gen: v6e
topology: v6e:2x2x1
jax: 0.10.0
libtpu: 0.0.40
codegen_flags: <defaults>
</compile_context>

<pallas_src>
import math
import jax
import jax.numpy as jnp
from jax.experimental import pallas as pl
from jax.experimental.pallas import tpu as pltpu

# ---- model / problem sizes (small, consistent with the module) ----
B, T, S = 2, 8, 8                 # batch, target seq, memory seq
D_MODEL, H, D_K, D_FF = 32, 4, 8, 64
EPS = 1e-6
NEG_INF = -1e9
SCALE = 1.0 / math.sqrt(D_K)


# --------------------------- fused decoder-layer kernel ---------------------------
def decoder_layer_kernel(
    x_ref, mem_ref, tgt_bias_ref, src_bias_ref,
    r_emb_ref, r_w_bias_ref, r_bias_ref,
    ln0_g_ref, ln0_b_ref,
    swq_ref, swk_ref, swv_ref, swo_ref, sbq_ref, sbk_ref, sbv_ref, sbo_ref,
    ln1_g_ref, ln1_b_ref,
    cwq_ref, cwk_ref, cwv_ref, cwo_ref, cbq_ref, cbk_ref, cbv_ref, cbo_ref,
    ln2_g_ref, ln2_b_ref,
    w1_ref, b1_ref, w2_ref, b2_ref,
    o_ref,
):
    f32 = jnp.float32
    x = x_ref[0].astype(f32)          # (T, D)
    mem = mem_ref[0].astype(f32)      # (S, D)
    tgt_bias = tgt_bias_ref[0]        # (T, T) additive mask (0 / -1e9)
    src_bias = src_bias_ref[0]        # (T, S) additive mask

    def mm(a, b):                     # a @ b
        return jax.lax.dot_general(a, b, (((1,), (0,)), ((), ())),
                                   preferred_element_type=f32)

    def mm_t(a, b):                   # a @ b.T  (contract last dims)
        return jax.lax.dot_general(a, b, (((1,), (1,)), ((), ())),
                                   preferred_element_type=f32)

    def layernorm(v, g_ref, b_ref):
        mean = jnp.mean(v, axis=-1, keepdims=True)
        diff = v - mean
        # torch.Tensor.std() is unbiased -> divide by (N - 1); eps added to std.
        var = jnp.sum(diff * diff, axis=-1, keepdims=True) / (v.shape[-1] - 1)
        inv = pl.reciprocal(jnp.sqrt(var) + EPS, approx=True)
        return g_ref[...] * diff * inv + b_ref[...]

    def softmax(sc):
        m = jnp.max(sc, axis=-1, keepdims=True)
        p = jnp.exp(sc - m)
        inv = pl.reciprocal(jnp.sum(p, axis=-1, keepdims=True), approx=True)
        return p * inv

    # ---- sublayer 0: relative-position self-attention ----
    y = layernorm(x, ln0_g_ref, ln0_b_ref)
    attn = jnp.zeros((T, D_MODEL), f32)
    for h in range(H):                                   # unrolled, H = 4
        q_h = mm(y, swq_ref[h]) + sbq_ref[h]             # (T, Dk)
        k_h = mm(y, swk_ref[h]) + sbk_ref[h]             # (T, Dk)
        v_h = mm(y, swv_ref[h]) + sbv_ref[h]             # (T, Dk)
        ac = mm_t(q_h + r_w_bias_ref[h], k_h)            # (T, T)
        # TODO(synk): exact injected self_attn module is unspecified; Transformer-XL
        # rel_shift is omitted (learnable-relative attention without shift).
        bd = mm_t(q_h, r_emb_ref[h]) + r_bias_ref[h]     # (T, T)
        p = softmax((ac + bd) * SCALE + tgt_bias)
        attn = attn + mm(mm(p, v_h), swo_ref[h])         # accumulate head output
    x = x + attn + sbo_ref[...]

    # ---- sublayer 1: standard src attention ----
    y = layernorm(x, ln1_g_ref, ln1_b_ref)
    attn = jnp.zeros((T, D_MODEL), f32)
    for h in range(H):
        q_h = mm(y, cwq_ref[h]) + cbq_ref[h]             # (T, Dk)
        k_h = mm(mem, cwk_ref[h]) + cbk_ref[h]           # (S, Dk)
        v_h = mm(mem, cwv_ref[h]) + cbv_ref[h]           # (S, Dk)
        p = softmax(mm_t(q_h, k_h) * SCALE + src_bias)   # (T, S)
        attn = attn + mm(mm(p, v_h), cwo_ref[h])
    x = x + attn + cbo_ref[...]

    # ---- sublayer 2: feed forward ----
    y = layernorm(x, ln2_g_ref, ln2_b_ref)
    hdd = jnp.maximum(mm(y, w1_ref[...]) + b1_ref[...], 0.0)   # (T, D_FF)
    x = x + mm(hdd, w2_ref[...]) + b2_ref[...]

    o_ref[0] = x.astype(o_ref.dtype)


# --------------------------- wrapper ---------------------------
def decoder_layer(x, memory, src_mask, tgt_mask, r_emb, r_w_bias, r_bias, params):
    f32 = jnp.float32
    # Precompute additive masks (0 / -1e9) on the wrapper side.
    tgt_bias = jnp.where(tgt_mask == 0, NEG_INF, 0.0).astype(f32)   # (B, T, T)
    src_bias = jnp.where(src_mask == 0, NEG_INF, 0.0).astype(f32)   # (B, T, S)

    # Per-head weight layouts (tiny parameter reshapes, done once in XLA):
    def heads_in(w):   # (D, D) -> (H, D, Dk): column block h = head h's projection
        return w.reshape(D_MODEL, H, D_K).transpose(1, 0, 2)

    def heads_out(w):  # (D, D) -> (H, Dk, D): row block h = head h's output proj
        return w.reshape(H, D_K, D_MODEL)

    def heads_bias(b):  # (D,) -> (H, 1, Dk)
        return b.reshape(H, 1, D_K)

    def row(v):         # (N,) -> (1, N)
        return v.reshape(1, -1)

    sp, cp, fp = params['self'], params['src'], params['ff']
    args = [
        x, memory, tgt_bias, src_bias,
        r_emb, r_w_bias.reshape(H, 1, D_K), r_bias.reshape(H, 1, T),
        row(params['ln0_g']), row(params['ln0_b']),
        heads_in(sp['wq']), heads_in(sp['wk']), heads_in(sp['wv']), heads_out(sp['wo']),
        heads_bias(sp['bq']), heads_bias(sp['bk']), heads_bias(sp['bv']), row(sp['bo']),
        row(params['ln1_g']), row(params['ln1_b']),
        heads_in(cp['wq']), heads_in(cp['wk']), heads_in(cp['wv']), heads_out(cp['wo']),
        heads_bias(cp['bq']), heads_bias(cp['bk']), heads_bias(cp['bv']), row(cp['bo']),
        row(params['ln2_g']), row(params['ln2_b']),
        fp['w1'], row(fp['b1']), fp['w2'], row(fp['b2']),
    ]

    def batched(shape):   # per-batch tile
        return pl.BlockSpec((1,) + shape, lambda b: (b, 0, 0))

    def const(shape):     # whole (small) array, same for every grid step
        if len(shape) == 2:
            return pl.BlockSpec(shape, lambda b: (0, 0))
        return pl.BlockSpec(shape, lambda b: (0, 0, 0))

    attn_w_specs = [const((H, D_MODEL, D_K))] * 3 + [const((H, D_K, D_MODEL))]
    attn_b_specs = [const((H, 1, D_K))] * 3 + [const((1, D_MODEL))]
    ln_specs = [const((1, D_MODEL)), const((1, D_MODEL))]

    in_specs = (
        [batched((T, D_MODEL)), batched((S, D_MODEL)),
         batched((T, T)), batched((T, S)),
         const((H, T, D_K)), const((H, 1, D_K)), const((H, 1, T))]
        + ln_specs + attn_w_specs + attn_b_specs
        + ln_specs + attn_w_specs + attn_b_specs
        + ln_specs
        + [const((D_MODEL, D_FF)), const((1, D_FF)),
           const((D_FF, D_MODEL)), const((1, D_MODEL))]
    )

    return pl.pallas_call(
        decoder_layer_kernel,
        out_shape=jax.ShapeDtypeStruct((B, T, D_MODEL), x.dtype),
        grid=(B,),
        in_specs=in_specs,
        out_specs=pl.BlockSpec((1, T, D_MODEL), lambda b: (b, 0, 0)),
        compiler_params=pltpu.CompilerParams(
            dimension_semantics=("parallel",)),   # v7x: one batch per TensorCore
    )(*args)


# ------------------------------- main -------------------------------
def _init_params(key):
    ks = jax.random.split(key, 16)

    def w(k, shape):
        return 0.02 * jax.random.normal(k, shape, jnp.float32)

    attn_p = lambda k: {
        'wq': w(jax.random.fold_in(k, 0), (D_MODEL, D_MODEL)), 'bq': jnp.zeros((D_MODEL,), jnp.float32),
        'wk': w(jax.random.fold_in(k, 1), (D_MODEL, D_MODEL)), 'bk': jnp.zeros((D_MODEL,), jnp.float32),
        'wv': w(jax.random.fold_in(k, 2), (D_MODEL, D_MODEL)), 'bv': jnp.zeros((D_MODEL,), jnp.float32),
        'wo': w(jax.random.fold_in(k, 3), (D_MODEL, D_MODEL)), 'bo': jnp.zeros((D_MODEL,), jnp.float32),
    }
    return {
        'self': attn_p(ks[0]),
        'src': attn_p(ks[1]),
        'ff': {
            'w1': w(ks[2], (D_MODEL, D_FF)), 'b1': jnp.zeros((D_FF,), jnp.float32),
            'w2': w(ks[3], (D_FF, D_MODEL)), 'b2': jnp.zeros((D_MODEL,), jnp.float32),
        },
        'ln0_g': jnp.ones((D_MODEL,), jnp.float32), 'ln0_b': jnp.zeros((D_MODEL,), jnp.float32),
        'ln1_g': jnp.ones((D_MODEL,), jnp.float32), 'ln1_b': jnp.zeros((D_MODEL,), jnp.float32),
        'ln2_g': jnp.ones((D_MODEL,), jnp.float32), 'ln2_b': jnp.zeros((D_MODEL,), jnp.float32),
    }


if __name__ == "__main__":
    key = jax.random.PRNGKey(0)
    k_x, k_m, k_r1, k_r2, k_r3, k_p = jax.random.split(key, 6)

    x = jax.random.normal(k_x, (B, T, D_MODEL), jnp.float32)
    memory = jax.random.normal(k_m, (B, S, D_MODEL), jnp.float32)
    tgt_mask = jnp.tile(jnp.tril(jnp.ones((T, T), jnp.int32))[None], (B, 1, 1))
    src_mask = jnp.ones((B, T, S), jnp.int32)
    r_emb = 0.02 * jax.random.normal(k_r1, (H, T, D_K), jnp.float32)
    r_w_bias = 0.02 * jax.random.normal(k_r2, (H, D_K), jnp.float32)
    r_bias = 0.02 * jax.random.normal(k_r3, (H, T), jnp.float32)
    params = _init_params(k_p)

    fwd = jax.jit(decoder_layer)
    out = fwd(x, memory, src_mask, tgt_mask, r_emb, r_w_bias, r_bias, params)
    jax.block_until_ready(out)
    assert out.shape == (B, T, D_MODEL)
    print("KERNEL_OK")
</pallas_src>

<mosaic_0001>
module attributes {stable_mosaic.version = 11 : i64} {
  func.func @decoder_layer_kernel(%arg0: i32, %arg1: memref<1x8x32xf32, #tpu.memory_space<vmem>>, %arg2: memref<1x8x32xf32, #tpu.memory_space<vmem>>, %arg3: memref<1x8x8xf32, #tpu.memory_space<vmem>>, %arg4: memref<1x8x8xf32, #tpu.memory_space<vmem>>, %arg5: memref<4x8x8xf32, #tpu.memory_space<vmem>>, %arg6: memref<4x1x8xf32, #tpu.memory_space<vmem>>, %arg7: memref<4x1x8xf32, #tpu.memory_space<vmem>>, %arg8: memref<1x32xf32, #tpu.memory_space<vmem>>, %arg9: memref<1x32xf32, #tpu.memory_space<vmem>>, %arg10: memref<4x32x8xf32, #tpu.memory_space<vmem>>, %arg11: memref<4x32x8xf32, #tpu.memory_space<vmem>>, %arg12: memref<4x32x8xf32, #tpu.memory_space<vmem>>, %arg13: memref<4x8x32xf32, #tpu.memory_space<vmem>>, %arg14: memref<4x1x8xf32, #tpu.memory_space<vmem>>, %arg15: memref<4x1x8xf32, #tpu.memory_space<vmem>>, %arg16: memref<4x1x8xf32, #tpu.memory_space<vmem>>, %arg17: memref<1x32xf32, #tpu.memory_space<vmem>>, %arg18: memref<1x32xf32, #tpu.memory_space<vmem>>, %arg19: memref<1x32xf32, #tpu.memory_space<vmem>>, %arg20: memref<4x32x8xf32, #tpu.memory_space<vmem>>, %arg21: memref<4x32x8xf32, #tpu.memory_space<vmem>>, %arg22: memref<4x32x8xf32, #tpu.memory_space<vmem>>, %arg23: memref<4x8x32xf32, #tpu.memory_space<vmem>>, %arg24: memref<4x1x8xf32, #tpu.memory_space<vmem>>, %arg25: memref<4x1x8xf32, #tpu.memory_space<vmem>>, %arg26: memref<4x1x8xf32, #tpu.memory_space<vmem>>, %arg27: memref<1x32xf32, #tpu.memory_space<vmem>>, %arg28: memref<1x32xf32, #tpu.memory_space<vmem>>, %arg29: memref<1x32xf32, #tpu.memory_space<vmem>>, %arg30: memref<32x64xf32, #tpu.memory_space<vmem>>, %arg31: memref<1x64xf32, #tpu.memory_space<vmem>>, %arg32: memref<64x32xf32, #tpu.memory_space<vmem>>, %arg33: memref<1x32xf32, #tpu.memory_space<vmem>>, %arg34: memref<1x8x32xf32, #tpu.memory_space<vmem>>) attributes {dimension_semantics = [#tpu.dimension_semantics<parallel>], iteration_bounds = array<i64: 2>, scalar_prefetch = 0 : i64, scratch_operands = 0 : i64, tpu.core_type = #tpu.core_type<tc>, window_params = [{transform_indices = @transform_0, window_bounds = array<i64: 1, 8, 32>}, {transform_indices = @transform_1, window_bounds = array<i64: 1, 8, 32>}, {transform_indices = @transform_2, window_bounds = array<i64: 1, 8, 8>}, {transform_indices = @transform_3, window_bounds = array<i64: 1, 8, 8>}, {pipeline_mode = #tpu.pipeline_mode<synchronous>, transform_indices = @transform_4, window_bounds = array<i64: 4, 8, 8>}, {pipeline_mode = #tpu.pipeline_mode<synchronous>, transform_indices = @transform_5, window_bounds = array<i64: 4, 1, 8>}, {pipeline_mode = #tpu.pipeline_mode<synchronous>, transform_indices = @transform_6, window_bounds = array<i64: 4, 1, 8>}, {pipeline_mode = #tpu.pipeline_mode<synchronous>, transform_indices = @transform_7, window_bounds = array<i64: 1, 32>}, {pipeline_mode = #tpu.pipeline_mode<synchronous>, transform_indices = @transform_8, window_bounds = array<i64: 1, 32>}, {pipeline_mode = #tpu.pipeline_mode<synchronous>, transform_indices = @transform_9, window_bounds = array<i64: 4, 32, 8>}, {pipeline_mode = #tpu.pipeline_mode<synchronous>, transform_indices = @transform_10, window_bounds = array<i64: 4, 32, 8>}, {pipeline_mode = #tpu.pipeline_mode<synchronous>, transform_indices = @transform_11, window_bounds = array<i64: 4, 32, 8>}, {pipeline_mode = #tpu.pipeline_mode<synchronous>, transform_indices = @transform_12, window_bounds = array<i64: 4, 8, 32>}, {pipeline_mode = #tpu.pipeline_mode<synchronous>, transform_indices = @transform_13, window_bounds = array<i64: 4, 1, 8>}, {pipeline_mode = #tpu.pipeline_mode<synchronous>, transform_indices = @transform_14, window_bounds = array<i64: 4, 1, 8>}, {pipeline_mode = #tpu.pipeline_mode<synchronous>, transform_indices = @transform_15, window_bounds = array<i64: 4, 1, 8>}, {pipeline_mode = #tpu.pipeline_mode<synchronous>, transform_indices = @transform_16, window_bounds = array<i64: 1, 32>}, {pipeline_mode = #tpu.pipeline_mode<synchronous>, transform_indices = @transform_17, window_bounds = array<i64: 1, 32>}, {pipeline_mode = #tpu.pipeline_mode<synchronous>, transform_indices = @transform_18, window_bounds = array<i64: 1, 32>}, {pipeline_mode = #tpu.pipeline_mode<synchronous>, transform_indices = @transform_19, window_bounds = array<i64: 4, 32, 8>}, {pipeline_mode = #tpu.pipeline_mode<synchronous>, transform_indices = @transform_20, window_bounds = array<i64: 4, 32, 8>}, {pipeline_mode = #tpu.pipeline_mode<synchronous>, transform_indices = @transform_21, window_bounds = array<i64: 4, 32, 8>}, {pipeline_mode = #tpu.pipeline_mode<synchronous>, transform_indices = @transform_22, window_bounds = array<i64: 4, 8, 32>}, {pipeline_mode = #tpu.pipeline_mode<synchronous>, transform_indices = @transform_23, window_bounds = array<i64: 4, 1, 8>}, {pipeline_mode = #tpu.pipeline_mode<synchronous>, transform_indices = @transform_24, window_bounds = array<i64: 4, 1, 8>}, {pipeline_mode = #tpu.pipeline_mode<synchronous>, transform_indices = @transform_25, window_bounds = array<i64: 4, 1, 8>}, {pipeline_mode = #tpu.pipeline_mode<synchronous>, transform_indices = @transform_26, window_bounds = array<i64: 1, 32>}, {pipeline_mode = #tpu.pipeline_mode<synchronous>, transform_indices = @transform_27, window_bounds = array<i64: 1, 32>}, {pipeline_mode = #tpu.pipeline_mode<synchronous>, transform_indices = @transform_28, window_bounds = array<i64: 1, 32>}, {pipeline_mode = #tpu.pipeline_mode<synchronous>, transform_indices = @transform_29, window_bounds = array<i64: 32, 64>}, {pipeline_mode = #tpu.pipeline_mode<synchronous>, transform_indices = @transform_30, window_bounds = array<i64: 1, 64>}, {pipeline_mode = #tpu.pipeline_mode<synchronous>, transform_indices = @transform_31, window_bounds = array<i64: 64, 32>}, {pipeline_mode = #tpu.pipeline_mode<synchronous>, transform_indices = @transform_32, window_bounds = array<i64: 1, 32>}, {transform_indices = @transform_33, window_bounds = array<i64: 1, 8, 32>}]} {
    %c0 = arith.constant 0 : index
    %c0_0 = arith.constant 0 : index
    %c0_1 = arith.constant 0 : index
    %0 = vector.load %arg1[%c0, %c0_0, %c0_1] : memref<1x8x32xf32, #tpu.memory_space<vmem>>, vector<1x8x32xf32>
    %1 = vector.shape_cast %0 : vector<1x8x32xf32> to vector<8x32xf32>
    %c0_2 = arith.constant 0 : index
    %c0_3 = arith.constant 0 : index
    %c0_4 = arith.constant 0 : index
    %2 = vector.load %arg2[%c0_2, %c0_3, %c0_4] : memref<1x8x32xf32, #tpu.memory_space<vmem>>, vector<1x8x32xf32>
    %3 = vector.shape_cast %2 : vector<1x8x32xf32> to vector<8x32xf32>
    %c0_5 = arith.constant 0 : index
    %c0_6 = arith.constant 0 : index
    %c0_7 = arith.constant 0 : index
    %4 = vector.load %arg3[%c0_5, %c0_6, %c0_7] : memref<1x8x8xf32, #tpu.memory_space<vmem>>, vector<1x8x8xf32>
    %5 = vector.shape_cast %4 : vector<1x8x8xf32> to vector<8x8xf32>
    %c0_8 = arith.constant 0 : index
    %c0_9 = arith.constant 0 : index
    %c0_10 = arith.constant 0 : index
    %6 = vector.load %arg4[%c0_8, %c0_9, %c0_10] : memref<1x8x8xf32, #tpu.memory_space<vmem>>, vector<1x8x8xf32>
    %7 = vector.shape_cast %6 : vector<1x8x8xf32> to vector<8x8xf32>
    %cst = arith.constant dense<0.000000e+00> : vector<8xf32>
    %8 = vector.multi_reduction <add>, %1, %cst [1] : vector<8x32xf32> to vector<8xf32>
    %9 = vector.shape_cast %8 : vector<8xf32> to vector<8x1xf32>
    %cst_11 = arith.constant 3.200000e+01 : f32
    %10 = vector.broadcast %cst_11 : f32 to vector<8x1xf32>
    %11 = arith.divf %9, %10 : vector<8x1xf32>
    %12 = vector.broadcast %11 : vector<8x1xf32> to vector<8x32xf32>
    %13 = arith.subf %1, %12 : vector<8x32xf32>
    %14 = arith.mulf %13, %13 : vector<8x32xf32>
    %cst_12 = arith.constant dense<0.000000e+00> : vector<8xf32>
    %15 = vector.multi_reduction <add>, %14, %cst_12 [1] : vector<8x32xf32> to vector<8xf32>
    %16 = vector.shape_cast %15 : vector<8xf32> to vector<8x1xf32>
    %cst_13 = arith.constant 3.100000e+01 : f32
    %17 = vector.broadcast %cst_13 : f32 to vector<8x1xf32>
    %18 = arith.divf %16, %17 : vector<8x1xf32>
    %19 = math.sqrt %18 : vector<8x1xf32>
    %cst_14 = arith.constant 9.99999997E-7 : f32
    %20 = vector.broadcast %cst_14 : f32 to vector<8x1xf32>
    %21 = arith.addf %19, %20 : vector<8x1xf32>
    %22 = tpu.reciprocal %21 {approx = true} : vector<8x1xf32> -> vector<8x1xf32>
    %c0_15 = arith.constant 0 : index
    %c0_16 = arith.constant 0 : index
    %23 = vector.load %arg8[%c0_15, %c0_16] : memref<1x32xf32, #tpu.memory_space<vmem>>, vector<1x32xf32>
    %24 = vector.broadcast %23 : vector<1x32xf32> to vector<8x32xf32>
    %25 = arith.mulf %24, %13 : vector<8x32xf32>
    %26 = vector.broadcast %22 : vector<8x1xf32> to vector<8x32xf32>
    %27 = arith.mulf %25, %26 : vector<8x32xf32>
    %c0_17 = arith.constant 0 : index
    %c0_18 = arith.constant 0 : index
    %28 = vector.load %arg9[%c0_17, %c0_18] : memref<1x32xf32, #tpu.memory_space<vmem>>, vector<1x32xf32>
    %29 = vector.broadcast %28 : vector<1x32xf32> to vector<8x32xf32>
    %30 = arith.addf %27, %29 : vector<8x32xf32>
    %cst_19 = arith.constant 0.000000e+00 : f32
    %31 = vector.broadcast %cst_19 : f32 to vector<8x32xf32>
    %c0_20 = arith.constant 0 : index
    %c0_21 = arith.constant 0 : index
    %c0_22 = arith.constant 0 : index
    %32 = vector.load %arg10[%c0_20, %c0_21, %c0_22] : memref<4x32x8xf32, #tpu.memory_space<vmem>>, vector<1x32x8xf32>
    %33 = vector.shape_cast %32 : vector<1x32x8xf32> to vector<32x8xf32>
    %cst_23 = arith.constant dense<0.000000e+00> : vector<8x8xf32>
    %34 = tpu.matmul %30, %33, %cst_23 {dimension_numbers = #tpu.dot_dimension_numbers<[1], [0], [0], [1], [0, 0, 1, 1], [], []>} : vector<8x32xf32>, vector<32x8xf32>, vector<8x8xf32> -> vector<8x8xf32>
    %c0_24 = arith.constant 0 : index
    %c0_25 = arith.constant 0 : index
    %c0_26 = arith.constant 0 : index
    %35 = vector.load %arg14[%c0_24, %c0_25, %c0_26] : memref<4x1x8xf32, #tpu.memory_space<vmem>>, vector<1x1x8xf32>
    %36 = vector.shape_cast %35 : vector<1x1x8xf32> to vector<1x8xf32>
    %37 = vector.broadcast %36 : vector<1x8xf32> to vector<8x8xf32>
    %38 = arith.addf %34, %37 : vector<8x8xf32>
    %c0_27 = arith.constant 0 : index
    %c0_28 = arith.constant 0 : index
    %c0_29 = arith.constant 0 : index
    %39 = vector.load %arg11[%c0_27, %c0_28, %c0_29] : memref<4x32x8xf32, #tpu.memory_space<vmem>>, vector<1x32x8xf32>
    %40 = vector.shape_cast %39 : vector<1x32x8xf32> to vector<32x8xf32>
    %cst_30 = arith.constant dense<0.000000e+00> : vector<8x8xf32>
    %41 = tpu.matmul %30, %40, %cst_30 {dimension_numbers = #tpu.dot_dimension_numbers<[1], [0], [0], [1], [0, 0, 1, 1], [], []>} : vector<8x32xf32>, vector<32x8xf32>, vector<8x8xf32> -> vector<8x8xf32>
    %c0_31 = arith.constant 0 : index
    %c0_32 = arith.constant 0 : index
    %c0_33 = arith.constant 0 : index
    %42 = vector.load %arg15[%c0_31, %c0_32, %c0_33] : memref<4x1x8xf32, #tpu.memory_space<vmem>>, vector<1x1x8xf32>
    %43 = vector.shape_cast %42 : vector<1x1x8xf32> to vector<1x8xf32>
    %44 = vector.broadcast %43 : vector<1x8xf32> to vector<8x8xf32>
    %45 = arith.addf %41, %44 : vector<8x8xf32>
    %c0_34 = arith.constant 0 : index
    %c0_35 = arith.constant 0 : index
    %c0_36 = arith.constant 0 : index
    %46 = vector.load %arg12[%c0_34, %c0_35, %c0_36] : memref<4x32x8xf32, #tpu.memory_space<vmem>>, vector<1x32x8xf32>
    %47 = vector.shape_cast %46 : vector<1x32x8xf32> to vector<32x8xf32>
    %cst_37 = arith.constant dense<0.000000e+00> : vector<8x8xf32>
    %48 = tpu.matmul %30, %47, %cst_37 {dimension_numbers = #tpu.dot_dimension_numbers<[1], [0], [0], [1], [0, 0, 1, 1], [], []>} : vector<8x32xf32>, vector<32x8xf32>, vector<8x8xf32> -> vector<8x8xf32>
    %c0_38 = arith.constant 0 : index
    %c0_39 = arith.constant 0 : index
    %c0_40 = arith.constant 0 : index
    %49 = vector.load %arg16[%c0_38, %c0_39, %c0_40] : memref<4x1x8xf32, #tpu.memory_space<vmem>>, vector<1x1x8xf32>
    %50 = vector.shape_cast %49 : vector<1x1x8xf32> to vector<1x8xf32>
    %51 = vector.broadcast %50 : vector<1x8xf32> to vector<8x8xf32>
    %52 = arith.addf %48, %51 : vector<8x8xf32>
    %c0_41 = arith.constant 0 : index
    %c0_42 = arith.constant 0 : index
    %c0_43 = arith.constant 0 : index
    %53 = vector.load %arg6[%c0_41, %c0_42, %c0_43] : memref<4x1x8xf32, #tpu.memory_space<vmem>>, vector<1x1x8xf32>
    %54 = vector.shape_cast %53 : vector<1x1x8xf32> to vector<1x8xf32>
    %55 = vector.broadcast %54 : vector<1x8xf32> to vector<8x8xf32>
    %56 = arith.addf %38, %55 : vector<8x8xf32>
    %cst_44 = arith.constant dense<0.000000e+00> : vector<8x8xf32>
    %57 = tpu.matmul %56, %45, %cst_44 {dimension_numbers = #tpu.dot_dimension_numbers<[1], [1], [0], [0], [0, 0, 1, 0], [], []>} : vector<8x8xf32>, vector<8x8xf32>, vector<8x8xf32> -> vector<8x8xf32>
    %c0_45 = arith.constant 0 : index
    %c0_46 = arith.constant 0 : index
    %c0_47 = arith.constant 0 : index
    %58 = vector.load %arg5[%c0_45, %c0_46, %c0_47] : memref<4x8x8xf32, #tpu.memory_space<vmem>>, vector<1x8x8xf32>
    %59 = vector.shape_cast %58 : vector<1x8x8xf32> to vector<8x8xf32>
    %cst_48 = arith.constant dense<0.000000e+00> : vector<8x8xf32>
    %60 = tpu.matmul %38, %59, %cst_48 {dimension_numbers = #tpu.dot_dimension_numbers<[1], [1], [0], [0], [0, 0, 1, 0], [], []>} : vector<8x8xf32>, vector<8x8xf32>, vector<8x8xf32> -> vector<8x8xf32>
    %c0_49 = arith.constant 0 : index
    %c0_50 = arith.constant 0 : index
    %c0_51 = arith.constant 0 : index
    %61 = vector.load %arg7[%c0_49, %c0_50, %c0_51] : memref<4x1x8xf32, #tpu.memory_space<vmem>>, vector<1x1x8xf32>
    %62 = vector.shape_cast %61 : vector<1x1x8xf32> to vector<1x8xf32>
    %63 = vector.broadcast %62 : vector<1x8xf32> to vector<8x8xf32>
    %64 = arith.addf %60, %63 : vector<8x8xf32>
    %65 = arith.addf %57, %64 : vector<8x8xf32>
    %cst_52 = arith.constant 0.353553385 : f32
    %66 = vector.broadcast %cst_52 : f32 to vector<8x8xf32>
    %67 = arith.mulf %65, %66 : vector<8x8xf32>
    %68 = arith.addf %67, %5 : vector<8x8xf32>
    %cst_53 = arith.constant dense<0xFF800000> : vector<8xf32>
    %69 = vector.multi_reduction <maximumf>, %68, %cst_53 [1] : vector<8x8xf32> to vector<8xf32>
    %70 = vector.shape_cast %69 : vector<8xf32> to vector<8x1xf32>
    %71 = vector.broadcast %70 : vector<8x1xf32> to vector<8x8xf32>
    %72 = arith.subf %68, %71 : vector<8x8xf32>
    %73 = math.exp %72 : vector<8x8xf32>
    %cst_54 = arith.constant dense<0.000000e+00> : vector<8xf32>
    %74 = vector.multi_reduction <add>, %73, %cst_54 [1] : vector<8x8xf32> to vector<8xf32>
    %75 = vector.shape_cast %74 : vector<8xf32> to vector<8x1xf32>
    %76 = tpu.reciprocal %75 {approx = true} : vector<8x1xf32> -> vector<8x1xf32>
    %77 = vector.broadcast %76 : vector<8x1xf32> to vector<8x8xf32>
    %78 = arith.mulf %73, %77 : vector<8x8xf32>
    %cst_55 = arith.constant dense<0.000000e+00> : vector<8x8xf32>
    %79 = tpu.matmul %78, %52, %cst_55 {dimension_numbers = #tpu.dot_dimension_numbers<[1], [0], [0], [1], [0, 0, 1, 1], [], []>} : vector<8x8xf32>, vector<8x8xf32>, vector<8x8xf32> -> vector<8x8xf32>
    %c0_56 = arith.constant 0 : index
    %c0_57 = arith.constant 0 : index
    %c0_58 = arith.constant 0 : index
    %80 = vector.load %arg13[%c0_56, %c0_57, %c0_58] : memref<4x8x32xf32, #tpu.memory_space<vmem>>, vector<1x8x32xf32>
    %81 = vector.shape_cast %80 : vector<1x8x32xf32> to vector<8x32xf32>
    %cst_59 = arith.constant dense<0.000000e+00> : vector<8x32xf32>
    %82 = tpu.matmul %79, %81, %cst_59 {dimension_numbers = #tpu.dot_dimension_numbers<[1], [0], [0], [1], [0, 0, 1, 1], [], []>} : vector<8x8xf32>, vector<8x32xf32>, vector<8x32xf32> -> vector<8x32xf32>
    %83 = arith.addf %31, %82 : vector<8x32xf32>
    %c1 = arith.constant 1 : index
    %c0_60 = arith.constant 0 : index
    %c0_61 = arith.constant 0 : index
    %84 = vector.load %arg10[%c1, %c0_60, %c0_61] : memref<4x32x8xf32, #tpu.memory_space<vmem>>, vector<1x32x8xf32>
    %85 = vector.shape_cast %84 : vector<1x32x8xf32> to vector<32x8xf32>
    %cst_62 = arith.constant dense<0.000000e+00> : vector<8x8xf32>
    %86 = tpu.matmul %30, %85, %cst_62 {dimension_numbers = #tpu.dot_dimension_numbers<[1], [0], [0], [1], [0, 0, 1, 1], [], []>} : vector<8x32xf32>, vector<32x8xf32>, vector<8x8xf32> -> vector<8x8xf32>
    %c1_63 = arith.constant 1 : index
    %c0_64 = arith.constant 0 : index
    %c0_65 = arith.constant 0 : index
    %87 = vector.load %arg14[%c1_63, %c0_64, %c0_65] : memref<4x1x8xf32, #tpu.memory_space<vmem>>, vector<1x1x8xf32>
    %88 = vector.shape_cast %87 : vector<1x1x8xf32> to vector<1x8xf32>
    %89 = vector.broadcast %88 : vector<1x8xf32> to vector<8x8xf32>
    %90 = arith.addf %86, %89 : vector<8x8xf32>
    %c1_66 = arith.constant 1 : index
    %c0_67 = arith.constant 0 : index
    %c0_68 = arith.constant 0 : index
    %91 = vector.load %arg11[%c1_66, %c0_67, %c0_68] : memref<4x32x8xf32, #tpu.memory_space<vmem>>, vector<1x32x8xf32>
    %92 = vector.shape_cast %91 : vector<1x32x8xf32> to vector<32x8xf32>
    %cst_69 = arith.constant dense<0.000000e+00> : vector<8x8xf32>
    %93 = tpu.matmul %30, %92, %cst_69 {dimension_numbers = #tpu.dot_dimension_numbers<[1], [0], [0], [1], [0, 0, 1, 1], [], []>} : vector<8x32xf32>, vector<32x8xf32>, vector<8x8xf32> -> vector<8x8xf32>
    %c1_70 = arith.constant 1 : index
    %c0_71 = arith.constant 0 : index
    %c0_72 = arith.constant 0 : index
    %94 = vector.load %arg15[%c1_70, %c0_71, %c0_72] : memref<4x1x8xf32, #tpu.memory_space<vmem>>, vector<1x1x8xf32>
    %95 = vector.shape_cast %94 : vector<1x1x8xf32> to vector<1x8xf32>
    %96 = vector.broadcast %95 : vector<1x8xf32> to vector<8x8xf32>
    %97 = arith.addf %93, %96 : vector<8x8xf32>
    %c1_73 = arith.constant 1 : index
    %c0_74 = arith.constant 0 : index
    %c0_75 = arith.constant 0 : index
    %98 = vector.load %arg12[%c1_73, %c0_74, %c0_75] : memref<4x32x8xf32, #tpu.memory_space<vmem>>, vector<1x32x8xf32>
    %99 = vector.shape_cast %98 : vector<1x32x8xf32> to vector<32x8xf32>
    %cst_76 = arith.constant dense<0.000000e+00> : vector<8x8xf32>
    %100 = tpu.matmul %30, %99, %cst_76 {dimension_numbers = #tpu.dot_dimension_numbers<[1], [0], [0], [1], [0, 0, 1, 1], [], []>} : vector<8x32xf32>, vector<32x8xf32>, vector<8x8xf32> -> vector<8x8xf32>
    %c1_77 = arith.constant 1 : index
    %c0_78 = arith.constant 0 : index
    %c0_79 = arith.constant 0 : index
    %101 = vector.load %arg16[%c1_77, %c0_78, %c0_79] : memref<4x1x8xf32, #tpu.memory_space<vmem>>, vector<1x1x8xf32>
    %102 = vector.shape_cast %101 : vector<1x1x8xf32> to vector<1x8xf32>
    %103 = vector.broadcast %102 : vector<1x8xf32> to vector<8x8xf32>
    %104 = arith.addf %100, %103 : vector<8x8xf32>
    %c1_80 = arith.constant 1 : index
    %c0_81 = arith.constant 0 : index
    %c0_82 = arith.constant 0 : index
    %105 = vector.load %arg6[%c1_80, %c0_81, %c0_82] : memref<4x1x8xf32, #tpu.memory_space<vmem>>, vector<1x1x8xf32>
    %106 = vector.shape_cast %105 : vector<1x1x8xf32> to vector<1x8xf32>
    %107 = vector.broadcast %106 : vector<1x8xf32> to vector<8x8xf32>
    %108 = arith.addf %90, %107 : vector<8x8xf32>
    %cst_83 = arith.constant dense<0.000000e+00> : vector<8x8xf32>
    %109 = tpu.matmul %108, %97, %cst_83 {dimension_numbers = #tpu.dot_dimension_numbers<[1], [1], [0], [0], [0, 0, 1, 0], [], []>} : vector<8x8xf32>, vector<8x8xf32>, vector<8x8xf32> -> vector<8x8xf32>
    %c1_84 = arith.constant 1 : index
    %c0_85 = arith.constant 0 : index
    %c0_86 = arith.constant 0 : index
    %110 = vector.load %arg5[%c1_84, %c0_85, %c0_86] : memref<4x8x8xf32, #tpu.memory_space<vmem>>, vector<1x8x8xf32>
    %111 = vector.shape_cast %110 : vector<1x8x8xf32> to vector<8x8xf32>
    %cst_87 = arith.constant dense<0.000000e+00> : vector<8x8xf32>
    %112 = tpu.matmul %90, %111, %cst_87 {dimension_numbers = #tpu.dot_dimension_numbers<[1], [1], [0], [0], [0, 0, 1, 0], [], []>} : vector<8x8xf32>, vector<8x8xf32>, vector<8x8xf32> -> vector<8x8xf32>
    %c1_88 = arith.constant 1 : index
    %c0_89 = arith.constant 0 : index
    %c0_90 = arith.constant 0 : index
    %113 = vector.load %arg7[%c1_88, %c0_89, %c0_90] : memref<4x1x8xf32, #tpu.memory_space<vmem>>, vector<1x1x8xf32>
    %114 = vector.shape_cast %113 : vector<1x1x8xf32> to vector<1x8xf32>
    %115 = vector.broadcast %114 : vector<1x8xf32> to vector<8x8xf32>
    %116 = arith.addf %112, %115 : vector<8x8xf32>
    %117 = arith.addf %109, %116 : vector<8x8xf32>
    %cst_91 = arith.constant 0.353553385 : f32
    %118 = vector.broadcast %cst_91 : f32 to vector<8x8xf32>
    %119 = arith.mulf %117, %118 : vector<8x8xf32>
    %120 = arith.addf %119, %5 : vector<8x8xf32>
    %cst_92 = arith.constant dense<0xFF800000> : vector<8xf32>
    %121 = vector.multi_reduction <maximumf>, %120, %cst_92 [1] : vector<8x8xf32> to vector<8xf32>
    %122 = vector.shape_cast %121 : vector<8xf32> to vector<8x1xf32>
    %123 = vector.broadcast %122 : vector<8x1xf32> to vector<8x8xf32>
    %124 = arith.subf %120, %123 : vector<8x8xf32>
    %125 = math.exp %124 : vector<8x8xf32>
    %cst_93 = arith.constant dense<0.000000e+00> : vector<8xf32>
    %126 = vector.multi_reduction <add>, %125, %cst_93 [1] : vector<8x8xf32> to vector<8xf32>
    %127 = vector.shape_cast %126 : vector<8xf32> to vector<8x1xf32>
    %128 = tpu.reciprocal %127 {approx = true} : vector<8x1xf32> -> vector<8x1xf32>
    %129 = vector.broadcast %128 : vector<8x1xf32> to vector<8x8xf32>
    %130 = arith.mulf %125, %129 : vector<8x8xf32>
    %cst_94 = arith.constant dense<0.000000e+00> : vector<8x8xf32>
    %131 = tpu.matmul %130, %104, %cst_94 {dimension_numbers = #tpu.dot_dimension_numbers<[1], [0], [0], [1], [0, 0, 1, 1], [], []>} : vector<8x8xf32>, vector<8x8xf32>, vector<8x8xf32> -> vector<8x8xf32>
    %c1_95 = arith.constant 1 : index
    %c0_96 = arith.constant 0 : index
    %c0_97 = arith.constant 0 : index
    %132 = vector.load %arg13[%c1_95, %c0_96, %c0_97] : memref<4x8x32xf32, #tpu.memory_space<vmem>>, vector<1x8x32xf32>
    %133 = vector.shape_cast %132 : vector<1x8x32xf32> to vector<8x32xf32>
    %cst_98 = arith.constant dense<0.000000e+00> : vector<8x32xf32>
    %134 = tpu.matmul %131, %133, %cst_98 {dimension_numbers = #tpu.dot_dimension_numbers<[1], [0], [0], [1], [0, 0, 1, 1], [], []>} : vector<8x8xf32>, vector<8x32xf32>, vector<8x32xf32> -> vector<8x32xf32>
    %135 = arith.addf %83, %134 : vector<8x32xf32>
    %c2 = arith.constant 2 : index
    %c0_99 = arith.constant 0 : index
    %c0_100 = arith.constant 0 : index
    %136 = vector.load %arg10[%c2, %c0_99, %c0_100] : memref<4x32x8xf32, #tpu.memory_space<vmem>>, vector<1x32x8xf32>
    %137 = vector.shape_cast %136 : vector<1x32x8xf32> to vector<32x8xf32>
    %cst_101 = arith.constant dense<0.000000e+00> : vector<8x8xf32>
    %138 = tpu.matmul %30, %137, %cst_101 {dimension_numbers = #tpu.dot_dimension_numbers<[1], [0], [0], [1], [0, 0, 1, 1], [], []>} : vector<8x32xf32>, vector<32x8xf32>, vector<8x8xf32> -> vector<8x8xf32>
    %c2_102 = arith.constant 2 : index
    %c0_103 = arith.constant 0 : index
    %c0_104 = arith.constant 0 : index
    %139 = vector.load %arg14[%c2_102, %c0_103, %c0_104] : memref<4x1x8xf32, #tpu.memory_space<vmem>>, vector<1x1x8xf32>
    %140 = vector.shape_cast %139 : vector<1x1x8xf32> to vector<1x8xf32>
    %141 = vector.broadcast %140 : vector<1x8xf32> to vector<8x8xf32>
    %142 = arith.addf %138, %141 : vector<8x8xf32>
    %c2_105 = arith.constant 2 : index
    %c0_106 = arith.constant 0 : index
    %c0_107 = arith.constant 0 : index
    %143 = vector.load %arg11[%c2_105, %c0_106, %c0_107] : memref<4x32x8xf32, #tpu.memory_space<vmem>>, vector<1x32x8xf32>
    %144 = vector.shape_cast %143 : vector<1x32x8xf32> to vector<32x8xf32>
    %cst_108 = arith.constant dense<0.000000e+00> : vector<8x8xf32>
    %145 = tpu.matmul %30, %144, %cst_108 {dimension_numbers = #tpu.dot_dimension_numbers<[1], [0], [0], [1], [0, 0, 1, 1], [], []>} : vector<8x32xf32>, vector<32x8xf32>, vector<8x8xf32> -> vector<8x8xf32>
    %c2_109 = arith.constant 2 : index
    %c0_110 = arith.constant 0 : index
    %c0_111 = arith.constant 0 : index
    %146 = vector.load %arg15[%c2_109, %c0_110, %c0_111] : memref<4x1x8xf32, #tpu.memory_space<vmem>>, vector<1x1x8xf32>
    %147 = vector.shape_cast %146 : vector<1x1x8xf32> to vector<1x8xf32>
    %148 = vector.broadcast %147 : vector<1x8xf32> to vector<8x8xf32>
    %149 = arith.addf %145, %148 : vector<8x8xf32>
    %c2_112 = arith.constant 2 : index
    %c0_113 = arith.constant 0 : index
    %c0_114 = arith.constant 0 : index
    %150 = vector.load %arg12[%c2_112, %c0_113, %c0_114] : memref<4x32x8xf32, #tpu.memory_space<vmem>>, vector<1x32x8xf32>
    %151 = vector.shape_cast %150 : vector<1x32x8xf32> to vector<32x8xf32>
    %cst_115 = arith.constant dense<0.000000e+00> : vector<8x8xf32>
    %152 = tpu.matmul %30, %151, %cst_115 {dimension_numbers = #tpu.dot_dimension_numbers<[1], [0], [0], [1], [0, 0, 1, 1], [], []>} : vector<8x32xf32>, vector<32x8xf32>, vector<8x8xf32> -> vector<8x8xf32>
    %c2_116 = arith.constant 2 : index
    %c0_117 = arith.constant 0 : index
    %c0_118 = arith.constant 0 : index
    %153 = vector.load %arg16[%c2_116, %c0_117, %c0_118] : memref<4x1x8xf32, #tpu.memory_space<vmem>>, vector<1x1x8xf32>
    %154 = vector.shape_cast %153 : vector<1x1x8xf32> to vector<1x8xf32>
    %155 = vector.broadcast %154 : vector<1x8xf32> to vector<8x8xf32>
    %156 = arith.addf %152, %155 : vector<8x8xf32>
    %c2_119 = arith.constant 2 : index
    %c0_120 = arith.constant 0 : index
    %c0_121 = arith.constant 0 : index
    %157 = vector.load %arg6[%c2_119, %c0_120, %c0_121] : memref<4x1x8xf32, #tpu.memory_space<vmem>>, vector<1x1x8xf32>
    %158 = vector.shape_cast %157 : vector<1x1x8xf32> to vector<1x8xf32>
    %159 = vector.broadcast %158 : vector<1x8xf32> to vector<8x8xf32>
    %160 = arith.addf %142, %159 : vector<8x8xf32>
    %cst_122 = arith.constant dense<0.000000e+00> : vector<8x8xf32>
    %161 = tpu.matmul %160, %149, %cst_122 {dimension_numbers = #tpu.dot_dimension_numbers<[1], [1], [0], [0], [0, 0, 1, 0], [], []>} : vector<8x8xf32>, vector<8x8xf32>, vector<8x8xf32> -> vector<8x8xf32>
    %c2_123 = arith.constant 2 : index
    %c0_124 = arith.constant 0 : index
    %c0_125 = arith.constant 0 : index
    %162 = vector.load %arg5[%c2_123, %c0_124, %c0_125] : memref<4x8x8xf32, #tpu.memory_space<vmem>>, vector<1x8x8xf32>
    %163 = vector.shape_cast %162 : vector<1x8x8xf32> to vector<8x8xf32>
    %cst_126 = arith.constant dense<0.000000e+00> : vector<8x8xf32>
    %164 = tpu.matmul %142, %163, %cst_126 {dimension_numbers = #tpu.dot_dimension_numbers<[1], [1], [0], [0], [0, 0, 1, 0], [], []>} : vector<8x8xf32>, vector<8x8xf32>, vector<8x8xf32> -> vector<8x8xf32>
    %c2_127 = arith.constant 2 : index
    %c0_128 = arith.constant 0 : index
    %c0_129 = arith.constant 0 : index
    %165 = vector.load %arg7[%c2_127, %c0_128, %c0_129] : memref<4x1x8xf32, #tpu.memory_space<vmem>>, vector<1x1x8xf32>
    %166 = vector.shape_cast %165 : vector<1x1x8xf32> to vector<1x8xf32>
    %167 = vector.broadcast %166 : vector<1x8xf32> to vector<8x8xf32>
    %168 = arith.addf %164, %167 : vector<8x8xf32>
    %169 = arith.addf %161, %168 : vector<8x8xf32>
    %cst_130 = arith.constant 0.353553385 : f32
    %170 = vector.broadcast %cst_130 : f32 to vector<8x8xf32>
    %171 = arith.mulf %169, %170 : vector<8x8xf32>
    %172 = arith.addf %171, %5 : vector<8x8xf32>
    %cst_131 = arith.constant dense<0xFF800000> : vector<8xf32>
    %173 = vector.multi_reduction <maximumf>, %172, %cst_131 [1] : vector<8x8xf32> to vector<8xf32>
    %174 = vector.shape_cast %173 : vector<8xf32> to vector<8x1xf32>
    %175 = vector.broadcast %174 : vector<8x1xf32> to vector<8x8xf32>
    %176 = arith.subf %172, %175 : vector<8x8xf32>
    %177 = math.exp %176 : vector<8x8xf32>
    %cst_132 = arith.constant dense<0.000000e+00> : vector<8xf32>
    %178 = vector.multi_reduction <add>, %177, %cst_132 [1] : vector<8x8xf32> to vector<8xf32>
    %179 = vector.shape_cast %178 : vector<8xf32> to vector<8x1xf32>
    %180 = tpu.reciprocal %179 {approx = true} : vector<8x1xf32> -> vector<8x1xf32>
    %181 = vector.broadcast %180 : vector<8x1xf32> to vector<8x8xf32>
    %182 = arith.mulf %177, %181 : vector<8x8xf32>
    %cst_133 = arith.constant dense<0.000000e+00> : vector<8x8xf32>
    %183 = tpu.matmul %182, %156, %cst_133 {dimension_numbers = #tpu.dot_dimension_numbers<[1], [0], [0], [1], [0, 0, 1, 1], [], []>} : vector<8x8xf32>, vector<8x8xf32>, vector<8x8xf32> -> vector<8x8xf32>
    %c2_134 = arith.constant 2 : index
    %c0_135 = arith.constant 0 : index
    %c0_136 = arith.constant 0 : index
    %184 = vector.load %arg13[%c2_134, %c0_135, %c0_136] : memref<4x8x32xf32, #tpu.memory_space<vmem>>, vector<1x8x32xf32>
    %185 = vector.shape_cast %184 : vector<1x8x32xf32> to vector<8x32xf32>
    %cst_137 = arith.constant dense<0.000000e+00> : vector<8x32xf32>
    %186 = tpu.matmul %183, %185, %cst_137 {dimension_numbers = #tpu.dot_dimension_numbers<[1], [0], [0], [1], [0, 0, 1, 1], [], []>} : vector<8x8xf32>, vector<8x32xf32>, vector<8x32xf32> -> vector<8x32xf32>
    %187 = arith.addf %135, %186 : vector<8x32xf32>
    %c3 = arith.constant 3 : index
    %c0_138 = arith.constant 0 : index
    %c0_139 = arith.constant 0 : index
    %188 = vector.load %arg10[%c3, %c0_138, %c0_139] : memref<4x32x8xf32, #tpu.memory_space<vmem>>, vector<1x32x8xf32>
    %189 = vector.shape_cast %188 : vector<1x32x8xf32> to vector<32x8xf32>
    %cst_140 = arith.constant dense<0.000000e+00> : vector<8x8xf32>
    %190 = tpu.matmul %30, %189, %cst_140 {dimension_numbers = #tpu.dot_dimension_numbers<[1], [0], [0], [1], [0, 0, 1, 1], [], []>} : vector<8x32xf32>, vector<32x8xf32>, vector<8x8xf32> -> vector<8x8xf32>
    %c3_141 = arith.constant 3 : index
    %c0_142 = arith.constant 0 : index
    %c0_143 = arith.constant 0 : index
    %191 = vector.load %arg14[%c3_141, %c0_142, %c0_143] : memref<4x1x8xf32, #tpu.memory_space<vmem>>, vector<1x1x8xf32>
    %192 = vector.shape_cast %191 : vector<1x1x8xf32> to vector<1x8xf32>
    %193 = vector.broadcast %192 : vector<1x8xf32> to vector<8x8xf32>
    %194 = arith.addf %190, %193 : vector<8x8xf32>
    %c3_144 = arith.constant 3 : index
    %c0_145 = arith.constant 0 : index
    %c0_146 = arith.constant 0 : index
    %195 = vector.load %arg11[%c3_144, %c0_145, %c0_146] : memref<4x32x8xf32, #tpu.memory_space<vmem>>, vector<1x32x8xf32>
    %196 = vector.shape_cast %195 : vector<1x32x8xf32> to vector<32x8xf32>
    %cst_147 = arith.constant dense<0.000000e+00> : vector<8x8xf32>
    %197 = tpu.matmul %30, %196, %cst_147 {dimension_numbers = #tpu.dot_dimension_numbers<[1], [0], [0], [1], [0, 0, 1, 1], [], []>} : vector<8x32xf32>, vector<32x8xf32>, vector<8x8xf32> -> vector<8x8xf32>
    %c3_148 = arith.constant 3 : index
    %c0_149 = arith.constant 0 : index
    %c0_150 = arith.constant 0 : index
    %198 = vector.load %arg15[%c3_148, %c0_149, %c0_150] : memref<4x1x8xf32, #tpu.memory_space<vmem>>, vector<1x1x8xf32>
    %199 = vector.shape_cast %198 : vector<1x1x8xf32> to vector<1x8xf32>
    %200 = vector.broadcast %199 : vector<1x8xf32> to vector<8x8xf32>
    %201 = arith.addf %197, %200 : vector<8x8xf32>
    %c3_151 = arith.constant 3 : index
    %c0_152 = arith.constant 0 : index
    %c0_153 = arith.constant 0 : index
    %202 = vector.load %arg12[%c3_151, %c0_152, %c0_153] : memref<4x32x8xf32, #tpu.memory_space<vmem>>, vector<1x32x8xf32>
    %203 = vector.shape_cast %202 : vector<1x32x8xf32> to vector<32x8xf32>
    %cst_154 = arith.constant dense<0.000000e+00> : vector<8x8xf32>
    %204 = tpu.matmul %30, %203, %cst_154 {dimension_numbers = #tpu.dot_dimension_numbers<[1], [0], [0], [1], [0, 0, 1, 1], [], []>} : vector<8x32xf32>, vector<32x8xf32>, vector<8x8xf32> -> vector<8x8xf32>
    %c3_155 = arith.constant 3 : index
    %c0_156 = arith.constant 0 : index
    %c0_157 = arith.constant 0 : index
    %205 = vector.load %arg16[%c3_155, %c0_156, %c0_157] : memref<4x1x8xf32, #tpu.memory_space<vmem>>, vector<1x1x8xf32>
    %206 = vector.shape_cast %205 : vector<1x1x8xf32> to vector<1x8xf32>
    %207 = vector.broadcast %206 : vector<1x8xf32> to vector<8x8xf32>
    %208 = arith.addf %204, %207 : vector<8x8xf32>
    %c3_158 = arith.constant 3 : index
    %c0_159 = arith.constant 0 : index
    %c0_160 = arith.constant 0 : index
    %209 = vector.load %arg6[%c3_158, %c0_159, %c0_160] : memref<4x1x8xf32, #tpu.memory_space<vmem>>, vector<1x1x8xf32>
    %210 = vector.shape_cast %209 : vector<1x1x8xf32> to vector<1x8xf32>
    %211 = vector.broadcast %210 : vector<1x8xf32> to vector<8x8xf32>
    %212 = arith.addf %194, %211 : vector<8x8xf32>
    %cst_161 = arith.constant dense<0.000000e+00> : vector<8x8xf32>
    %213 = tpu.matmul %212, %201, %cst_161 {dimension_numbers = #tpu.dot_dimension_numbers<[1], [1], [0], [0], [0, 0, 1, 0], [], []>} : vector<8x8xf32>, vector<8x8xf32>, vector<8x8xf32> -> vector<8x8xf32>
    %c3_162 = arith.constant 3 : index
    %c0_163 = arith.constant 0 : index
    %c0_164 = arith.constant 0 : index
    %214 = vector.load %arg5[%c3_162, %c0_163, %c0_164] : memref<4x8x8xf32, #tpu.memory_space<vmem>>, vector<1x8x8xf32>
    %215 = vector.shape_cast %214 : vector<1x8x8xf32> to vector<8x8xf32>
    %cst_165 = arith.constant dense<0.000000e+00> : vector<8x8xf32>
    %216 = tpu.matmul %194, %215, %cst_165 {dimension_numbers = #tpu.dot_dimension_numbers<[1], [1], [0], [0], [0, 0, 1, 0], [], []>} : vector<8x8xf32>, vector<8x8xf32>, vector<8x8xf32> -> vector<8x8xf32>
    %c3_166 = arith.constant 3 : index
    %c0_167 = arith.constant 0 : index
    %c0_168 = arith.constant 0 : index
    %217 = vector.load %arg7[%c3_166, %c0_167, %c0_168] : memref<4x1x8xf32, #tpu.memory_space<vmem>>, vector<1x1x8xf32>
    %218 = vector.shape_cast %217 : vector<1x1x8xf32> to vector<1x8xf32>
    %219 = vector.broadcast %218 : vector<1x8xf32> to vector<8x8xf32>
    %220 = arith.addf %216, %219 : vector<8x8xf32>
    %221 = arith.addf %213, %220 : vector<8x8xf32>
    %cst_169 = arith.constant 0.353553385 : f32
    %222 = vector.broadcast %cst_169 : f32 to vector<8x8xf32>
    %223 = arith.mulf %221, %222 : vector<8x8xf32>
    %224 = arith.addf %223, %5 : vector<8x8xf32>
    %cst_170 = arith.constant dense<0xFF800000> : vector<8xf32>
    %225 = vector.multi_reduction <maximumf>, %224, %cst_170 [1] : vector<8x8xf32> to vector<8xf32>
    %226 = vector.shape_cast %225 : vector<8xf32> to vector<8x1xf32>
    %227 = vector.broadcast %226 : vector<8x1xf32> to vector<8x8xf32>
    %228 = arith.subf %224, %227 : vector<8x8xf32>
    %229 = math.exp %228 : vector<8x8xf32>
    %cst_171 = arith.constant dense<0.000000e+00> : vector<8xf32>
    %230 = vector.multi_reduction <add>, %229, %cst_171 [1] : vector<8x8xf32> to vector<8xf32>
    %231 = vector.shape_cast %230 : vector<8xf32> to vector<8x1xf32>
    %232 = tpu.reciprocal %231 {approx = true} : vector<8x1xf32> -> vector<8x1xf32>
    %233 = vector.broadcast %232 : vector<8x1xf32> to vector<8x8xf32>
    %234 = arith.mulf %229, %233 : vector<8x8xf32>
    %cst_172 = arith.constant dense<0.000000e+00> : vector<8x8xf32>
    %235 = tpu.matmul %234, %208, %cst_172 {dimension_numbers = #tpu.dot_dimension_numbers<[1], [0], [0], [1], [0, 0, 1, 1], [], []>} : vector<8x8xf32>, vector<8x8xf32>, vector<8x8xf32> -> vector<8x8xf32>
    %c3_173 = arith.constant 3 : index
    %c0_174 = arith.constant 0 : index
    %c0_175 = arith.constant 0 : index
    %236 = vector.load %arg13[%c3_173, %c0_174, %c0_175] : memref<4x8x32xf32, #tpu.memory_space<vmem>>, vector<1x8x32xf32>
    %237 = vector.shape_cast %236 : vector<1x8x32xf32> to vector<8x32xf32>
    %cst_176 = arith.constant dense<0.000000e+00> : vector<8x32xf32>
    %238 = tpu.matmul %235, %237, %cst_176 {dimension_numbers = #tpu.dot_dimension_numbers<[1], [0], [0], [1], [0, 0, 1, 1], [], []>} : vector<8x8xf32>, vector<8x32xf32>, vector<8x32xf32> -> vector<8x32xf32>
    %239 = arith.addf %187, %238 : vector<8x32xf32>
    %240 = arith.addf %1, %239 : vector<8x32xf32>
    %c0_177 = arith.constant 0 : index
    %c0_178 = arith.constant 0 : index
    %241 = vector.load %arg17[%c0_177, %c0_178] : memref<1x32xf32, #tpu.memory_space<vmem>>, vector<1x32xf32>
    %242 = vector.broadcast %241 : vector<1x32xf32> to vector<8x32xf32>
    %243 = arith.addf %240, %242 : vector<8x32xf32>
    %cst_179 = arith.constant dense<0.000000e+00> : vector<8xf32>
    %244 = vector.multi_reduction <add>, %243, %cst_179 [1] : vector<8x32xf32> to vector<8xf32>
    %245 = vector.shape_cast %244 : vector<8xf32> to vector<8x1xf32>
    %cst_180 = arith.constant 3.200000e+01 : f32
    %246 = vector.broadcast %cst_180 : f32 to vector<8x1xf32>
    %247 = arith.divf %245, %246 : vector<8x1xf32>
    %248 = vector.broadcast %247 : vector<8x1xf32> to vector<8x32xf32>
    %249 = arith.subf %243, %248 : vector<8x32xf32>
    %250 = arith.mulf %249, %249 : vector<8x32xf32>
    %cst_181 = arith.constant dense<0.000000e+00> : vector<8xf32>
    %251 = vector.multi_reduction <add>, %250, %cst_181 [1] : vector<8x32xf32> to vector<8xf32>
    %252 = vector.shape_cast %251 : vector<8xf32> to vector<8x1xf32>
    %cst_182 = arith.constant 3.100000e+01 : f32
    %253 = vector.broadcast %cst_182 : f32 to vector<8x1xf32>
    %254 = arith.divf %252, %253 : vector<8x1xf32>
    %255 = math.sqrt %254 : vector<8x1xf32>
    %cst_183 = arith.constant 9.99999997E-7 : f32
    %256 = vector.broadcast %cst_183 : f32 to vector<8x1xf32>
    %257 = arith.addf %255, %256 : vector<8x1xf32>
    %258 = tpu.reciprocal %257 {approx = true} : vector<8x1xf32> -> vector<8x1xf32>
    %c0_184 = arith.constant 0 : index
    %c0_185 = arith.constant 0 : index
    %259 = vector.load %arg18[%c0_184, %c0_185] : memref<1x32xf32, #tpu.memory_space<vmem>>, vector<1x32xf32>
    %260 = vector.broadcast %259 : vector<1x32xf32> to vector<8x32xf32>
    %261 = arith.mulf %260, %249 : vector<8x32xf32>
    %262 = vector.broadcast %258 : vector<8x1xf32> to vector<8x32xf32>
    %263 = arith.mulf %261, %262 : vector<8x32xf32>
    %c0_186 = arith.constant 0 : index
    %c0_187 = arith.constant 0 : index
    %264 = vector.load %arg19[%c0_186, %c0_187] : memref<1x32xf32, #tpu.memory_space<vmem>>, vector<1x32xf32>
    %265 = vector.broadcast %264 : vector<1x32xf32> to vector<8x32xf32>
    %266 = arith.addf %263, %265 : vector<8x32xf32>
    %cst_188 = arith.constant 0.000000e+00 : f32
    %267 = vector.broadcast %cst_188 : f32 to vector<8x32xf32>
    %c0_189 = arith.constant 0 : index
    %c0_190 = arith.constant 0 : index
    %c0_191 = arith.constant 0 : index
    %268 = vector.load %arg20[%c0_189, %c0_190, %c0_191] : memref<4x32x8xf32, #tpu.memory_space<vmem>>, vector<1x32x8xf32>
    %269 = vector.shape_cast %268 : vector<1x32x8xf32> to vector<32x8xf32>
    %cst_192 = arith.constant dense<0.000000e+00> : vector<8x8xf32>
    %270 = tpu.matmul %266, %269, %cst_192 {dimension_numbers = #tpu.dot_dimension_numbers<[1], [0], [0], [1], [0, 0, 1, 1], [], []>} : vector<8x32xf32>, vector<32x8xf32>, vector<8x8xf32> -> vector<8x8xf32>
    %c0_193 = arith.constant 0 : index
    %c0_194 = arith.constant 0 : index
    %c0_195 = arith.constant 0 : index
    %271 = vector.load %arg24[%c0_193, %c0_194, %c0_195] : memref<4x1x8xf32, #tpu.memory_space<vmem>>, vector<1x1x8xf32>
    %272 = vector.shape_cast %271 : vector<1x1x8xf32> to vector<1x8xf32>
    %273 = vector.broadcast %272 : vector<1x8xf32> to vector<8x8xf32>
    %274 = arith.addf %270, %273 : vector<8x8xf32>
    %c0_196 = arith.constant 0 : index
    %c0_197 = arith.constant 0 : index
    %c0_198 = arith.constant 0 : index
    %275 = vector.load %arg21[%c0_196, %c0_197, %c0_198] : memref<4x32x8xf32, #tpu.memory_space<vmem>>, vector<1x32x8xf32>
    %276 = vector.shape_cast %275 : vector<1x32x8xf32> to vector<32x8xf32>
    %cst_199 = arith.constant dense<0.000000e+00> : vector<8x8xf32>
    %277 = tpu.matmul %3, %276, %cst_199 {dimension_numbers = #tpu.dot_dimension_numbers<[1], [0], [0], [1], [0, 0, 1, 1], [], []>} : vector<8x32xf32>, vector<32x8xf32>, vector<8x8xf32> -> vector<8x8xf32>
    %c0_200 = arith.constant 0 : index
    %c0_201 = arith.constant 0 : index
    %c0_202 = arith.constant 0 : index
    %278 = vector.load %arg25[%c0_200, %c0_201, %c0_202] : memref<4x1x8xf32, #tpu.memory_space<vmem>>, vector<1x1x8xf32>
    %279 = vector.shape_cast %278 : vector<1x1x8xf32> to vector<1x8xf32>
    %280 = vector.broadcast %279 : vector<1x8xf32> to vector<8x8xf32>
    %281 = arith.addf %277, %280 : vector<8x8xf32>
    %c0_203 = arith.constant 0 : index
    %c0_204 = arith.constant 0 : index
    %c0_205 = arith.constant 0 : index
    %282 = vector.load %arg22[%c0_203, %c0_204, %c0_205] : memref<4x32x8xf32, #tpu.memory_space<vmem>>, vector<1x32x8xf32>
    %283 = vector.shape_cast %282 : vector<1x32x8xf32> to vector<32x8xf32>
    %cst_206 = arith.constant dense<0.000000e+00> : vector<8x8xf32>
    %284 = tpu.matmul %3, %283, %cst_206 {dimension_numbers = #tpu.dot_dimension_numbers<[1], [0], [0], [1], [0, 0, 1, 1], [], []>} : vector<8x32xf32>, vector<32x8xf32>, vector<8x8xf32> -> vector<8x8xf32>
    %c0_207 = arith.constant 0 : index
    %c0_208 = arith.constant 0 : index
    %c0_209 = arith.constant 0 : index
    %285 = vector.load %arg26[%c0_207, %c0_208, %c0_209] : memref<4x1x8xf32, #tpu.memory_space<vmem>>, vector<1x1x8xf32>
    %286 = vector.shape_cast %285 : vector<1x1x8xf32> to vector<1x8xf32>
    %287 = vector.broadcast %286 : vector<1x8xf32> to vector<8x8xf32>
    %288 = arith.addf %284, %287 : vector<8x8xf32>
    %cst_210 = arith.constant dense<0.000000e+00> : vector<8x8xf32>
    %289 = tpu.matmul %274, %281, %cst_210 {dimension_numbers = #tpu.dot_dimension_numbers<[1], [1], [0], [0], [0, 0, 1, 0], [], []>} : vector<8x8xf32>, vector<8x8xf32>, vector<8x8xf32> -> vector<8x8xf32>
    %cst_211 = arith.constant 0.353553385 : f32
    %290 = vector.broadcast %cst_211 : f32 to vector<8x8xf32>
    %291 = arith.mulf %289, %290 : vector<8x8xf32>
    %292 = arith.addf %291, %7 : vector<8x8xf32>
    %cst_212 = arith.constant dense<0xFF800000> : vector<8xf32>
    %293 = vector.multi_reduction <maximumf>, %292, %cst_212 [1] : vector<8x8xf32> to vector<8xf32>
    %294 = vector.shape_cast %293 : vector<8xf32> to vector<8x1xf32>
    %295 = vector.broadcast %294 : vector<8x1xf32> to vector<8x8xf32>
    %296 = arith.subf %292, %295 : vector<8x8xf32>
    %297 = math.exp %296 : vector<8x8xf32>
    %cst_213 = arith.constant dense<0.000000e+00> : vector<8xf32>
    %298 = vector.multi_reduction <add>, %297, %cst_213 [1] : vector<8x8xf32> to vector<8xf32>
    %299 = vector.shape_cast %298 : vector<8xf32> to vector<8x1xf32>
    %300 = tpu.reciprocal %299 {approx = true} : vector<8x1xf32> -> vector<8x1xf32>
    %301 = vector.broadcast %300 : vector<8x1xf32> to vector<8x8xf32>
    %302 = arith.mulf %297, %301 : vector<8x8xf32>
    %cst_214 = arith.constant dense<0.000000e+00> : vector<8x8xf32>
    %303 = tpu.matmul %302, %288, %cst_214 {dimension_numbers = #tpu.dot_dimension_numbers<[1], [0], [0], [1], [0, 0, 1, 1], [], []>} : vector<8x8xf32>, vector<8x8xf32>, vector<8x8xf32> -> vector<8x8xf32>
    %c0_215 = arith.constant 0 : index
    %c0_216 = arith.constant 0 : index
    %c0_217 = arith.constant 0 : index
    %304 = vector.load %arg23[%c0_215, %c0_216, %c0_217] : memref<4x8x32xf32, #tpu.memory_space<vmem>>, vector<1x8x32xf32>
    %305 = vector.shape_cast %304 : vector<1x8x32xf32> to vector<8x32xf32>
    %cst_218 = arith.constant dense<0.000000e+00> : vector<8x32xf32>
    %306 = tpu.matmul %303, %305, %cst_218 {dimension_numbers = #tpu.dot_dimension_numbers<[1], [0], [0], [1], [0, 0, 1, 1], [], []>} : vector<8x8xf32>, vector<8x32xf32>, vector<8x32xf32> -> vector<8x32xf32>
    %307 = arith.addf %267, %306 : vector<8x32xf32>
    %c1_219 = arith.constant 1 : index
    %c0_220 = arith.constant 0 : index
    %c0_221 = arith.constant 0 : index
    %308 = vector.load %arg20[%c1_219, %c0_220, %c0_221] : memref<4x32x8xf32, #tpu.memory_space<vmem>>, vector<1x32x8xf32>
    %309 = vector.shape_cast %308 : vector<1x32x8xf32> to vector<32x8xf32>
    %cst_222 = arith.constant dense<0.000000e+00> : vector<8x8xf32>
    %310 = tpu.matmul %266, %309, %cst_222 {dimension_numbers = #tpu.dot_dimension_numbers<[1], [0], [0], [1], [0, 0, 1, 1], [], []>} : vector<8x32xf32>, vector<32x8xf32>, vector<8x8xf32> -> vector<8x8xf32>
    %c1_223 = arith.constant 1 : index
    %c0_224 = arith.constant 0 : index
    %c0_225 = arith.constant 0 : index
    %311 = vector.load %arg24[%c1_223, %c0_224, %c0_225] : memref<4x1x8xf32, #tpu.memory_space<vmem>>, vector<1x1x8xf32>
    %312 = vector.shape_cast %311 : vector<1x1x8xf32> to vector<1x8xf32>
    %313 = vector.broadcast %312 : vector<1x8xf32> to vector<8x8xf32>
    %314 = arith.addf %310, %313 : vector<8x8xf32>
    %c1_226 = arith.constant 1 : index
    %c0_227 = arith.constant 0 : index
    %c0_228 = arith.constant 0 : index
    %315 = vector.load %arg21[%c1_226, %c0_227, %c0_228] : memref<4x32x8xf32, #tpu.memory_space<vmem>>, vector<1x32x8xf32>
    %316 = vector.shape_cast %315 : vector<1x32x8xf32> to vector<32x8xf32>
    %cst_229 = arith.constant dense<0.000000e+00> : vector<8x8xf32>
    %317 = tpu.matmul %3, %316, %cst_229 {dimension_numbers = #tpu.dot_dimension_numbers<[1], [0], [0], [1], [0, 0, 1, 1], [], []>} : vector<8x32xf32>, vector<32x8xf32>, vector<8x8xf32> -> vector<8x8xf32>
    %c1_230 = arith.constant 1 : index
    %c0_231 = arith.constant 0 : index
    %c0_232 = arith.constant 0 : index
    %318 = vector.load %arg25[%c1_230, %c0_231, %c0_232] : memref<4x1x8xf32, #tpu.memory_space<vmem>>, vector<1x1x8xf32>
    %319 = vector.shape_cast %318 : vector<1x1x8xf32> to vector<1x8xf32>
    %320 = vector.broadcast %319 : vector<1x8xf32> to vector<8x8xf32>
    %321 = arith.addf %317, %320 : vector<8x8xf32>
    %c1_233 = arith.constant 1 : index
    %c0_234 = arith.constant 0 : index
    %c0_235 = arith.constant 0 : index
    %322 = vector.load %arg22[%c1_233, %c0_234, %c0_235] : memref<4x32x8xf32, #tpu.memory_space<vmem>>, vector<1x32x8xf32>
    %323 = vector.shape_cast %322 : vector<1x32x8xf32> to vector<32x8xf32>
    %cst_236 = arith.constant dense<0.000000e+00> : vector<8x8xf32>
    %324 = tpu.matmul %3, %323, %cst_236 {dimension_numbers = #tpu.dot_dimension_numbers<[1], [0], [0], [1], [0, 0, 1, 1], [], []>} : vector<8x32xf32>, vector<32x8xf32>, vector<8x8xf32> -> vector<8x8xf32>
    %c1_237 = arith.constant 1 : index
    %c0_238 = arith.constant 0 : index
    %c0_239 = arith.constant 0 : index
    %325 = vector.load %arg26[%c1_237, %c0_238, %c0_239] : memref<4x1x8xf32, #tpu.memory_space<vmem>>, vector<1x1x8xf32>
    %326 = vector.shape_cast %325 : vector<1x1x8xf32> to vector<1x8xf32>
    %327 = vector.broadcast %326 : vector<1x8xf32> to vector<8x8xf32>
    %328 = arith.addf %324, %327 : vector<8x8xf32>
    %cst_240 = arith.constant dense<0.000000e+00> : vector<8x8xf32>
    %329 = tpu.matmul %314, %321, %cst_240 {dimension_numbers = #tpu.dot_dimension_numbers<[1], [1], [0], [0], [0, 0, 1, 0], [], []>} : vector<8x8xf32>, vector<8x8xf32>, vector<8x8xf32> -> vector<8x8xf32>
    %cst_241 = arith.constant 0.353553385 : f32
    %330 = vector.broadcast %cst_241 : f32 to vector<8x8xf32>
    %331 = arith.mulf %329, %330 : vector<8x8xf32>
    %332 = arith.addf %331, %7 : vector<8x8xf32>
    %cst_242 = arith.constant dense<0xFF800000> : vector<8xf32>
    %333 = vector.multi_reduction <maximumf>, %332, %cst_242 [1] : vector<8x8xf32> to vector<8xf32>
    %334 = vector.shape_cast %333 : vector<8xf32> to vector<8x1xf32>
    %335 = vector.broadcast %334 : vector<8x1xf32> to vector<8x8xf32>
    %336 = arith.subf %332, %335 : vector<8x8xf32>
    %337 = math.exp %336 : vector<8x8xf32>
    %cst_243 = arith.constant dense<0.000000e+00> : vector<8xf32>
    %338 = vector.multi_reduction <add>, %337, %cst_243 [1] : vector<8x8xf32> to vector<8xf32>
    %339 = vector.shape_cast %338 : vector<8xf32> to vector<8x1xf32>
    %340 = tpu.reciprocal %339 {approx = true} : vector<8x1xf32> -> vector<8x1xf32>
    %341 = vector.broadcast %340 : vector<8x1xf32> to vector<8x8xf32>
    %342 = arith.mulf %337, %341 : vector<8x8xf32>
    %cst_244 = arith.constant dense<0.000000e+00> : vector<8x8xf32>
    %343 = tpu.matmul %342, %328, %cst_244 {dimension_numbers = #tpu.dot_dimension_numbers<[1], [0], [0], [1], [0, 0, 1, 1], [], []>} : vector<8x8xf32>, vector<8x8xf32>, vector<8x8xf32> -> vector<8x8xf32>
    %c1_245 = arith.constant 1 : index
    %c0_246 = arith.constant 0 : index
    %c0_247 = arith.constant 0 : index
    %344 = vector.load %arg23[%c1_245, %c0_246, %c0_247] : memref<4x8x32xf32, #tpu.memory_space<vmem>>, vector<1x8x32xf32>
    %345 = vector.shape_cast %344 : vector<1x8x32xf32> to vector<8x32xf32>
    %cst_248 = arith.constant dense<0.000000e+00> : vector<8x32xf32>
    %346 = tpu.matmul %343, %345, %cst_248 {dimension_numbers = #tpu.dot_dimension_numbers<[1], [0], [0], [1], [0, 0, 1, 1], [], []>} : vector<8x8xf32>, vector<8x32xf32>, vector<8x32xf32> -> vector<8x32xf32>
    %347 = arith.addf %307, %346 : vector<8x32xf32>
    %c2_249 = arith.constant 2 : index
    %c0_250 = arith.constant 0 : index
    %c0_251 = arith.constant 0 : index
    %348 = vector.load %arg20[%c2_249, %c0_250, %c0_251] : memref<4x32x8xf32, #tpu.memory_space<vmem>>, vector<1x32x8xf32>
    %349 = vector.shape_cast %348 : vector<1x32x8xf32> to vector<32x8xf32>
    %cst_252 = arith.constant dense<0.000000e+00> : vector<8x8xf32>
    %350 = tpu.matmul %266, %349, %cst_252 {dimension_numbers = #tpu.dot_dimension_numbers<[1], [0], [0], [1], [0, 0, 1, 1], [], []>} : vector<8x32xf32>, vector<32x8xf32>, vector<8x8xf32> -> vector<8x8xf32>
    %c2_253 = arith.constant 2 : index
    %c0_254 = arith.constant 0 : index
    %c0_255 = arith.constant 0 : index
    %351 = vector.load %arg24[%c2_253, %c0_254, %c0_255] : memref<4x1x8xf32, #tpu.memory_space<vmem>>, vector<1x1x8xf32>
    %352 = vector.shape_cast %351 : vector<1x1x8xf32> to vector<1x8xf32>
    %353 = vector.broadcast %352 : vector<1x8xf32> to vector<8x8xf32>
    %354 = arith.addf %350, %353 : vector<8x8xf32>
    %c2_256 = arith.constant 2 : index
    %c0_257 = arith.constant 0 : index
    %c0_258 = arith.constant 0 : index
    %355 = vector.load %arg21[%c2_256, %c0_257, %c0_258] : memref<4x32x8xf32, #tpu.memory_space<vmem>>, vector<1x32x8xf32>
    %356 = vector.shape_cast %355 : vector<1x32x8xf32> to vector<32x8xf32>
    %cst_259 = arith.constant dense<0.000000e+00> : vector<8x8xf32>
    %357 = tpu.matmul %3, %356, %cst_259 {dimension_numbers = #tpu.dot_dimension_numbers<[1], [0], [0], [1], [0, 0, 1, 1], [], []>} : vector<8x32xf32>, vector<32x8xf32>, vector<8x8xf32> -> vector<8x8xf32>
    %c2_260 = arith.constant 2 : index
    %c0_261 = arith.constant 0 : index
    %c0_262 = arith.constant 0 : index
    %358 = vector.load %arg25[%c2_260, %c0_261, %c0_262] : memref<4x1x8xf32, #tpu.memory_space<vmem>>, vector<1x1x8xf32>
    %359 = vector.shape_cast %358 : vector<1x1x8xf32> to vector<1x8xf32>
    %360 = vector.broadcast %359 : vector<1x8xf32> to vector<8x8xf32>
    %361 = arith.addf %357, %360 : vector<8x8xf32>
    %c2_263 = arith.constant 2 : index
    %c0_264 = arith.constant 0 : index
    %c0_265 = arith.constant 0 : index
    %362 = vector.load %arg22[%c2_263, %c0_264, %c0_265] : memref<4x32x8xf32, #tpu.memory_space<vmem>>, vector<1x32x8xf32>
    %363 = vector.shape_cast %362 : vector<1x32x8xf32> to vector<32x8xf32>
    %cst_266 = arith.constant dense<0.000000e+00> : vector<8x8xf32>
    %364 = tpu.matmul %3, %363, %cst_266 {dimension_numbers = #tpu.dot_dimension_numbers<[1], [0], [0], [1], [0, 0, 1, 1], [], []>} : vector<8x32xf32>, vector<32x8xf32>, vector<8x8xf32> -> vector<8x8xf32>
    %c2_267 = arith.constant 2 : index
    %c0_268 = arith.constant 0 : index
    %c0_269 = arith.constant 0 : index
    %365 = vector.load %arg26[%c2_267, %c0_268, %c0_269] : memref<4x1x8xf32, #tpu.memory_space<vmem>>, vector<1x1x8xf32>
    %366 = vector.shape_cast %365 : vector<1x1x8xf32> to vector<1x8xf32>
    %367 = vector.broadcast %366 : vector<1x8xf32> to vector<8x8xf32>
    %368 = arith.addf %364, %367 : vector<8x8xf32>
    %cst_270 = arith.constant dense<0.000000e+00> : vector<8x8xf32>
    %369 = tpu.matmul %354, %361, %cst_270 {dimension_numbers = #tpu.dot_dimension_numbers<[1], [1], [0], [0], [0, 0, 1, 0], [], []>} : vector<8x8xf32>, vector<8x8xf32>, vector<8x8xf32> -> vector<8x8xf32>
    %cst_271 = arith.constant 0.353553385 : f32
    %370 = vector.broadcast %cst_271 : f32 to vector<8x8xf32>
    %371 = arith.mulf %369, %370 : vector<8x8xf32>
    %372 = arith.addf %371, %7 : vector<8x8xf32>
    %cst_272 = arith.constant dense<0xFF800000> : vector<8xf32>
    %373 = vector.multi_reduction <maximumf>, %372, %cst_272 [1] : vector<8x8xf32> to vector<8xf32>
    %374 = vector.shape_cast %373 : vector<8xf32> to vector<8x1xf32>
    %375 = vector.broadcast %374 : vector<8x1xf32> to vector<8x8xf32>
    %376 = arith.subf %372, %375 : vector<8x8xf32>
    %377 = math.exp %376 : vector<8x8xf32>
    %cst_273 = arith.constant dense<0.000000e+00> : vector<8xf32>
    %378 = vector.multi_reduction <add>, %377, %cst_273 [1] : vector<8x8xf32> to vector<8xf32>
    %379 = vector.shape_cast %378 : vector<8xf32> to vector<8x1xf32>
    %380 = tpu.reciprocal %379 {approx = true} : vector<8x1xf32> -> vector<8x1xf32>
    %381 = vector.broadcast %380 : vector<8x1xf32> to vector<8x8xf32>
    %382 = arith.mulf %377, %381 : vector<8x8xf32>
    %cst_274 = arith.constant dense<0.000000e+00> : vector<8x8xf32>
    %383 = tpu.matmul %382, %368, %cst_274 {dimension_numbers = #tpu.dot_dimension_numbers<[1], [0], [0], [1], [0, 0, 1, 1], [], []>} : vector<8x8xf32>, vector<8x8xf32>, vector<8x8xf32> -> vector<8x8xf32>
    %c2_275 = arith.constant 2 : index
    %c0_276 = arith.constant 0 : index
    %c0_277 = arith.constant 0 : index
    %384 = vector.load %arg23[%c2_275, %c0_276, %c0_277] : memref<4x8x32xf32, #tpu.memory_space<vmem>>, vector<1x8x32xf32>
    %385 = vector.shape_cast %384 : vector<1x8x32xf32> to vector<8x32xf32>
    %cst_278 = arith.constant dense<0.000000e+00> : vector<8x32xf32>
    %386 = tpu.matmul %383, %385, %cst_278 {dimension_numbers = #tpu.dot_dimension_numbers<[1], [0], [0], [1], [0, 0, 1, 1], [], []>} : vector<8x8xf32>, vector<8x32xf32>, vector<8x32xf32> -> vector<8x32xf32>
    %387 = arith.addf %347, %386 : vector<8x32xf32>
    %c3_279 = arith.constant 3 : index
    %c0_280 = arith.constant 0 : index
    %c0_281 = arith.constant 0 : index
    %388 = vector.load %arg20[%c3_279, %c0_280, %c0_281] : memref<4x32x8xf32, #tpu.memory_space<vmem>>, vector<1x32x8xf32>
    %389 = vector.shape_cast %388 : vector<1x32x8xf32> to vector<32x8xf32>
    %cst_282 = arith.constant dense<0.000000e+00> : vector<8x8xf32>
    %390 = tpu.matmul %266, %389, %cst_282 {dimension_numbers = #tpu.dot_dimension_numbers<[1], [0], [0], [1], [0, 0, 1, 1], [], []>} : vector<8x32xf32>, vector<32x8xf32>, vector<8x8xf32> -> vector<8x8xf32>
    %c3_283 = arith.constant 3 : index
    %c0_284 = arith.constant 0 : index
    %c0_285 = arith.constant 0 : index
    %391 = vector.load %arg24[%c3_283, %c0_284, %c0_285] : memref<4x1x8xf32, #tpu.memory_space<vmem>>, vector<1x1x8xf32>
    %392 = vector.shape_cast %391 : vector<1x1x8xf32> to vector<1x8xf32>
    %393 = vector.broadcast %392 : vector<1x8xf32> to vector<8x8xf32>
    %394 = arith.addf %390, %393 : vector<8x8xf32>
    %c3_286 = arith.constant 3 : index
    %c0_287 = arith.constant 0 : index
    %c0_288 = arith.constant 0 : index
    %395 = vector.load %arg21[%c3_286, %c0_287, %c0_288] : memref<4x32x8xf32, #tpu.memory_space<vmem>>, vector<1x32x8xf32>
    %396 = vector.shape_cast %395 : vector<1x32x8xf32> to vector<32x8xf32>
    %cst_289 = arith.constant dense<0.000000e+00> : vector<8x8xf32>
    %397 = tpu.matmul %3, %396, %cst_289 {dimension_numbers = #tpu.dot_dimension_numbers<[1], [0], [0], [1], [0, 0, 1, 1], [], []>} : vector<8x32xf32>, vector<32x8xf32>, vector<8x8xf32> -> vector<8x8xf32>
    %c3_290 = arith.constant 3 : index
    %c0_291 = arith.constant 0 : index
    %c0_292 = arith.constant 0 : index
    %398 = vector.load %arg25[%c3_290, %c0_291, %c0_292] : memref<4x1x8xf32, #tpu.memory_space<vmem>>, vector<1x1x8xf32>
    %399 = vector.shape_cast %398 : vector<1x1x8xf32> to vector<1x8xf32>
    %400 = vector.broadcast %399 : vector<1x8xf32> to vector<8x8xf32>
    %401 = arith.addf %397, %400 : vector<8x8xf32>
    %c3_293 = arith.constant 3 : index
    %c0_294 = arith.constant 0 : index
    %c0_295 = arith.constant 0 : index
    %402 = vector.load %arg22[%c3_293, %c0_294, %c0_295] : memref<4x32x8xf32, #tpu.memory_space<vmem>>, vector<1x32x8xf32>
    %403 = vector.shape_cast %402 : vector<1x32x8xf32> to vector<32x8xf32>
    %cst_296 = arith.constant dense<0.000000e+00> : vector<8x8xf32>
    %404 = tpu.matmul %3, %403, %cst_296 {dimension_numbers = #tpu.dot_dimension_numbers<[1], [0], [0], [1], [0, 0, 1, 1], [], []>} : vector<8x32xf32>, vector<32x8xf32>, vector<8x8xf32> -> vector<8x8xf32>
    %c3_297 = arith.constant 3 : index
    %c0_298 = arith.constant 0 : index
    %c0_299 = arith.constant 0 : index
    %405 = vector.load %arg26[%c3_297, %c0_298, %c0_299] : memref<4x1x8xf32, #tpu.memory_space<vmem>>, vector<1x1x8xf32>
    %406 = vector.shape_cast %405 : vector<1x1x8xf32> to vector<1x8xf32>
    %407 = vector.broadcast %406 : vector<1x8xf32> to vector<8x8xf32>
    %408 = arith.addf %404, %407 : vector<8x8xf32>
    %cst_300 = arith.constant dense<0.000000e+00> : vector<8x8xf32>
    %409 = tpu.matmul %394, %401, %cst_300 {dimension_numbers = #tpu.dot_dimension_numbers<[1], [1], [0], [0], [0, 0, 1, 0], [], []>} : vector<8x8xf32>, vector<8x8xf32>, vector<8x8xf32> -> vector<8x8xf32>
    %cst_301 = arith.constant 0.353553385 : f32
    %410 = vector.broadcast %cst_301 : f32 to vector<8x8xf32>
    %411 = arith.mulf %409, %410 : vector<8x8xf32>
    %412 = arith.addf %411, %7 : vector<8x8xf32>
    %cst_302 = arith.constant dense<0xFF800000> : vector<8xf32>
    %413 = vector.multi_reduction <maximumf>, %412, %cst_302 [1] : vector<8x8xf32> to vector<8xf32>
    %414 = vector.shape_cast %413 : vector<8xf32> to vector<8x1xf32>
    %415 = vector.broadcast %414 : vector<8x1xf32> to vector<8x8xf32>
    %416 = arith.subf %412, %415 : vector<8x8xf32>
    %417 = math.exp %416 : vector<8x8xf32>
    %cst_303 = arith.constant dense<0.000000e+00> : vector<8xf32>
    %418 = vector.multi_reduction <add>, %417, %cst_303 [1] : vector<8x8xf32> to vector<8xf32>
    %419 = vector.shape_cast %418 : vector<8xf32> to vector<8x1xf32>
    %420 = tpu.reciprocal %419 {approx = true} : vector<8x1xf32> -> vector<8x1xf32>
    %421 = vector.broadcast %420 : vector<8x1xf32> to vector<8x8xf32>
    %422 = arith.mulf %417, %421 : vector<8x8xf32>
    %cst_304 = arith.constant dense<0.000000e+00> : vector<8x8xf32>
    %423 = tpu.matmul %422, %408, %cst_304 {dimension_numbers = #tpu.dot_dimension_numbers<[1], [0], [0], [1], [0, 0, 1, 1], [], []>} : vector<8x8xf32>, vector<8x8xf32>, vector<8x8xf32> -> vector<8x8xf32>
    %c3_305 = arith.constant 3 : index
    %c0_306 = arith.constant 0 : index
    %c0_307 = arith.constant 0 : index
    %424 = vector.load %arg23[%c3_305, %c0_306, %c0_307] : memref<4x8x32xf32, #tpu.memory_space<vmem>>, vector<1x8x32xf32>
    %425 = vector.shape_cast %424 : vector<1x8x32xf32> to vector<8x32xf32>
    %cst_308 = arith.constant dense<0.000000e+00> : vector<8x32xf32>
    %426 = tpu.matmul %423, %425, %cst_308 {dimension_numbers = #tpu.dot_dimension_numbers<[1], [0], [0], [1], [0, 0, 1, 1], [], []>} : vector<8x8xf32>, vector<8x32xf32>, vector<8x32xf32> -> vector<8x32xf32>
    %427 = arith.addf %387, %426 : vector<8x32xf32>
    %428 = arith.addf %243, %427 : vector<8x32xf32>
    %c0_309 = arith.constant 0 : index
    %c0_310 = arith.constant 0 : index
    %429 = vector.load %arg27[%c0_309, %c0_310] : memref<1x32xf32, #tpu.memory_space<vmem>>, vector<1x32xf32>
    %430 = vector.broadcast %429 : vector<1x32xf32> to vector<8x32xf32>
    %431 = arith.addf %428, %430 : vector<8x32xf32>
    %cst_311 = arith.constant dense<0.000000e+00> : vector<8xf32>
    %432 = vector.multi_reduction <add>, %431, %cst_311 [1] : vector<8x32xf32> to vector<8xf32>
    %433 = vector.shape_cast %432 : vector<8xf32> to vector<8x1xf32>
    %cst_312 = arith.constant 3.200000e+01 : f32
    %434 = vector.broadcast %cst_312 : f32 to vector<8x1xf32>
    %435 = arith.divf %433, %434 : vector<8x1xf32>
    %436 = vector.broadcast %435 : vector<8x1xf32> to vector<8x32xf32>
    %437 = arith.subf %431, %436 : vector<8x32xf32>
    %438 = arith.mulf %437, %437 : vector<8x32xf32>
    %cst_313 = arith.constant dense<0.000000e+00> : vector<8xf32>
    %439 = vector.multi_reduction <add>, %438, %cst_313 [1] : vector<8x32xf32> to vector<8xf32>
    %440 = vector.shape_cast %439 : vector<8xf32> to vector<8x1xf32>
    %cst_314 = arith.constant 3.100000e+01 : f32
    %441 = vector.broadcast %cst_314 : f32 to vector<8x1xf32>
    %442 = arith.divf %440, %441 : vector<8x1xf32>
    %443 = math.sqrt %442 : vector<8x1xf32>
    %cst_315 = arith.constant 9.99999997E-7 : f32
    %444 = vector.broadcast %cst_315 : f32 to vector<8x1xf32>
    %445 = arith.addf %443, %444 : vector<8x1xf32>
    %446 = tpu.reciprocal %445 {approx = true} : vector<8x1xf32> -> vector<8x1xf32>
    %c0_316 = arith.constant 0 : index
    %c0_317 = arith.constant 0 : index
    %447 = vector.load %arg28[%c0_316, %c0_317] : memref<1x32xf32, #tpu.memory_space<vmem>>, vector<1x32xf32>
    %448 = vector.broadcast %447 : vector<1x32xf32> to vector<8x32xf32>
    %449 = arith.mulf %448, %437 : vector<8x32xf32>
    %450 = vector.broadcast %446 : vector<8x1xf32> to vector<8x32xf32>
    %451 = arith.mulf %449, %450 : vector<8x32xf32>
    %c0_318 = arith.constant 0 : index
    %c0_319 = arith.constant 0 : index
    %452 = vector.load %arg29[%c0_318, %c0_319] : memref<1x32xf32, #tpu.memory_space<vmem>>, vector<1x32xf32>
    %453 = vector.broadcast %452 : vector<1x32xf32> to vector<8x32xf32>
    %454 = arith.addf %451, %453 : vector<8x32xf32>
    %c0_320 = arith.constant 0 : index
    %c0_321 = arith.constant 0 : index
    %455 = vector.load %arg30[%c0_320, %c0_321] : memref<32x64xf32, #tpu.memory_space<vmem>>, vector<32x64xf32>
    %cst_322 = arith.constant dense<0.000000e+00> : vector<8x64xf32>
    %456 = tpu.matmul %454, %455, %cst_322 {dimension_numbers = #tpu.dot_dimension_numbers<[1], [0], [0], [1], [0, 0, 1, 1], [], []>} : vector<8x32xf32>, vector<32x64xf32>, vector<8x64xf32> -> vector<8x64xf32>
    %c0_323 = arith.constant 0 : index
    %c0_324 = arith.constant 0 : index
    %457 = vector.load %arg31[%c0_323, %c0_324] : memref<1x64xf32, #tpu.memory_space<vmem>>, vector<1x64xf32>
    %458 = vector.broadcast %457 : vector<1x64xf32> to vector<8x64xf32>
    %459 = arith.addf %456, %458 : vector<8x64xf32>
    %cst_325 = arith.constant 0.000000e+00 : f32
    %460 = vector.broadcast %cst_325 : f32 to vector<8x64xf32>
    %461 = arith.maximumf %459, %460 : vector<8x64xf32>
    %c0_326 = arith.constant 0 : index
    %c0_327 = arith.constant 0 : index
    %462 = vector.load %arg32[%c0_326, %c0_327] : memref<64x32xf32, #tpu.memory_space<vmem>>, vector<64x32xf32>
    %cst_328 = arith.constant dense<0.000000e+00> : vector<8x32xf32>
    %463 = tpu.matmul %461, %462, %cst_328 {dimension_numbers = #tpu.dot_dimension_numbers<[1], [0], [0], [1], [0, 0, 1, 1], [], []>} : vector<8x64xf32>, vector<64x32xf32>, vector<8x32xf32> -> vector<8x32xf32>
    %464 = arith.addf %431, %463 : vector<8x32xf32>
    %c0_329 = arith.constant 0 : index
    %c0_330 = arith.constant 0 : index
    %465 = vector.load %arg33[%c0_329, %c0_330] : memref<1x32xf32, #tpu.memory_space<vmem>>, vector<1x32xf32>
    %466 = vector.broadcast %465 : vector<1x32xf32> to vector<8x32xf32>
    %467 = arith.addf %464, %466 : vector<8x32xf32>
    %c0_331 = arith.constant 0 : index
    %c0_332 = arith.constant 0 : index
    %c0_333 = arith.constant 0 : index
    %468 = vector.load %arg34[%c0_331, %c0_332, %c0_333] : memref<1x8x32xf32, #tpu.memory_space<vmem>>, vector<1x8x32xf32>
    %469 = vector.shape_cast %468 : vector<1x8x32xf32> to vector<8x32xf32>
    %470 = vector.shape_cast %467 : vector<8x32xf32> to vector<1x8x32xf32>
    tpu.vector_store %arg34[%c0_331, %c0_332, %c0_333], %470 {strides = array<i32>} : memref<1x8x32xf32, #tpu.memory_space<vmem>>, vector<1x8x32xf32>,
    return
  }
  func.func @transform_0(%arg0: i32) -> (i32, i32, i32) {
    %c0_i32 = arith.constant 0 : i32
    %c0_i32_0 = arith.constant 0 : i32
    %c0_i32_1 = arith.constant 0 : i32
    return %arg0, %c0_i32, %c0_i32_0 : i32, i32, i32
  }
  func.func @transform_1(%arg0: i32) -> (i32, i32, i32) {
    %c0_i32 = arith.constant 0 : i32
    %c0_i32_0 = arith.constant 0 : i32
    %c0_i32_1 = arith.constant 0 : i32
    return %arg0, %c0_i32, %c0_i32_0 : i32, i32, i32
  }
  func.func @transform_2(%arg0: i32) -> (i32, i32, i32) {
    %c0_i32 = arith.constant 0 : i32
    %c0_i32_0 = arith.constant 0 : i32
    %c0_i32_1 = arith.constant 0 : i32
    return %arg0, %c0_i32, %c0_i32_0 : i32, i32, i32
  }
  func.func @transform_3(%arg0: i32) -> (i32, i32, i32) {
    %c0_i32 = arith.constant 0 : i32
    %c0_i32_0 = arith.constant 0 : i32
    %c0_i32_1 = arith.constant 0 : i32
    return %arg0, %c0_i32, %c0_i32_0 : i32, i32, i32
  }
  func.func @transform_4(%arg0: i32) -> (i32, i32, i32) {
    %c0_i32 = arith.constant 0 : i32
    %c0_i32_0 = arith.constant 0 : i32
    %c0_i32_1 = arith.constant 0 : i32
    %c0_i32_2 = arith.constant 0 : i32
    return %c0_i32, %c0_i32_0, %c0_i32_1 : i32, i32, i32
  }
  func.func @transform_5(%arg0: i32) -> (i32, i32, i32) {
    %c0_i32 = arith.constant 0 : i32
    %c0_i32_0 = arith.constant 0 : i32
    %c0_i32_1 = arith.constant 0 : i32
    %c0_i32_2 = arith.constant 0 : i32
    return %c0_i32, %c0_i32_0, %c0_i32_1 : i32, i32, i32
  }
  func.func @transform_6(%arg0: i32) -> (i32, i32, i32) {
    %c0_i32 = arith.constant 0 : i32
    %c0_i32_0 = arith.constant 0 : i32
    %c0_i32_1 = arith.constant 0 : i32
    %c0_i32_2 = arith.constant 0 : i32
    return %c0_i32, %c0_i32_0, %c0_i32_1 : i32, i32, i32
  }
  func.func @transform_7(%arg0: i32) -> (i32, i32) {
    %c0_i32 = arith.constant 0 : i32
    %c0_i32_0 = arith.constant 0 : i32
    %c0_i32_1 = arith.constant 0 : i32
    return %c0_i32, %c0_i32_0 : i32, i32
  }
  func.func @transform_8(%arg0: i32) -> (i32, i32) {
    %c0_i32 = arith.constant 0 : i32
    %c0_i32_0 = arith.constant 0 : i32
    %c0_i32_1 = arith.constant 0 : i32
    return %c0_i32, %c0_i32_0 : i32, i32
  }
  func.func @transform_9(%arg0: i32) -> (i32, i32, i32) {
    %c0_i32 = arith.constant 0 : i32
    %c0_i32_0 = arith.constant 0 : i32
    %c0_i32_1 = arith.constant 0 : i32
    %c0_i32_2 = arith.constant 0 : i32
    return %c0_i32, %c0_i32_0, %c0_i32_1 : i32, i32, i32
  }
  func.func @transform_10(%arg0: i32) -> (i32, i32, i32) {
    %c0_i32 = arith.constant 0 : i32
    %c0_i32_0 = arith.constant 0 : i32
    %c0_i32_1 = arith.constant 0 : i32
    %c0_i32_2 = arith.constant 0 : i32
    return %c0_i32, %c0_i32_0, %c0_i32_1 : i32, i32, i32
  }
  func.func @transform_11(%arg0: i32) -> (i32, i32, i32) {
    %c0_i32 = arith.constant 0 : i32
    %c0_i32_0 = arith.constant 0 : i32
    %c0_i32_1 = arith.constant 0 : i32
    %c0_i32_2 = arith.constant 0 : i32
    return %c0_i32, %c0_i32_0, %c0_i32_1 : i32, i32, i32
  }
  func.func @transform_12(%arg0: i32) -> (i32, i32, i32) {
    %c0_i32 = arith.constant 0 : i32
    %c0_i32_0 = arith.constant 0 : i32
    %c0_i32_1 = arith.constant 0 : i32
    %c0_i32_2 = arith.constant 0 : i32
    return %c0_i32, %c0_i32_0, %c0_i32_1 : i32, i32, i32
  }
  func.func @transform_13(%arg0: i32) -> (i32, i32, i32) {
    %c0_i32 = arith.constant 0 : i32
    %c0_i32_0 = arith.constant 0 : i32
    %c0_i32_1 = arith.constant 0 : i32
    %c0_i32_2 = arith.constant 0 : i32
    return %c0_i32, %c0_i32_0, %c0_i32_1 : i32, i32, i32
  }
  func.func @transform_14(%arg0: i32) -> (i32, i32, i32) {
    %c0_i32 = arith.constant 0 : i32
    %c0_i32_0 = arith.constant 0 : i32
    %c0_i32_1 = arith.constant 0 : i32
    %c0_i32_2 = arith.constant 0 : i32
    return %c0_i32, %c0_i32_0, %c0_i32_1 : i32, i32, i32
  }
  func.func @transform_15(%arg0: i32) -> (i32, i32, i32) {
    %c0_i32 = arith.constant 0 : i32
    %c0_i32_0 = arith.constant 0 : i32
    %c0_i32_1 = arith.constant 0 : i32
    %c0_i32_2 = arith.constant 0 : i32
    return %c0_i32, %c0_i32_0, %c0_i32_1 : i32, i32, i32
  }
  func.func @transform_16(%arg0: i32) -> (i32, i32) {
    %c0_i32 = arith.constant 0 : i32
    %c0_i32_0 = arith.constant 0 : i32
    %c0_i32_1 = arith.constant 0 : i32
    return %c0_i32, %c0_i32_0 : i32, i32
  }
  func.func @transform_17(%arg0: i32) -> (i32, i32) {
    %c0_i32 = arith.constant 0 : i32
    %c0_i32_0 = arith.constant 0 : i32
    %c0_i32_1 = arith.constant 0 : i32
    return %c0_i32, %c0_i32_0 : i32, i32
  }
  func.func @transform_18(%arg0: i32) -> (i32, i32) {
    %c0_i32 = arith.constant 0 : i32
    %c0_i32_0 = arith.constant 0 : i32
    %c0_i32_1 = arith.constant 0 : i32
    return %c0_i32, %c0_i32_0 : i32, i32
  }
  func.func @transform_19(%arg0: i32) -> (i32, i32, i32) {
    %c0_i32 = arith.constant 0 : i32
    %c0_i32_0 = arith.constant 0 : i32
    %c0_i32_1 = arith.constant 0 : i32
    %c0_i32_2 = arith.constant 0 : i32
    return %c0_i32, %c0_i32_0, %c0_i32_1 : i32, i32, i32
  }
  func.func @transform_20(%arg0: i32) -> (i32, i32, i32) {
    %c0_i32 = arith.constant 0 : i32
    %c0_i32_0 = arith.constant 0 : i32
    %c0_i32_1 = arith.constant 0 : i32
    %c0_i32_2 = arith.constant 0 : i32
    return %c0_i32, %c0_i32_0, %c0_i32_1 : i32, i32, i32
  }
  func.func @transform_21(%arg0: i32) -> (i32, i32, i32) {
    %c0_i32 = arith.constant 0 : i32
    %c0_i32_0 = arith.constant 0 : i32
    %c0_i32_1 = arith.constant 0 : i32
    %c0_i32_2 = arith.constant 0 : i32
    return %c0_i32, %c0_i32_0, %c0_i32_1 : i32, i32, i32
  }
  func.func @transform_22(%arg0: i32) -> (i32, i32, i32) {
    %c0_i32 = arith.constant 0 : i32
    %c0_i32_0 = arith.constant 0 : i32
    %c0_i32_1 = arith.constant 0 : i32
    %c0_i32_2 = arith.constant 0 : i32
    return %c0_i32, %c0_i32_0, %c0_i32_1 : i32, i32, i32
  }
  func.func @transform_23(%arg0: i32) -> (i32, i32, i32) {
    %c0_i32 = arith.constant 0 : i32
    %c0_i32_0 = arith.constant 0 : i32
    %c0_i32_1 = arith.constant 0 : i32
    %c0_i32_2 = arith.constant 0 : i32
    return %c0_i32, %c0_i32_0, %c0_i32_1 : i32, i32, i32
  }
  func.func @transform_24(%arg0: i32) -> (i32, i32, i32) {
    %c0_i32 = arith.constant 0 : i32
    %c0_i32_0 = arith.constant 0 : i32
    %c0_i32_1 = arith.constant 0 : i32
    %c0_i32_2 = arith.constant 0 : i32
    return %c0_i32, %c0_i32_0, %c0_i32_1 : i32, i32, i32
  }
  func.func @transform_25(%arg0: i32) -> (i32, i32, i32) {
    %c0_i32 = arith.constant 0 : i32
    %c0_i32_0 = arith.constant 0 : i32
    %c0_i32_1 = arith.constant 0 : i32
    %c0_i32_2 = arith.constant 0 : i32
    return %c0_i32, %c0_i32_0, %c0_i32_1 : i32, i32, i32
  }
  func.func @transform_26(%arg0: i32) -> (i32, i32) {
    %c0_i32 = arith.constant 0 : i32
    %c0_i32_0 = arith.constant 0 : i32
    %c0_i32_1 = arith.constant 0 : i32
    return %c0_i32, %c0_i32_0 : i32, i32
  }
  func.func @transform_27(%arg0: i32) -> (i32, i32) {
    %c0_i32 = arith.constant 0 : i32
    %c0_i32_0 = arith.constant 0 : i32
    %c0_i32_1 = arith.constant 0 : i32
    return %c0_i32, %c0_i32_0 : i32, i32
  }
  func.func @transform_28(%arg0: i32) -> (i32, i32) {
    %c0_i32 = arith.constant 0 : i32
    %c0_i32_0 = arith.constant 0 : i32
    %c0_i32_1 = arith.constant 0 : i32
    return %c0_i32, %c0_i32_0 : i32, i32
  }
  func.func @transform_29(%arg0: i32) -> (i32, i32) {
    %c0_i32 = arith.constant 0 : i32
    %c0_i32_0 = arith.constant 0 : i32
    %c0_i32_1 = arith.constant 0 : i32
    return %c0_i32, %c0_i32_0 : i32, i32
  }
  func.func @transform_30(%arg0: i32) -> (i32, i32) {
    %c0_i32 = arith.constant 0 : i32
    %c0_i32_0 = arith.constant 0 : i32
    %c0_i32_1 = arith.constant 0 : i32
    return %c0_i32, %c0_i32_0 : i32, i32
  }
  func.func @transform_31(%arg0: i32) -> (i32, i32) {
    %c0_i32 = arith.constant 0 : i32
    %c0_i32_0 = arith.constant 0 : i32
    %c0_i32_1 = arith.constant 0 : i32
    return %c0_i32, %c0_i32_0 : i32, i32
  }
  func.func @transform_32(%arg0: i32) -> (i32, i32) {
    %c0_i32 = arith.constant 0 : i32
    %c0_i32_0 = arith.constant 0 : i32
    %c0_i32_1 = arith.constant 0 : i32
    return %c0_i32, %c0_i32_0 : i32, i32
  }
  func.func @transform_33(%arg0: i32) -> (i32, i32, i32) {
    %c0_i32 = arith.constant 0 : i32
    %c0_i32_0 = arith.constant 0 : i32
    %c0_i32_1 = arith.constant 0 : i32
    return %arg0, %c0_i32, %c0_i32_0 : i32, i32, i32
  }
}

</mosaic_0001>

<bundles_post_ra>
// kernel: decoder_layer.1
= control target key start
LH: loop header
LB: loop body
LE: loop exit
PB: predicated region body
PF: predicated region fallthrough
CT: control target
= control target key end

     0   :  { %s6808_s6 = smov 1   ;;  %s6809_s10 = smov 2   ;;  %s7670_s0 = inlined_call_operand.smem [shape: u32[34], index: -1, kind: input, shape index: {}] }
   0x1   :  { %s6852_s5 = sld [smem:[%s7670_s0]]   ;;  %s6810_s14 = smov 3  }
   0x2   :  { %s6857_s9 = sld [smem:[%s7670_s0 + %s6808_s6]]   ;;  %s6811_s18 = smov 4  }
   0x3   :  { %s6862_s13 = sld [smem:[%s7670_s0 + %s6809_s10]]   ;;  %s6812_s22 = smov 5  }
   0x4   :  { %s6867_s17 = sld [smem:[%s7670_s0 + %s6810_s14]]   ;;  %s6813_s26 = smov 6  }
   0x5   :  { %s6872_s21 = sld [smem:[%s7670_s0 + %s6811_s18]]   ;;  %s6814_s30 = smov 7  }
   0x6   :  { %s6877_s25 = sld [smem:[%s7670_s0 + %s6812_s22]]   ;;  %s6815_s4 = smov 8  }
   0x7   :  { %7689 = sst [smem:[#allocation5_spill]] %s6852_s5  ;;  %s6816_s10 = smov 9  }
   0x8   :  { %7690 = sst [smem:[#allocation6_spill]] %s6857_s9  ;;  %s6817_s15 = smov 10  }
   0x9   :  { %7691 = sst [smem:[#allocation7_spill]] %s6862_s13  ;;  %s6818_s20 = smov 11  }
   0xa   :  { %7692 = sst [smem:[#allocation8_spill]] %s6867_s17  ;;  %s6820_s1 = smov 13  }
   0xb   :  { %s6882_s29 = sld [smem:[%s7670_s0 + %s6813_s26]]   ;;  %s6819_s26 = smov 12  }
   0xc   :  { %s6887_s3 = sld [smem:[%s7670_s0 + %s6814_s30]]   ;;  %s6821_s7 = smov 14  }
   0xd   :  { %s6892_s8 = sld [smem:[%s7670_s0 + %s6815_s4]]   ;;  %s6823_s22 = smov 16  }
   0xe   :  { %s6897_s14 = sld [smem:[%s7670_s0 + %s6816_s10]]   ;;  %s6824_s28 = smov 17  }
   0xf   :  { %s6902_s19 = sld [smem:[%s7670_s0 + %s6817_s15]]   ;;  %s6822_s15 = smov 15  }
  0x10   :  { %s6907_s24 = sld [smem:[%s7670_s0 + %s6818_s20]]  }
  0x11   :  { %s6912_s30 = sld [smem:[%s7670_s0 + %s6819_s26]]  }
  0x12   :  { %7693 = sst [smem:[#allocation9_spill]] %s6887_s3 }
  0x13   :  { %7694 = sst [smem:[#allocation10_spill]] %s6892_s8 }
  0x14   :  { %7695 = sst [smem:[#allocation11_spill]] %s6897_s14 }
  0x15   :  { %s6917_s6 = sld [smem:[%s7670_s0 + %s6820_s1]]  }
  0x16   :  { %s6922_s12 = sld [smem:[%s7670_s0 + %s6821_s7]]   ;;  %s6825_s7 = smov 18  }
  0x17   :  { %s6927_s20 = sld [smem:[%s7670_s0 + %s6822_s15]]   ;;  %s6826_s15 = smov 19  }
  0x18   :  { %s6932_s27 = sld [smem:[%s7670_s0 + %s6823_s22]]   ;;  %s6827_s22 = smov 20  }
  0x19   :  { %s6937_s4 = sld [smem:[%s7670_s0 + %s6824_s28]]   ;;  %s6828_s28 = smov 21  }
  0x1a   :  { %s6942_s17 = sld [smem:[%s7670_s0 + %s6825_s7]]   ;;  %s6829_s7 = smov 22  }
  0x1b   :  { %7696 = sst [smem:[#allocation12_spill]] %s6917_s6 }
  0x1c   :  { %7697 = sst [smem:[#allocation13_spill]] %s6922_s12 }
  0x1d   :  { %s6947_s9 = sld [smem:[%s7670_s0 + %s6826_s15]]   ;;  %s6830_s15 = smov 23  }
  0x1e   :  { %7698 = sst [smem:[#allocation14_spill]] %s6932_s27 }
  0x1f   :  { %7699 = sst [smem:[#allocation15_spill]] %s6937_s4 }
  0x20   :  { %7700 = sst [smem:[#allocation16_spill]] %s6942_s17 }
  0x21   :  { %s6952_s27 = sld [smem:[%s7670_s0 + %s6827_s22]]   ;;  %s6831_s22 = smov 24  }
  0x22   :  { %s6957_s4 = sld [smem:[%s7670_s0 + %s6828_s28]]   ;;  %s6832_s28 = smov 25  }
  0x23   :  { %7701 = sst [smem:[#allocation17_spill]] %s6947_s9 }
  0x24   :  { %s6962_s17 = sld [smem:[%s7670_s0 + %s6829_s7]]   ;;  %s6833_s7 = smov 26  }
  0x25   :  { %s6967_s9 = sld [smem:[%s7670_s0 + %s6830_s15]]   ;;  %s6834_s15 = smov 27  }
  0x27   :  { %7702 = sst [smem:[#allocation18_spill]] %s6952_s27 }
  0x28   :  { %7703 = sst [smem:[#allocation19_spill]] %s6957_s4 }
  0x29   :  { %s6972_s27 = sld [smem:[%s7670_s0 + %s6831_s22]]   ;;  %s6835_s22 = smov 28  }
  0x2a   :  { %7704 = sst [smem:[#allocation20_spill]] %s6962_s17 }
  0x2b   :  { %7705 = sst [smem:[#allocation21_spill]] %s6967_s9 }
  0x2c   :  { %s6977_s4 = sld [smem:[%s7670_s0 + %s6832_s28]]   ;;  %s6836_s28 = smov 29  }
  0x2d   :  { %s6982_s17 = sld [smem:[%s7670_s0 + %s6833_s7]]   ;;  %s6837_s7 = smov 30  }
  0x2e   :  { %s6987_s9 = sld [smem:[%s7670_s0 + %s6834_s15]]   ;;  %s6838_s15 = smov 31  }
  0x2f   :  { %7706 = sst [smem:[#allocation22_spill]] %s6972_s27 }
  0x30   :  { %s6992_s27 = sld [smem:[%s7670_s0 + %s6835_s22]]   ;;  %s6839_s22 = smov 32  }
  0x32   :  { %7707 = sst [smem:[#allocation23_spill]] %s6977_s4 }
  0x33   :  { %7708 = sst [smem:[#allocation24_spill]] %s6982_s17 }
  0x34   :  { %7709 = sst [smem:[#allocation25_spill]] %s6987_s9 }
  0x35   :  { %s6997_s4 = sld [smem:[%s7670_s0 + %s6836_s28]]   ;;  %s6840_s28 = smov 33  }
  0x36   :  { %7710 = sst [smem:[#allocation26_spill]] %s6992_s27 }
  0x37   :  { %s7002_s17 = sld [smem:[%s7670_s0 + %s6837_s7]]  }
  0x38   :  { %s7007_s9 = sld [smem:[%s7670_s0 + %s6838_s15]]  }
  0x39   :  { %s7012_s27 = sld [smem:[%s7670_s0 + %s6839_s22]]  }
  0x3b   :  { %7711 = sst [smem:[#allocation27_spill]] %s6997_s4 }
  0x3c   :  { %s7017_s4 = sld [smem:[%s7670_s0 + %s6840_s28]]  }
  0x3e   :  { %7712 = sst [smem:[#allocation28_spill]] %s7007_s9 }
  0x3f   :  { %72 = vsyncpa [#allocation3], 0 }
  0x40   :  { %74 = vsyncpa [#allocation3 + $0x1], 0  ;;  %s7019_s7 = smov 0   ;;  %s7021_s10 = smov 0  }
  0x41   :  { %s7023_s11 = smov 0   ;;  %s7025_s15 = smov 0  }
  0x42 LB: > { %s7713_s14 = sld [smem:[#allocation11_spill]]  ;;  %s7040_s0 = sadd.s32 4294967295, %s6806_s15   ;;  %s6806_s15 = sphi %s7025_s15, %s7742_s15   ;;  %s6802_s11 = sphi %s7023_s11, %s7741_s11   ;;  %s6798_s10 = sphi %s7021_s10, %s7740_s10   ;;  %s6794_s7 = sphi %s7019_s7, %s7739_s7  }
  0x43   : > { %s7714_s9 = sld [smem:[#allocation28_spill]]  ;;  %s5778_s16 = sadd.s32 4294967294, %s6806_s15  }
  0x44   : > { %s7715_s12 = sld [smem:[#allocation13_spill]]  ;;  %s7044_s18 = sadd.s32 1, %s6806_s15  }
  0x45   : > { %s7716_s6 = sld [smem:[#allocation12_spill]]  ;;  %s800_s22 = sadd.s32 1, %s6802_s11 }
  0x46   : > { %s797_s23 = ssub.s32 %s6806_s15, %s7044_s18  ;;  %p810_p0 = scmp.ne.s32.totalorder %s6802_s11, %s6798_s10 }
  0x47   : > { %p798_p1 = scmp.eq.s32.totalorder %s797_s23, 0  ;;  %p811_p2 = scmp.eq.s32.totalorder %s7040_s0, 1 }
  0x48   : > { %p816_p3 = scmp.ne.s32.totalorder %s6798_s10, %s6794_s7  ;;  %p817_p4 = scmp.eq.s32.totalorder %s5778_s16, 1 }
  0x49   : > { %s7055_s26 = scalar_select %p798_p1, %s6802_s11, %s800_s22  }
  0x4a   : > { %p7057_p5 = por %p811_p2, %p810_p0  ;;  %p7061_p6 = por %p817_p4, %p816_p3 }
  0x4b   : > { %p5781_p7 = scmp.ge.s32.totalorder %s6806_s15, 1  ;;  %p950_p8 = scmp.lt.s32.totalorder %s6806_s15, 3 }
  0x4d   : > { %p951_p9 = pnand %p5781_p7, %p950_p8 }
  0x4e   : > { %s7719_s5 = sld [smem:[#allocation5_spill]] (!%p951_p9)  ;;  %p1045_p10 = scmp.lt.s32.totalorder (!%p951_p9), %s7040_s0, 1 }
  0x4f   : > { %954 = sbr.rel (%p951_p9) target bundleno = 8731 (0x221b), region = 152  ;;  %s7720_s3 = sld [smem:[#allocation9_spill]] (!%p951_p9) }
  0x50   : > { %s7721_s8 = sld [smem:[#allocation10_spill]] (!%p951_p9) }
  0x51   : > { %s7722_s13 = sld [smem:[#allocation7_spill]] (!%p951_p9) }
  0x54   : > { %s1046_s2 = scalar_select %p1045_p10, %s7040_s0, 1  ;;  %vm1065_vm0 = vcmask 261120   ;;  %v6841_v7 = vmov 0.0   ;;  %v1107_v8 = vld [vmem:[%s7713_s14 + $0x18] sm:$0xff]  ;;  %v1106_v10 = vld [vmem:[%s7713_s14 + $0x10] sm:$0xff]  ;;  %v1105_v12 = vld [vmem:[%s7713_s14 + $0x8] sm:$0xff] }
  0x55   : > { %6194 = vmatprep.subr.mxu0 %v6841_v7  ;;  %6205 = vmatprep.subr.mxu1 %v6841_v7  ;;  %v1191_v9 = vld [vmem:[%s6902_s19 + $0x18] sm:$0xff]  ;;  %v1190_v11 = vld [vmem:[%s6902_s19 + $0x10] sm:$0xff]  ;;  %v1189_v13 = vld [vmem:[%s6902_s19 + $0x8] sm:$0xff]  ;;  %vm6842_vm1 = vmmov 0   ;;  %vm1366_vm4 = vcmask 64512   ;;  %vm5552_vm9 = vcmask 523264  }
  0x56   : > { %s7069_s16 = sshll.u32 %s1046_s2, 3  ;;  %6195 = vmatpush3.msra.mxu0 %v1107_v8  ;;  %6206 = vmatpush3.msra.mxu1 %v1191_v9  ;;  %v1104_v14 = vld [vmem:[%s7713_s14] sm:$0xff]  ;;  %v1272_v30 = vld [vmem:[%s6907_s24 + $0x18] sm:$0xff]  ;;  %v1271_v31 = vld [vmem:[%s6907_s24 + $0x10] sm:$0xff]  ;;  %s7723_s2 = sld [smem:[#allocation14_spill]] }
  0x57   : > { %s1048_s22 = scalar_lea.vmem %s7719_s5, %s7069_s16  ;;  %6196 = vmatprep.subr.mxu0 %v6841_v7  ;;  %6207 = vmatprep.subr.mxu1 %v6841_v7  ;;  %v1188_v15 = vld [vmem:[%s6902_s19] sm:$0xff]  ;;  %v1270_v32 = vld [vmem:[%s6907_s24 + $0x8] sm:$0xff]  ;;  %v5805_v45 = vld [vmem:[%s7713_s14 + $0x38] sm:$0xff]  ;;  %s1056_s23 = scalar_lea.vmem %s7722_s13, %s7069_s16 }
  0x58   : > { %v7073_v0 = vld [vmem:[%s1048_s22] sm:$0xff]  ;;  %6197 = vmatpush3.msra.mxu0 %v1106_v10  ;;  %6208 = vmatpush3.msra.mxu1 %v1190_v11  ;;  %v5804_v47 = vld [vmem:[%s7713_s14 + $0x30] sm:$0xff]  ;;  %v5803_v49 = vld [vmem:[%s7713_s14 + $0x28] sm:$0xff]  ;;  %s7724_s22 = sld [smem:[#allocation18_spill]] }
  0x59   : > { %v1066_v1 = vsel %vm1065_vm0, %v7073_v0, 0.0  ;;  %6198 = vmatprep.subr.mxu0 %v6841_v7  ;;  %6209 = vmatprep.subr.mxu1 %v6841_v7  ;;  %v5787_v24 = vld [vmem:[%s7720_s3] ss:$0 sm:$0xff]  ;;  %v5819_v53 = vld [vmem:[%s6907_s24 + $0x38] sm:$0xff]  ;;  %v5818_v54 = vld [vmem:[%s6907_s24 + $0x30] sm:$0xff]  ;;  %s7726_s3 = sld [smem:[#allocation6_spill]] }
  0x5a   : > { %1067 = vadd.xlane.f32.xlu0 %v1066_v1  ;;  %6199 = vmatpush3.msra.mxu0 %v1105_v12  ;;  %v5788_v27 = vld [vmem:[%s7721_s8] ss:$0 sm:$0xff]  ;;  %v5817_v55 = vld [vmem:[%s6907_s24 + $0x28] sm:$0xff]  ;;  %v5821_v8 = vld [vmem:[%s6927_s20 + $0x1] ss:$0 sm:$0xff]  ;;  %s7729_s5 = sld [smem:[#allocation19_spill]] }
  0x5b   : > { %6200 = vmatprep.subr.mxu0 %v6841_v7  ;;  %6210 = vmatpush3.msra.mxu1 %v1189_v13  ;;  %v1269_v33 = vld [vmem:[%s6907_s24] sm:$0xff]  ;;  %s7733_s8 = sld [smem:[#allocation8_spill]] }
  0x5c   : > { %6201 = vmatpush3.msra.mxu0 %v1104_v14  ;;  %6211 = vmatprep.subr.mxu1 %v6841_v7  ;;  %v1358_v34 = vld [vmem:[%s6872_s21] sm:$0xff] }
  0x5d   : > { %6202 = vmatprep.mubr.msk.f32.mxu0 %vm6842_vm1, %v6841_v7  ;;  %6212 = vmatpush3.msra.mxu1 %v1188_v15  ;;  %v5789_v35 = vld [vmem:[%s7716_s6] ss:$0 sm:$0xff] }
  0x5e   : > { %6213 = vmatprep.mubr.msk.f32.mxu1 %vm6842_vm1, %v6841_v7  ;;  %6216 = vmatprep.subr.mxu0 %v6841_v7  ;;  %v5791_v36 = vld [vmem:[%s7715_s12] ss:$0 sm:$0xff] }
  0x5f   : > { %6232 = vmatprep.subr.mxu1 %v6841_v7  ;;  %v5795_v38 = vld [vmem:[%s6877_s25] ss:$0 sm:$0xff] }
  0x60   : > { %v5793_v46 = vld [vmem:[%s6927_s20] ss:$0 sm:$0xff] }
  0x61   : > { %v5802_v52 = vld [vmem:[%s7713_s14 + $0x20] sm:$0xff] }
  0x62   : > { %v5816_v56 = vld [vmem:[%s6907_s24 + $0x20] sm:$0xff] }
  0x63   : > { %v5796_v57 = vld [vmem:[%s6882_s29] ss:$0 sm:$0xff] }
  0x64   : > { %v7168_v1 = vld [vmem:[%s1056_s23] sm:$0xff]  ;;  %s7725_s23 = sld [smem:[#allocation17_spill]] }
  0xe3   : > { %v1068_v2 = vpop.xlane.xlu0 %1067 }
  0xe4   : > { %v1070_v3 = vmul.f32 0.03125, %v1068_v2 }
  0xe6   : > { %v1071_v4 = vsub.f32 %v7073_v0, %v1070_v3 }
  0xe8   : > { %v1072_v5 = vmul.f32 %v1071_v4, %v1071_v4  ;;  %v1094_v25 = vmul.f32 %v5787_v24, %v1071_v4  ;;  %v5825_v24 = vld [vmem:[%s6872_s21 + $0x8] sm:$0xff] }
  0xea   : > { %v1073_v6 = vsel %vm1065_vm0, %v1072_v5, 0.0 }
  0xeb   : > { %1074 = vadd.xlane.f32.xlu0 %v1073_v6 }
 0x174   : > { %v1075_v16 = vpop.xlane.xlu0 %1074 }
 0x175   : > { %v1077_v17 = vmul.f32 0.032258064, %v1075_v16 }
 0x177   : > { %6702 = vrsqrt.f32 %v1077_v17  ;;  %vm1080_vm2 = vcmp.eq.f32.partialorder %v1077_v17, inf  ;;  %v1083_v20 = vand.u32 2147483648, %v1077_v17  ;;  %vm1082_vm3 = vcmp.eq.f32.partialorder %v1077_v17, 0.0 }
 0x184   : > { %v6703_v18 = vpop.eup %6702 }
 0x185   : > { %v1079_v19 = vmul.f32 %v6703_v18, %v1077_v17 }
 0x187   : > { %v1081_v21 = vsel %vm1080_vm2, %v1077_v17, %v1079_v19 }
 0x188   : > { %v1084_v22 = vsel %vm1082_vm3, %v1083_v20, %v1081_v21  ;;  %v5812_v20 = vld [vmem:[%s6902_s19 + $0x38] sm:$0xff]  ;;  %v5811_v21 = vld [vmem:[%s6902_s19 + $0x30] sm:$0xff] }
 0x189   : > { %v1085_v23 = vadd.f32 1e-06, %v1084_v22  ;;  %v5810_v22 = vld [vmem:[%s6902_s19 + $0x28] sm:$0xff] }
 0x18b   : > { %6704 = vrcp.f32 %v1085_v23  ;;  %v5809_v23 = vld [vmem:[%s6902_s19 + $0x20] sm:$0xff] }
 0x198   : > { %v6705_v26 = vpop.eup %6704 }
 0x199   : > { %v1095_v28 = vmul.f32 %v6705_v26, %v1094_v25  ;;  %v5807_v25 = vld [vmem:[%s7716_s6 + $0x1] ss:$0 sm:$0xff] }
 0x19b   : > { %v7103_v29 = vadd.f32 %v5788_v27, %v1095_v28 }
 0x19d   : > { %6203 = vmatmul.mubr.msk.f32.vlgmr.msra.gmra.mxu0 %vm1065_vm0, %v7103_v29  ;;  %6214 = vmatmul.mubr.msk.f32.vlgmr.msra.gmra.mxu1 %vm1065_vm0, %v7103_v29 }
 0x19e   : > { %6217 = vmatpush3.msra.mxu0 %v1272_v30  ;;  %6224 = vmatprep.mubr.msk.f32.mxu0 %vm6842_vm1, %v6841_v7  ;;  %v5814_v30 = vld [vmem:[%s7715_s12 + $0x1] ss:$0 sm:$0xff] }
 0x19f   : > { %6218 = vmatprep.subr.mxu0 %v6841_v7  ;;  %6234 = vmatprep.mubr.msk.f32.mxu1 %vm6842_vm1, %v6841_v7 }
 0x1a0   : > { %6219 = vmatpush3.msra.mxu0 %v1271_v31 }
 0x1a1   : > { %6220 = vmatprep.subr.mxu0 %v6841_v7 }
 0x1a2   : > { %6221 = vmatpush3.msra.mxu0 %v1270_v32  ;;  %v5824_v32 = vld [vmem:[%s6877_s25 + $0x1] ss:$0 sm:$0xff] }
 0x1a3   : > { %6222 = vmatprep.subr.mxu0 %v6841_v7 }
 0x1a4   : > { %6223 = vmatpush3.msra.mxu0 %v1269_v33 }
 0x1a5   : > { %6225 = vmatmul.mubr.msk.f32.vlgmr.msra.gmra.mxu0 %vm1065_vm0, %v7103_v29  ;;  %6227 = vmatprep.subr.mxu0 %v6841_v7 }
 0x1a6   : > { %6229 = vmatprep.mubr.msk.f32.mxu0 %vm6842_vm1, %v6841_v7  ;;  %6228 = vmatpush3.xpose.msk.msra.mxu0 %vm1366_vm4, %v1358_v34 }
 0x1a7   : > { %6237 = vmatprep.subr.mxu0 %v6841_v7 }
 0x25d   : > { %v1184_v37 = vpop.f32.mrf.mxu0  ;;  %v1265_v39 = vpop.f32.mrf.mxu1 }
 0x25e   : > { %v1185_v40 = vadd.f32 %v5789_v35, %v1184_v37  ;;  %v1266_v41 = vadd.f32 %v5791_v36, %v1265_v39 }
 0x25f   : > { %v6204_v42 = vpop.f32.mrf.mxu0  ;;  %v6215_v43 = vpop.f32.mrf.mxu1 }
 0x260   : > { %v1357_v44 = vadd.f32 %v5795_v38, %v1185_v40  ;;  %6230 = vmatmul.mubr.msk.f32.vlgmr.msra.gmra.mxu0 %vm1366_vm4, %v1185_v40  ;;  %6233 = vmatpush3.xpose.msk.msra.mxu1 %vm1366_vm4, %v1266_v41  ;;  %v5827_v38 = vld [vmem:[%s6882_s29 + $0x1] ss:$0 sm:$0xff] }
 0x261   : > { %6242 = vmatprep.subr.mxu1 %v6841_v7  ;;  %6239 = vmatprep.mubr.msk.f32.mxu0 %vm6842_vm1, %v6841_v7 }
 0x263   : > { %6235 = vmatmul.mubr.msk.f32.vlgmr.msra.gmra.mxu1 %vm1366_vm4, %v1357_v44 }
 0x264   : > { %6243 = vmatpush3.msra.mxu1 %v5805_v45  ;;  %6250 = vmatprep.mubr.msk.f32.mxu1 %vm6842_vm1, %v6841_v7 }
 0x265   : > { %v1346_v48 = vpop.f32.mrf.mxu0  ;;  %6244 = vmatprep.subr.mxu1 %v6841_v7 }
 0x266   : > { %v1347_v50 = vadd.f32 %v5793_v46, %v1346_v48  ;;  %6245 = vmatpush3.msra.mxu1 %v5804_v47 }
 0x267   : > { %v6226_v51 = vpop.f32.mrf.mxu0  ;;  %6246 = vmatprep.subr.mxu1 %v6841_v7 }
 0x268   : > { %6238 = vmatpush3.msra.mxu0 %v1347_v50  ;;  %6247 = vmatpush3.msra.mxu1 %v5803_v49  ;;  %v5833_v51 = vld [vmem:[%s6912_s30 + $0x8] sm:$0xff] }
 0x269   : > { %6248 = vmatprep.subr.mxu1 %v6841_v7  ;;  %6253 = vmatprep.subr.mxu0 %v6841_v7 }
 0x26a   : > { %6249 = vmatpush3.msra.mxu1 %v5802_v52 }
 0x26b   : > { %6251 = vmatmul.mubr.msk.f32.vlgmr.msra.gmra.mxu1 %vm1065_vm0, %v7103_v29  ;;  %6264 = vmatprep.subr.mxu1 %v6841_v7 }
 0x26c   : > { %6265 = vmatpush3.msra.mxu1 %v5819_v53  ;;  %6272 = vmatprep.mubr.msk.f32.mxu1 %vm6842_vm1, %v6841_v7 }
 0x26d   : > { %6266 = vmatprep.subr.mxu1 %v6841_v7 }
 0x26e   : > { %6267 = vmatpush3.msra.mxu1 %v5818_v54 }
 0x26f   : > { %6268 = vmatprep.subr.mxu1 %v6841_v7 }
 0x270   : > { %6269 = vmatpush3.msra.mxu1 %v5817_v55  ;;  %v1605_v55 = vld [vmem:[%s6912_s30] sm:$0xff] }
 0x271   : > { %6270 = vmatprep.subr.mxu1 %v6841_v7 }
 0x272   : > { %6271 = vmatpush3.msra.mxu1 %v5816_v56  ;;  %v5846_v56 = vld [vmem:[%s6902_s19 + $0x58] sm:$0xff] }
 0x273   : > { %6273 = vmatmul.mubr.msk.f32.vlgmr.msra.gmra.mxu1 %vm1065_vm0, %v7103_v29  ;;  %6285 = vmatprep.subr.mxu1 %v6841_v7 }
 0x274   : > { %6287 = vmatprep.mubr.msk.f32.mxu1 %vm6842_vm1, %v6841_v7 }
 0x320   : > { %v1439_v58 = vpop.f32.mrf.mxu0 }
 0x321   : > { %v1440_v59 = vadd.f32 %v5796_v57, %v1439_v58  ;;  %v5845_v57 = vld [vmem:[%s6902_s19 + $0x50] sm:$0xff]  ;;  %v5844_v58 = vld [vmem:[%s6902_s19 + $0x48] sm:$0xff] }
 0x322   : > { %v6231_v60 = vpop.f32.mrf.mxu0 }
 0x323   : > { %v1515_v61 = vpop.f32.mrf.mxu1  ;;  %v5839_v60 = vld [vmem:[%s7713_s14 + $0x58] sm:$0xff] }
 0x324   : > { %v1516_v62 = vadd.f32 %v1515_v61, %v1440_v59  ;;  %v5843_v59 = vld [vmem:[%s6902_s19 + $0x40] sm:$0xff] }
 0x325   : > { %v6236_v63 = vpop.f32.mrf.mxu1 }
 0x326   : > { %v1519_v2 = vmul.f32 0.35355338, %v1516_v62  ;;  %v5838_v62 = vld [vmem:[%s7713_s14 + $0x50] sm:$0xff] }
 0x328   : > { %v1520_v3 = vadd.f32 %v1519_v2, %v7168_v1  ;;  %v5837_v2 = vld [vmem:[%s7713_s14 + $0x48] sm:$0xff] }
 0x32a   : > { %v1521_v4 = vsel %vm1366_vm4, %v1520_v3, -inf }
 0x32b   : > { %v1685_v5 = vpop.f32.mrf.mxu1  ;;  %1522 = vmax.xlane.f32.xlu1 %v1521_v4  ;;  %v5836_v4 = vld [vmem:[%s7713_s14 + $0x40] sm:$0xff] }
 0x32c   : > { %v1686_v26 = vadd.f32 %v5807_v25, %v1685_v5 }
 0x32d   : > { %v6252_v6 = vpop.f32.mrf.mxu1 }
 0x32e   : > { %v1863_v35 = vadd.f32 %v5824_v32, %v1686_v26  ;;  %v5853_v6 = vld [vmem:[%s6907_s24 + $0x58] sm:$0xff] }
 0x333   : > { %v1851_v9 = vpop.f32.mrf.mxu1 }
 0x334   : > { %v1852_v10 = vadd.f32 %v5821_v8, %v1851_v9  ;;  %v5852_v8 = vld [vmem:[%s6907_s24 + $0x50] sm:$0xff]  ;;  %v5851_v9 = vld [vmem:[%s6907_s24 + $0x48] sm:$0xff] }
 0x335   : > { %v6274_v11 = vpop.f32.mrf.mxu1 }
 0x336   : > { %6286 = vmatpush3.msra.mxu1 %v1852_v10  ;;  %v5850_v11 = vld [vmem:[%s6907_s24 + $0x40] sm:$0xff] }
 0x337   : > { %6295 = vmatprep.subr.mxu1 %v6841_v7 }
 0x3b4   : > { %v1523_v12 = vpop.xlane.xlu1 %1522 }
 0x3b5   : > { %v1524_v13 = vsub.f32 %v1520_v3, %v1523_v12 }
 0x3b7   : > { %v1525_v14 = vmul.f32 1.442695, %v1524_v13  ;;  %v5859_v13 = vld [vmem:[%s6872_s21 + $0x10] sm:$0xff] }
 0x3b9   : > { %6706 = vpow2.f32 %v1525_v14 }
 0x3c6   : > { %v6707_v15 = vpop.eup %6706 }
 0x3c7   : > { %v1527_v16 = vsel %vm1366_vm4, %v6707_v15, 0.0 }
 0x3c8   : > { %1528 = vadd.xlane.f32.xlu1 %v1527_v16  ;;  %v5841_v16 = vld [vmem:[%s7716_s6 + $0x2] ss:$0 sm:$0xff] }
 0x451   : > { %v1529_v17 = vpop.xlane.xlu1 %1528 }
 0x452   : > { %6708 = vrcp.f32 %v1529_v17  ;;  %v5848_v17 = vld [vmem:[%s7715_s12 + $0x2] ss:$0 sm:$0xff] }
 0x45f   : > { %v6709_v18 = vpop.eup %6708 }
 0x460   : > { %v1531_v19 = vmul.f32 %v6709_v18, %v6707_v15 }
 0x462   : > { %6240 = vmatmul.mubr.msk.f32.vlgmr.msra.gmra.mxu0 %vm1366_vm4, %v1531_v19 }
 0x463   : > { %6254 = vmatpush3.msra.mxu0 %v5812_v20  ;;  %6261 = vmatprep.mubr.msk.f32.mxu0 %vm6842_vm1, %v6841_v7 }
 0x464   : > { %6255 = vmatprep.subr.mxu0 %v6841_v7 }
 0x465   : > { %6256 = vmatpush3.msra.mxu0 %v5811_v21  ;;  %v5858_v21 = vld [vmem:[%s6877_s25 + $0x2] ss:$0 sm:$0xff] }
 0x466   : > { %6257 = vmatprep.subr.mxu0 %v6841_v7 }
 0x467   : > { %6258 = vmatpush3.msra.mxu0 %v5810_v22 }
 0x468   : > { %6259 = vmatprep.subr.mxu0 %v6841_v7 }
 0x469   : > { %6260 = vmatpush3.msra.mxu0 %v5809_v23 }
 0x46a   : > { %6262 = vmatmul.mubr.msk.f32.vlgmr.msra.gmra.mxu0 %vm1065_vm0, %v7103_v29  ;;  %6275 = vmatprep.subr.mxu0 %v6841_v7 }
 0x46b   : > { %6276 = vmatpush3.xpose.msk.msra.mxu0 %vm1366_vm4, %v5825_v24  ;;  %6277 = vmatprep.mubr.msk.f32.mxu0 %vm6842_vm1, %v6841_v7  ;;  %v5855_v24 = vld [vmem:[%s6927_s20 + $0x2] ss:$0 sm:$0xff] }
 0x46c   : > { %6280 = vmatprep.subr.mxu0 %v6841_v7 }
 0x46e   : > { %6278 = vmatmul.mubr.msk.f32.vlgmr.msra.gmra.mxu0 %vm1366_vm4, %v1686_v26 }
 0x46f   : > { %6282 = vmatprep.mubr.msk.f32.mxu0 %vm6842_vm1, %v6841_v7 }
 0x522   : > { %v1601_v27 = vpop.f32.mrf.mxu0 }
 0x524   : > { %v6241_v28 = vpop.f32.mrf.mxu0 }
 0x525   : > { %v5861_v28 = vld [vmem:[%s6882_s29 + $0x2] ss:$0 sm:$0xff] }
 0x52a   : > { %v1768_v31 = vpop.f32.mrf.mxu0 }
 0x52b   : > { %v1769_v33 = vadd.f32 %v5814_v30, %v1768_v31 }
 0x52c   : > { %v6263_v34 = vpop.f32.mrf.mxu0 }
 0x52d   : > { %6281 = vmatpush3.xpose.msk.msra.mxu0 %vm1366_vm4, %v1769_v33 }
 0x52e   : > { %v1946_v36 = vpop.f32.mrf.mxu0  ;;  %6290 = vmatprep.subr.mxu0 %v6841_v7 }
 0x52f   : > { %v1947_v39 = vadd.f32 %v5827_v38, %v1946_v36 }
 0x530   : > { %v6279_v37 = vpop.f32.mrf.mxu0  ;;  %6283 = vmatmul.mubr.msk.f32.vlgmr.msra.gmra.mxu0 %vm1366_vm4, %v1863_v35 }
 0x531   : > { %6292 = vmatprep.mubr.msk.f32.mxu0 %vm6842_vm1, %v6841_v7  ;;  %6291 = vmatpush3.msra.mxu0 %v5833_v51  ;;  %v5869_v51 = vld [vmem:[%s7713_s14 + $0x60] sm:$0xff] }
 0x532   : > { %6300 = vmatprep.subr.mxu0 %v6841_v7 }
 0x5f0   : > { %v2022_v40 = vpop.f32.mrf.mxu0 }
 0x5f1   : > { %v2023_v41 = vadd.f32 %v2022_v40, %v1947_v39 }
 0x5f2   : > { %v6284_v42 = vpop.f32.mrf.mxu0 }
 0x5f3   : > { %v2026_v43 = vmul.f32 0.35355338, %v2023_v41 }
 0x5f5   : > { %v2027_v44 = vadd.f32 %v2026_v43, %v7168_v1 }
 0x5f7   : > { %v2028_v45 = vsel %vm1366_vm4, %v2027_v44, -inf }
 0x5f8   : > { %2029 = vmax.xlane.f32.xlu0 %v2028_v45 }
 0x681   : > { %v2030_v46 = vpop.xlane.xlu0 %2029 }
 0x682   : > { %v2031_v47 = vsub.f32 %v2027_v44, %v2030_v46  ;;  %v5867_v44 = vld [vmem:[%s6912_s30 + $0x10] sm:$0xff] }
 0x684   : > { %v2032_v48 = vmul.f32 1.442695, %v2031_v47 }
 0x686   : > { %6710 = vpow2.f32 %v2032_v48  ;;  %v5872_v48 = vld [vmem:[%s7713_s14 + $0x78] sm:$0xff] }
 0x693   : > { %v6711_v49 = vpop.eup %6710 }
 0x694   : > { %v2034_v50 = vsel %vm1366_vm4, %v6711_v49, 0.0 }
 0x695   : > { %2035 = vadd.xlane.f32.xlu1 %v2034_v50  ;;  %v5870_v50 = vld [vmem:[%s7713_s14 + $0x68] sm:$0xff] }
 0x71e   : > { %v2036_v52 = vpop.xlane.xlu1 %2035 }
 0x71f   : > { %6712 = vrcp.f32 %v2036_v52  ;;  %v5886_v52 = vld [vmem:[%s6907_s24 + $0x78] sm:$0xff] }
 0x72c   : > { %v6713_v53 = vpop.eup %6712 }
 0x72d   : > { %v2038_v54 = vmul.f32 %v6713_v53, %v6711_v49  ;;  %v5871_v49 = vld [vmem:[%s7713_s14 + $0x70] sm:$0xff]  ;;  %s6843_s14 = smov [#allocation2]  }
 0x72e   : > { %v5885_v53 = vld [vmem:[%s6907_s24 + $0x70] sm:$0xff] }
 0x72f   : > { %6288 = vmatmul.mubr.msk.f32.vlgmr.msra.gmra.mxu1 %vm1366_vm4, %v2038_v54  ;;  %v5884_v54 = vld [vmem:[%s6907_s24 + $0x68] sm:$0xff] }
 0x730   : > { %6296 = vmatpush3.msra.mxu1 %v1605_v55  ;;  %6297 = vmatprep.mubr.msk.f32.mxu1 %vm6842_vm1, %v6841_v7  ;;  %v5883_v55 = vld [vmem:[%s6907_s24 + $0x60] sm:$0xff] }
 0x731   : > { %6311 = vmatprep.subr.mxu1 %v6841_v7 }
 0x733   : > { %6298 = vmatmul.mubr.msk.f32.vlgmr.msra.gmra.mxu1 %vm1366_vm4, %v1601_v27 }
 0x734   : > { %6312 = vmatpush3.msra.mxu1 %v5846_v56  ;;  %6319 = vmatprep.mubr.msk.f32.mxu1 %vm6842_vm1, %v6841_v7  ;;  %v5879_v56 = vld [vmem:[%s6902_s19 + $0x78] sm:$0xff] }
 0x735   : > { %6313 = vmatprep.subr.mxu1 %v6841_v7 }
 0x736   : > { %6314 = vmatpush3.msra.mxu1 %v5845_v57 }
 0x737   : > { %6315 = vmatprep.subr.mxu1 %v6841_v7 }
 0x738   : > { %6316 = vmatpush3.msra.mxu1 %v5844_v58  ;;  %v5878_v58 = vld [vmem:[%s6902_s19 + $0x70] sm:$0xff] }
 0x739   : > { %6317 = vmatprep.subr.mxu1 %v6841_v7 }
 0x73a   : > { %6318 = vmatpush3.msra.mxu1 %v5843_v59 }
 0x73b   : > { %6320 = vmatmul.mubr.msk.f32.vlgmr.msra.gmra.mxu1 %vm1065_vm0, %v7103_v29  ;;  %6333 = vmatprep.subr.mxu1 %v6841_v7 }
 0x73c   : > { %6335 = vmatprep.mubr.msk.f32.mxu1 %vm6842_vm1, %v6841_v7  ;;  %6334 = vmatpush3.xpose.msk.msra.mxu1 %vm1366_vm4, %v5859_v13 }
 0x73d   : > { %6338 = vmatprep.subr.mxu1 %v6841_v7 }
 0x7ef   : > { %v2108_v61 = vpop.f32.mrf.mxu1 }
 0x7f0   : > { %6293 = vmatmul.mubr.msk.f32.vlgmr.msra.gmra.mxu0 %vm1366_vm4, %v2108_v61  ;;  %v5876_v61 = vld [vmem:[%s6902_s19 + $0x60] sm:$0xff] }
 0x7f1   : > { %6301 = vmatpush3.msra.mxu0 %v5839_v60  ;;  %v6289_v63 = vpop.f32.mrf.mxu1  ;;  %6308 = vmatprep.mubr.msk.f32.mxu0 %vm6842_vm1, %v6841_v7  ;;  %v5877_v60 = vld [vmem:[%s6902_s19 + $0x68] sm:$0xff] }
 0x7f2   : > { %6302 = vmatprep.subr.mxu0 %v6841_v7  ;;  %v5874_v63 = vld [vmem:[%s7716_s6 + $0x3] ss:$0 sm:$0xff]  ;;  %s7732_s6 = sld [smem:[#allocation23_spill]] }
 0x7f3   : > { %6303 = vmatpush3.msra.mxu0 %v5838_v62  ;;  %v7237_v3 = vpop.f32.mrf.mxu1  ;;  %v5892_v62 = vld [vmem:[%s6872_s21 + $0x18] sm:$0xff] }
 0x7f4   : > { %6304 = vmatprep.subr.mxu0 %v6841_v7 }
 0x7f5   : > { %6305 = vmatpush3.msra.mxu0 %v5837_v2  ;;  %v6299_v5 = vpop.f32.mrf.mxu1 }
 0x7f6   : > { %6306 = vmatprep.subr.mxu0 %v6841_v7 }
 0x7f7   : > { %6307 = vmatpush3.msra.mxu0 %v5836_v4 }
 0x7f8   : > { %6309 = vmatmul.mubr.msk.f32.vlgmr.msra.gmra.mxu0 %vm1065_vm0, %v7103_v29  ;;  %6322 = vmatprep.subr.mxu0 %v6841_v7 }
 0x7f9   : > { %6323 = vmatpush3.msra.mxu0 %v5853_v6  ;;  %6330 = vmatprep.mubr.msk.f32.mxu0 %vm6842_vm1, %v6841_v7  ;;  %v5888_v6 = vld [vmem:[%s6927_s20 + $0x3] ss:$0 sm:$0xff] }
 0x7fa   : > { %6324 = vmatprep.subr.mxu0 %v6841_v7 }
 0x7fb   : > { %v2422_v10 = vpop.f32.mrf.mxu1  ;;  %6325 = vmatpush3.msra.mxu0 %v5852_v8 }
 0x7fc   : > { %6326 = vmatprep.subr.mxu0 %v6841_v7  ;;  %v2423_v20 = vadd.f32 %v5848_v17, %v2422_v10  ;;  %v5891_v17 = vld [vmem:[%s6877_s25 + $0x3] ss:$0 sm:$0xff] }
 0x7fd   : > { %v6321_v12 = vpop.f32.mrf.mxu1  ;;  %6327 = vmatpush3.msra.mxu0 %v5851_v9 }
 0x7fe   : > { %6328 = vmatprep.subr.mxu0 %v6841_v7 }
 0x7ff   : > { %6329 = vmatpush3.msra.mxu0 %v5850_v11 }
 0x800   : > { %6331 = vmatmul.mubr.msk.f32.vlgmr.msra.gmra.mxu0 %vm1065_vm0, %v7103_v29  ;;  %6343 = vmatprep.subr.mxu0 %v6841_v7 }
 0x801   : > { %6345 = vmatprep.mubr.msk.f32.mxu0 %vm6842_vm1, %v6841_v7 }
 0x8b0   : > { %v7262_v14 = vpop.f32.mrf.mxu0 }
 0x8b1   : > { %v2257_v10 = vadd.f32 %v7237_v3, %v7262_v14  ;;  %v5894_v3 = vld [vmem:[%s6882_s29 + $0x3] ss:$0 sm:$0xff] }
 0x8b2   : > { %v6294_v15 = vpop.f32.mrf.mxu0 }
 0x8b3   : > { %v5881_v15 = vld [vmem:[%s7715_s12 + $0x3] ss:$0 sm:$0xff]  ;;  %s1060_s12 = scalar_lea.vmem %s7733_s8, %s7069_s16  ;;  %s7734_s8 = sld [smem:[#allocation20_spill]] }
 0x8b8   : > { %v2339_v18 = vpop.f32.mrf.mxu0 }
 0x8b9   : > { %v2340_v19 = vadd.f32 %v5841_v16, %v2339_v18 }
 0x8ba   : > { %v6310_v22 = vpop.f32.mrf.mxu0 }
 0x8bb   : > { %6336 = vmatmul.mubr.msk.f32.vlgmr.msra.gmra.mxu1 %vm1366_vm4, %v2340_v19  ;;  %v2517_v23 = vadd.f32 %v5858_v21, %v2340_v19 }
 0x8bc   : > { %6339 = vmatpush3.xpose.msk.msra.mxu1 %vm1366_vm4, %v2423_v20  ;;  %6340 = vmatprep.mubr.msk.f32.mxu1 %vm6842_vm1, %v6841_v7 }
 0x8bd   : > { %6348 = vmatprep.subr.mxu1 %v6841_v7 }
 0x8bf   : > { %6341 = vmatmul.mubr.msk.f32.vlgmr.msra.gmra.mxu1 %vm1366_vm4, %v2517_v23 }
 0x8c0   : > { %v2505_v25 = vpop.f32.mrf.mxu0  ;;  %6350 = vmatprep.mubr.msk.f32.mxu1 %vm6842_vm1, %v6841_v7  ;;  %6349 = vmatpush3.msra.mxu1 %v5867_v44 }
 0x8c1   : > { %v2506_v26 = vadd.f32 %v5855_v24, %v2505_v25  ;;  %6364 = vmatprep.subr.mxu1 %v6841_v7 }
 0x8c2   : > { %v6332_v27 = vpop.f32.mrf.mxu0 }
 0x8c3   : > { %6344 = vmatpush3.msra.mxu0 %v2506_v26 }
 0x8c4   : > { %6353 = vmatprep.subr.mxu0 %v6841_v7 }
 0x97b   : > { %v2600_v30 = vpop.f32.mrf.mxu1 }
 0x97c   : > { %v2601_v32 = vadd.f32 %v5861_v28, %v2600_v30 }
 0x97d   : > { %v6337_v31 = vpop.f32.mrf.mxu1 }
 0x97f   : > { %v2676_v33 = vpop.f32.mrf.mxu1 }
 0x980   : > { %v2677_v34 = vadd.f32 %v2676_v33, %v2601_v32 }
 0x981   : > { %v6342_v35 = vpop.f32.mrf.mxu1 }
 0x982   : > { %v2680_v36 = vmul.f32 0.35355338, %v2677_v34  ;;  %v5900_v35 = vld [vmem:[%s6912_s30 + $0x18] sm:$0xff] }
 0x984   : > { %v2681_v37 = vadd.f32 %v2680_v36, %v7168_v1 }
 0x986   : > { %v2682_v38 = vsel %vm1366_vm4, %v2681_v37, -inf }
 0x987   : > { %2683 = vmax.xlane.f32.xlu0 %v2682_v38 }
 0xa10   : > { %v2684_v39 = vpop.xlane.xlu0 %2683 }
 0xa11   : > { %v2685_v40 = vsub.f32 %v2681_v37, %v2684_v39 }
 0xa13   : > { %v2686_v41 = vmul.f32 1.442695, %v2685_v40 }
 0xa15   : > { %6714 = vpow2.f32 %v2686_v41 }
 0xa22   : > { %v6715_v42 = vpop.eup %6714 }
 0xa23   : > { %v2688_v43 = vsel %vm1366_vm4, %v6715_v42, 0.0 }
 0xa24   : > { %2689 = vadd.xlane.f32.xlu1 %v2688_v43 }
 0xaad   : > { %v2690_v45 = vpop.xlane.xlu1 %2689 }
 0xaae   : > { %6716 = vrcp.f32 %v2690_v45 }
 0xabb   : > { %v6717_v46 = vpop.eup %6716 }
 0xabc   : > { %v2692_v47 = vmul.f32 %v6717_v46, %v6715_v42  ;;  %v5902_v42 = vld [vmem:[%s7723_s2] ss:$0 sm:$0xff]  ;;  %s1052_s2 = scalar_lea.vmem %s7726_s3, %s7069_s16  ;;  %s7727_s3 = sld [smem:[#allocation15_spill]] }
 0xabd   : > { %s7736_s16 = sld [smem:[#allocation27_spill]] }
 0xabe   : > { %6346 = vmatmul.mubr.msk.f32.vlgmr.msra.gmra.mxu0 %vm1366_vm4, %v2692_v47 }
 0xabf   : > { %6354 = vmatpush3.msra.mxu0 %v5872_v48  ;;  %6361 = vmatprep.mubr.msk.f32.mxu0 %vm6842_vm1, %v6841_v7 }
 0xac0   : > { %6355 = vmatprep.subr.mxu0 %v6841_v7 }
 0xac1   : > { %6356 = vmatpush3.msra.mxu0 %v5871_v49 }
 0xac2   : > { %6357 = vmatprep.subr.mxu0 %v6841_v7 }
 0xac3   : > { %6358 = vmatpush3.msra.mxu0 %v5870_v50 }
 0xac4   : > { %6359 = vmatprep.subr.mxu0 %v6841_v7 }
 0xac5   : > { %6360 = vmatpush3.msra.mxu0 %v5869_v51 }
 0xac6   : > { %6362 = vmatmul.mubr.msk.f32.vlgmr.msra.gmra.mxu0 %vm1065_vm0, %v7103_v29  ;;  %6375 = vmatprep.subr.mxu0 %v6841_v7 }
 0xac7   : > { %6376 = vmatpush3.msra.mxu0 %v5886_v52  ;;  %6383 = vmatprep.mubr.msk.f32.mxu0 %vm6842_vm1, %v6841_v7  ;;  %v3555_v52 = vld [vmem:[%s7724_s22 + $0x10] sm:$0xff] }
 0xac8   : > { %6377 = vmatprep.subr.mxu0 %v6841_v7 }
 0xac9   : > { %6378 = vmatpush3.msra.mxu0 %v5885_v53  ;;  %v3472_v53 = vld [vmem:[%s7725_s23 + $0x18] sm:$0xff] }
 0xaca   : > { %6379 = vmatprep.subr.mxu0 %v6841_v7 }
 0xacb   : > { %6380 = vmatpush3.msra.mxu0 %v5884_v54  ;;  %v3471_v54 = vld [vmem:[%s7725_s23 + $0x10] sm:$0xff] }
 0xacc   : > { %6381 = vmatprep.subr.mxu0 %v6841_v7 }
 0xacd   : > { %6382 = vmatpush3.msra.mxu0 %v5883_v55  ;;  %v3554_v55 = vld [vmem:[%s7724_s22 + $0x8] sm:$0xff] }
 0xace   : > { %6384 = vmatmul.mubr.msk.f32.vlgmr.msra.gmra.mxu0 %vm1065_vm0, %v7103_v29  ;;  %6396 = vmatprep.subr.mxu0 %v6841_v7 }
 0xacf   : > { %6398 = vmatprep.mubr.msk.f32.mxu0 %vm6842_vm1, %v6841_v7 }
 0xb7e   : > { %v2762_v57 = vpop.f32.mrf.mxu0 }
 0xb7f   : > { %6351 = vmatmul.mubr.msk.f32.vlgmr.msra.gmra.mxu1 %vm1366_vm4, %v2762_v57  ;;  %v3553_v57 = vld [vmem:[%s7724_s22] sm:$0xff] }
 0xb80   : > { %6365 = vmatpush3.msra.mxu1 %v5879_v56  ;;  %v6347_v59 = vpop.f32.mrf.mxu0  ;;  %6372 = vmatprep.mubr.msk.f32.mxu1 %vm6842_vm1, %v6841_v7  ;;  %v3470_v56 = vld [vmem:[%s7725_s23 + $0x8] sm:$0xff] }
 0xb81   : > { %6366 = vmatprep.subr.mxu1 %v6841_v7  ;;  %v7377_v59 = vld [vmem:[%s1052_s2] sm:$0xff]  ;;  %s7728_s2 = sld [smem:[#allocation16_spill]] }
 0xb82   : > { %6367 = vmatpush3.msra.mxu1 %v5878_v58  ;;  %v3469_v58 = vld [vmem:[%s7725_s23] sm:$0xff] }
 0xb83   : > { %6368 = vmatprep.subr.mxu1 %v6841_v7 }
 0xb84   : > { %6369 = vmatpush3.msra.mxu1 %v5877_v60 }
 0xb85   : > { %6370 = vmatprep.subr.mxu1 %v6841_v7 }
 0xb86   : > { %v2921_v2 = vpop.f32.mrf.mxu0  ;;  %6371 = vmatpush3.msra.mxu1 %v5876_v61 }
 0xb87   : > { %6373 = vmatmul.mubr.msk.f32.vlgmr.msra.gmra.mxu1 %vm1065_vm0, %v7103_v29  ;;  %6386 = vmatprep.subr.mxu1 %v6841_v7  ;;  %v2922_v5 = vadd.f32 %v5874_v63, %v2921_v2 }
 0xb88   : > { %v6363_v4 = vpop.f32.mrf.mxu0  ;;  %6387 = vmatpush3.xpose.msk.msra.mxu1 %vm1366_vm4, %v5892_v62  ;;  %6388 = vmatprep.mubr.msk.f32.mxu1 %vm6842_vm1, %v6841_v7 }
 0xb89   : > { %6391 = vmatprep.subr.mxu1 %v6841_v7  ;;  %v3099_v20 = vadd.f32 %v5891_v17, %v2922_v5  ;;  %v3637_v17 = vld [vmem:[%s7729_s5] sm:$0xff] }
 0xb8b   : > { %6389 = vmatmul.mubr.msk.f32.vlgmr.msra.gmra.mxu1 %vm1366_vm4, %v2922_v5 }
 0xb8c   : > { %6393 = vmatprep.mubr.msk.f32.mxu1 %vm6842_vm1, %v6841_v7 }
 0xb8e   : > { %v3087_v29 = vpop.f32.mrf.mxu0 }
 0xb8f   : > { %v3088_v8 = vadd.f32 %v5888_v6, %v3087_v29  ;;  %v5903_v29 = vld [vmem:[%s7727_s3] ss:$0 sm:$0xff]  ;;  %s7730_s3 = sld [smem:[#allocation22_spill]] }
 0xb90   : > { %v6385_v9 = vpop.f32.mrf.mxu0 }
 0xb91   : > { %6397 = vmatpush3.msra.mxu0 %v3088_v8 }
 0xb92   : > { %6406 = vmatprep.subr.mxu0 %v6841_v7 }
 0xc3f   : > { %v2837_v11 = vpop.f32.mrf.mxu1 }
 0xc40   : > { %v2841_v12 = vadd.f32 %v2837_v11, %v2257_v10  ;;  %v5904_v10 = vld [vmem:[%s7728_s2] ss:$0 sm:$0xff]  ;;  %s7731_s2 = sld [smem:[#allocation21_spill]] }
 0xc41   : > { %v6352_v13 = vpop.f32.mrf.mxu1 }
 0xc42   : > { %v3640_v13 = vld [vmem:[%s7729_s5 + $0x18] sm:$0xff] }
 0xc47   : > { %v3004_v16 = vpop.f32.mrf.mxu1 }
 0xc48   : > { %v3005_v18 = vadd.f32 %v5881_v15, %v3004_v16  ;;  %v3639_v15 = vld [vmem:[%s7729_s5 + $0x10] sm:$0xff]  ;;  %v3638_v16 = vld [vmem:[%s7729_s5 + $0x8] sm:$0xff] }
 0xc49   : > { %v6374_v19 = vpop.f32.mrf.mxu1 }
 0xc4a   : > { %6392 = vmatpush3.xpose.msk.msra.mxu1 %vm1366_vm4, %v3005_v18  ;;  %v5917_v18 = vld [vmem:[%s7725_s23 + $0x38] sm:$0xff]  ;;  %v5916_v19 = vld [vmem:[%s7725_s23 + $0x30] sm:$0xff] }
 0xc4b   : > { %v3182_v21 = vpop.f32.mrf.mxu1  ;;  %6401 = vmatprep.subr.mxu1 %v6841_v7 }
 0xc4c   : > { %v3183_v14 = vadd.f32 %v5894_v3, %v3182_v21  ;;  %v5914_v21 = vld [vmem:[%s7725_s23 + $0x20] sm:$0xff] }
 0xc4d   : > { %v6390_v22 = vpop.f32.mrf.mxu1  ;;  %6394 = vmatmul.mubr.msk.f32.vlgmr.msra.gmra.mxu1 %vm1366_vm4, %v3099_v20  ;;  %v5915_v20 = vld [vmem:[%s7725_s23 + $0x28] sm:$0xff] }
 0xc4e   : > { %6403 = vmatprep.mubr.msk.f32.mxu1 %vm6842_vm1, %v6841_v7  ;;  %6402 = vmatpush3.msra.mxu1 %v5900_v35  ;;  %v5907_v22 = vld [vmem:[%s7730_s3] ss:$0 sm:$0xff] }
 0xc4f   : > { %6417 = vmatprep.subr.mxu1 %v6841_v7 }
 0xd0d   : > { %v3258_v23 = vpop.f32.mrf.mxu1 }
 0xd0e   : > { %v3259_v24 = vadd.f32 %v3258_v23, %v3183_v14 }
 0xd0f   : > { %v6395_v25 = vpop.f32.mrf.mxu1 }
 0xd10   : > { %v3262_v26 = vmul.f32 0.35355338, %v3259_v24  ;;  %v5905_v24 = vld [vmem:[%s7731_s2] ss:$0 sm:$0xff] }
 0xd12   : > { %v3263_v27 = vadd.f32 %v3262_v26, %v7168_v1 }
 0xd14   : > { %v3264_v28 = vsel %vm1366_vm4, %v3263_v27, -inf }
 0xd15   : > { %3265 = vmax.xlane.f32.xlu0 %v3264_v28  ;;  %v5909_v28 = vld [vmem:[%s7732_s6] ss:$0 sm:$0xff] }
 0xd9e   : > { %v3266_v30 = vpop.xlane.xlu0 %3265 }
 0xd9f   : > { %v3267_v31 = vsub.f32 %v3263_v27, %v3266_v30 }
 0xda1   : > { %v3268_v32 = vmul.f32 1.442695, %v3267_v31 }
 0xda3   : > { %6718 = vpow2.f32 %v3268_v32 }
 0xdb0   : > { %v6719_v33 = vpop.eup %6718 }
 0xdb1   : > { %v3270_v34 = vsel %vm1366_vm4, %v6719_v33, 0.0 }
 0xdb2   : > { %3271 = vadd.xlane.f32.xlu1 %v3270_v34 }
 0xe3b   : > { %v3272_v36 = vpop.xlane.xlu1 %3271 }
 0xe3c   : > { %6720 = vrcp.f32 %v3272_v36  ;;  %v7430_v36 = vld [vmem:[%s1060_s12] sm:$0xff]  ;;  %s7735_s12 = sld [smem:[#allocation24_spill]] }
 0xe49   : > { %v6721_v37 = vpop.eup %6720 }
 0xe4a   : > { %v3274_v1 = vmul.f32 %v6721_v37, %v6719_v33 }
 0xe4c   : > { %6399 = vmatmul.mubr.msk.f32.vlgmr.msra.gmra.mxu0 %vm1366_vm4, %v3274_v1 }
 0xe4d   : > { %6414 = vmatprep.mubr.msk.f32.mxu0 %vm6842_vm1, %v6841_v7  ;;  %6407 = vmatpush3.msra.mxu0 %v3472_v53 }
 0xe4e   : > { %6408 = vmatprep.subr.mxu0 %v6841_v7 }
 0xe4f   : > { %6409 = vmatpush3.msra.mxu0 %v3471_v54  ;;  %v5926_v54 = vld [vmem:[%s7730_s3 + $0x1] ss:$0 sm:$0xff] }
 0xe50   : > { %6410 = vmatprep.subr.mxu0 %v6841_v7 }
 0xe51   : > { %6411 = vmatpush3.msra.mxu0 %v3470_v56  ;;  %v5919_v56 = vld [vmem:[%s7731_s2 + $0x1] ss:$0 sm:$0xff] }
 0xe52   : > { %6412 = vmatprep.subr.mxu0 %v6841_v7 }
 0xe53   : > { %6413 = vmatpush3.msra.mxu0 %v3469_v58 }
 0xe54   : > { %6428 = vmatprep.subr.mxu0 %v6841_v7 }
 0xf0c   : > { %v3344_v38 = vpop.f32.mrf.mxu0 }
 0xf0d   : > { %6404 = vmatmul.mubr.msk.f32.vlgmr.msra.gmra.mxu1 %vm1366_vm4, %v3344_v38 }
 0xf0e   : > { %v6400_v39 = vpop.f32.mrf.mxu0  ;;  %6425 = vmatprep.mubr.msk.f32.mxu1 %vm6842_vm1, %v6841_v7 }
 0xfcd   : > { %v3419_v40 = vpop.f32.mrf.mxu1 }
 0xfce   : > { %v3423_v41 = vadd.f32 %v3419_v40, %v2841_v12 }
 0xfcf   : > { %v6405_v43 = vpop.f32.mrf.mxu1 }
 0xfd0   : > { %v3424_v44 = vadd.f32 %v3423_v41, %v7073_v0  ;;  %v3556_v0 = vld [vmem:[%s7724_s22 + $0x18] sm:$0xff] }
 0xfd1   : > { %6418 = vmatpush3.msra.mxu1 %v3556_v0  ;;  %v5921_v0 = vld [vmem:[%s7724_s22 + $0x20] sm:$0xff] }
 0xfd2   : > { %v7357_v45 = vadd.f32 %v5902_v42, %v3424_v44  ;;  %6419 = vmatprep.subr.mxu1 %v6841_v7 }
 0xfd3   : > { %6420 = vmatpush3.msra.mxu1 %v3555_v52 }
 0xfd4   : > { %v3433_v46 = vsel %vm1065_vm0, %v7357_v45, 0.0  ;;  %6421 = vmatprep.subr.mxu1 %v6841_v7 }
 0xfd5   : > { %3434 = vadd.xlane.f32.xlu0 %v3433_v46  ;;  %6422 = vmatpush3.msra.mxu1 %v3554_v55 }
 0xfd6   : > { %6423 = vmatprep.subr.mxu1 %v6841_v7 }
 0xfd7   : > { %6424 = vmatpush3.msra.mxu1 %v3553_v57 }
 0xfd8   : > { %6426 = vmatmul.mubr.msk.f32.vlgmr.msra.gmra.mxu1 %vm1065_vm0, %v7377_v59  ;;  %6439 = vmatprep.subr.mxu1 %v6841_v7 }
 0xfd9   : > { %6441 = vmatprep.mubr.msk.f32.mxu1 %vm6842_vm1, %v6841_v7 }
0x105e   : > { %v3435_v47 = vpop.xlane.xlu0 %3434 }
0x105f   : > { %v3436_v48 = vmul.f32 0.03125, %v3435_v47 }
0x1061   : > { %v3437_v49 = vsub.f32 %v7357_v45, %v3436_v48 }
0x1063   : > { %v3438_v50 = vmul.f32 %v3437_v49, %v3437_v49  ;;  %v3459_v8 = vmul.f32 %v5903_v29, %v3437_v49  ;;  %v5924_v49 = vld [vmem:[%s7724_s22 + $0x38] sm:$0xff] }
0x1065   : > { %v3439_v51 = vsel %vm1065_vm0, %v3438_v50, 0.0  ;;  %v5923_v50 = vld [vmem:[%s7724_s22 + $0x30] sm:$0xff] }
0x1066   : > { %3440 = vadd.xlane.f32.xlu1 %v3439_v51  ;;  %v5922_v51 = vld [vmem:[%s7724_s22 + $0x28] sm:$0xff] }
0x1098   : > { %v3633_v3 = vpop.f32.mrf.mxu1 }
0x1099   : > { %v3634_v14 = vadd.f32 %v5907_v22, %v3633_v3 }
0x109a   : > { %v6427_v23 = vpop.f32.mrf.mxu1 }
0x109b   : > { %6440 = vmatpush3.xpose.msk.msra.mxu1 %vm1366_vm4, %v3634_v14  ;;  %v3880_v14 = vld [vmem:[%s7734_s8] sm:$0xff]  ;;  %v5951_v23 = vld [vmem:[%s7724_s22 + $0x58] sm:$0xff] }
0x109c   : > { %6444 = vmatprep.subr.mxu1 %v6841_v7 }
0x10ef   : > { %v3441_v60 = vpop.xlane.xlu1 %3440 }
0x10f0   : > { %v3442_v61 = vmul.f32 0.032258064, %v3441_v60 }
0x10f2   : > { %6722 = vrsqrt.f32 %v3442_v61  ;;  %vm3445_vm5 = vcmp.eq.f32.partialorder %v3442_v61, inf  ;;  %v3448_v2 = vand.u32 2147483648, %v3442_v61  ;;  %vm3447_vm6 = vcmp.eq.f32.partialorder %v3442_v61, 0.0 }
0x10ff   : > { %v6723_v62 = vpop.eup %6722 }
0x1100   : > { %v3444_v63 = vmul.f32 %v6723_v62, %v3442_v61  ;;  %v5930_v62 = vld [vmem:[%s7729_s5 + $0x30] sm:$0xff] }
0x1102   : > { %v3446_v4 = vsel %vm3445_vm5, %v3442_v61, %v3444_v63  ;;  %v5931_v61 = vld [vmem:[%s7729_s5 + $0x38] sm:$0xff]  ;;  %v5929_v63 = vld [vmem:[%s7729_s5 + $0x28] sm:$0xff] }
0x1103   : > { %v3449_v5 = vsel %vm3447_vm6, %v3448_v2, %v3446_v4  ;;  %v5928_v2 = vld [vmem:[%s7729_s5 + $0x20] sm:$0xff] }
0x1104   : > { %v3450_v6 = vadd.f32 1e-06, %v3449_v5 }
0x1106   : > { %6724 = vrcp.f32 %v3450_v6 }
0x1113   : > { %v6725_v9 = vpop.eup %6724 }
0x1114   : > { %v3460_v11 = vmul.f32 %v6725_v9, %v3459_v8 }
0x1116   : > { %v7389_v12 = vadd.f32 %v5904_v10, %v3460_v11 }
0x1118   : > { %6415 = vmatmul.mubr.msk.f32.vlgmr.msra.gmra.mxu0 %vm1065_vm0, %v7389_v12 }
0x1119   : > { %6429 = vmatpush3.msra.mxu0 %v3640_v13  ;;  %6436 = vmatprep.mubr.msk.f32.mxu0 %vm6842_vm1, %v6841_v7 }
0x111a   : > { %6430 = vmatprep.subr.mxu0 %v6841_v7 }
0x111b   : > { %6431 = vmatpush3.msra.mxu0 %v3639_v15 }
0x111c   : > { %6432 = vmatprep.subr.mxu0 %v6841_v7 }
0x111d   : > { %6433 = vmatpush3.msra.mxu0 %v3638_v16  ;;  %v5933_v16 = vld [vmem:[%s7732_s6 + $0x1] ss:$0 sm:$0xff] }
0x111e   : > { %6434 = vmatprep.subr.mxu0 %v6841_v7 }
0x111f   : > { %6435 = vmatpush3.msra.mxu0 %v3637_v17 }
0x1120   : > { %6449 = vmatprep.subr.mxu0 %v6841_v7  ;;  %6437 = vmatmul.mubr.msk.f32.vlgmr.msra.gmra.mxu0 %vm1065_vm0, %v7377_v59 }
0x1121   : > { %6450 = vmatpush3.msra.mxu0 %v5917_v18  ;;  %6457 = vmatprep.mubr.msk.f32.mxu0 %vm6842_vm1, %v6841_v7 }
0x1122   : > { %6451 = vmatprep.subr.mxu0 %v6841_v7 }
0x1123   : > { %6452 = vmatpush3.msra.mxu0 %v5916_v19 }
0x1124   : > { %6453 = vmatprep.subr.mxu0 %v6841_v7 }
0x1125   : > { %6454 = vmatpush3.msra.mxu0 %v5915_v20  ;;  %v5938_v20 = vld [vmem:[%s7734_s8 + $0x8] sm:$0xff] }
0x1126   : > { %6455 = vmatprep.subr.mxu0 %v6841_v7 }
0x1127   : > { %6456 = vmatpush3.msra.mxu0 %v5914_v21 }
0x1128   : > { %6458 = vmatmul.mubr.msk.f32.vlgmr.msra.gmra.mxu0 %vm1065_vm0, %v7389_v12  ;;  %6471 = vmatprep.subr.mxu0 %v6841_v7 }
0x1129   : > { %6479 = vmatprep.mubr.msk.f32.mxu0 %vm6842_vm1, %v6841_v7  ;;  %6472 = vmatpush3.msra.mxu0 %v5931_v61  ;;  %v5960_v61 = vld [vmem:[%s7732_s6 + $0x2] ss:$0 sm:$0xff] }
0x112a   : > { %6473 = vmatprep.subr.mxu0 %v6841_v7 }
0x112b   : > { %6474 = vmatpush3.msra.mxu0 %v5930_v62 }
0x112c   : > { %6475 = vmatprep.subr.mxu0 %v6841_v7 }
0x112d   : > { %6476 = vmatpush3.msra.mxu0 %v5929_v63 }
0x112e   : > { %6477 = vmatprep.subr.mxu0 %v6841_v7 }
0x112f   : > { %6478 = vmatpush3.msra.mxu0 %v5928_v2 }
0x1130   : > { %6480 = vmatmul.mubr.msk.f32.vlgmr.msra.gmra.mxu0 %vm1065_vm0, %v7377_v59  ;;  %6492 = vmatprep.subr.mxu0 %v6841_v7 }
0x1131   : > { %6494 = vmatprep.mubr.msk.f32.mxu0 %vm6842_vm1, %v6841_v7  ;;  %6493 = vmatpush3.msra.mxu0 %v5938_v20 }
0x1132   : > { %6502 = vmatprep.subr.mxu0 %v6841_v7 }
0x11d8   : > { %v3549_v25 = vpop.f32.mrf.mxu0 }
0x11d9   : > { %v3550_v26 = vadd.f32 %v5905_v24, %v3549_v25  ;;  %v5950_v24 = vld [vmem:[%s7724_s22 + $0x50] sm:$0xff]  ;;  %v5949_v25 = vld [vmem:[%s7724_s22 + $0x48] sm:$0xff] }
0x11da   : > { %v6416_v27 = vpop.f32.mrf.mxu0 }
0x11db   : > { %6442 = vmatmul.mubr.msk.f32.vlgmr.msra.gmra.mxu1 %vm1366_vm4, %v3550_v26  ;;  %v5948_v26 = vld [vmem:[%s7724_s22 + $0x40] sm:$0xff]  ;;  %v5944_v27 = vld [vmem:[%s7725_s23 + $0x58] sm:$0xff] }
0x11dc   : > { %6446 = vmatprep.mubr.msk.f32.mxu1 %vm6842_vm1, %v6841_v7 }
0x11e0   : > { %v3714_v30 = vpop.f32.mrf.mxu0 }
0x11e1   : > { %v3715_v31 = vadd.f32 %v5909_v28, %v3714_v30  ;;  %v5943_v30 = vld [vmem:[%s7725_s23 + $0x50] sm:$0xff] }
0x11e2   : > { %v6438_v32 = vpop.f32.mrf.mxu0 }
0x11e3   : > { %6445 = vmatpush3.msra.mxu1 %v3715_v31  ;;  %v5942_v32 = vld [vmem:[%s7725_s23 + $0x48] sm:$0xff] }
0x11e4   : > { %6460 = vmatprep.subr.mxu1 %v6841_v7 }
0x11e8   : > { %v3960_v33 = vpop.f32.mrf.mxu0 }
0x11e9   : > { %v3961_v60 = vadd.f32 %v5919_v56, %v3960_v33 }
0x11ea   : > { %v6459_v34 = vpop.f32.mrf.mxu0 }
0x11eb   : > { %v5941_v34 = vld [vmem:[%s7725_s23 + $0x40] sm:$0xff] }
0x11f0   : > { %v4126_v17 = vpop.f32.mrf.mxu0 }
0x11f1   : > { %v4127_v18 = vadd.f32 %v5933_v16, %v4126_v17  ;;  %v5976_v16 = vld [vmem:[%s7724_s22 + $0x70] sm:$0xff] }
0x11f2   : > { %v6481_v19 = vpop.f32.mrf.mxu0 }
0x129b   : > { %v3790_v35 = vpop.f32.mrf.mxu1 }
0x129c   : > { %v3794_v37 = vmul.f32 0.35355338, %v3790_v35 }
0x129d   : > { %v6443_v1 = vpop.f32.mrf.mxu1 }
0x129e   : > { %v3795_v38 = vadd.f32 %v3794_v37, %v7430_v36  ;;  %v5953_v37 = vld [vmem:[%s7730_s3 + $0x2] ss:$0 sm:$0xff] }
0x12a0   : > { %v3796_v39 = vsel %vm1366_vm4, %v3795_v38, -inf }
0x12a1   : > { %3797 = vmax.xlane.f32.xlu0 %v3796_v39 }
0x132a   : > { %v3798_v40 = vpop.xlane.xlu0 %3797 }
0x132b   : > { %v3799_v41 = vsub.f32 %v3795_v38, %v3798_v40 }
0x132d   : > { %v3800_v42 = vmul.f32 1.442695, %v3799_v41 }
0x132f   : > { %6726 = vpow2.f32 %v3800_v42  ;;  %v5946_v42 = vld [vmem:[%s7731_s2 + $0x2] ss:$0 sm:$0xff] }
0x133c   : > { %v6727_v43 = vpop.eup %6726 }
0x133d   : > { %v3802_v44 = vsel %vm1366_vm4, %v6727_v43, 0.0 }
0x133e   : > { %3803 = vadd.xlane.f32.xlu1 %v3802_v44 }
0x13c7   : > { %v3804_v46 = vpop.xlane.xlu1 %3803 }
0x13c8   : > { %6728 = vrcp.f32 %v3804_v46 }
0x13d5   : > { %v6729_v47 = vpop.eup %6728 }
0x13d6   : > { %v3806_v48 = vmul.f32 %v6729_v47, %v6727_v43  ;;  %v5958_v47 = vld [vmem:[%s7729_s5 + $0x58] sm:$0xff] }
0x13d8   : > { %6447 = vmatmul.mubr.msk.f32.vlgmr.msra.gmra.mxu1 %vm1366_vm4, %v3806_v48  ;;  %v5957_v48 = vld [vmem:[%s7729_s5 + $0x50] sm:$0xff] }
0x13d9   : > { %6461 = vmatpush3.msra.mxu1 %v5924_v49  ;;  %6468 = vmatprep.mubr.msk.f32.mxu1 %vm6842_vm1, %v6841_v7  ;;  %v5956_v49 = vld [vmem:[%s7729_s5 + $0x48] sm:$0xff] }
0x13da   : > { %6462 = vmatprep.subr.mxu1 %v6841_v7 }
0x13db   : > { %6463 = vmatpush3.msra.mxu1 %v5923_v50  ;;  %v5955_v50 = vld [vmem:[%s7729_s5 + $0x40] sm:$0xff] }
0x13dc   : > { %6464 = vmatprep.subr.mxu1 %v6841_v7 }
0x13dd   : > { %6465 = vmatpush3.msra.mxu1 %v5922_v51 }
0x13de   : > { %6466 = vmatprep.subr.mxu1 %v6841_v7 }
0x13df   : > { %6467 = vmatpush3.msra.mxu1 %v5921_v0 }
0x13e0   : > { %6469 = vmatmul.mubr.msk.f32.vlgmr.msra.gmra.mxu1 %vm1065_vm0, %v7377_v59  ;;  %6482 = vmatprep.subr.mxu1 %v6841_v7 }
0x13e1   : > { %6484 = vmatprep.mubr.msk.f32.mxu1 %vm6842_vm1, %v6841_v7 }
0x1498   : > { %v3876_v52 = vpop.f32.mrf.mxu1 }
0x149a   : > { %v6448_v53 = vpop.f32.mrf.mxu1 }
0x14a0   : > { %v4043_v55 = vpop.f32.mrf.mxu1 }
0x14a1   : > { %v4044_v57 = vadd.f32 %v5926_v54, %v4043_v55 }
0x14a2   : > { %v6470_v58 = vpop.f32.mrf.mxu1 }
0x14a3   : > { %6483 = vmatpush3.xpose.msk.msra.mxu1 %vm1366_vm4, %v4044_v57 }
0x14a4   : > { %6487 = vmatprep.subr.mxu1 %v6841_v7 }
0x14a6   : > { %6485 = vmatmul.mubr.msk.f32.vlgmr.msra.gmra.mxu1 %vm1366_vm4, %v3961_v60 }
0x14a7   : > { %6489 = vmatprep.mubr.msk.f32.mxu1 %vm6842_vm1, %v6841_v7  ;;  %6488 = vmatpush3.msra.mxu1 %v4127_v18  ;;  %v5975_v18 = vld [vmem:[%s7724_s22 + $0x68] sm:$0xff] }
0x14a8   : > { %6497 = vmatprep.subr.mxu1 %v6841_v7 }
0x1566   : > { %v4202_v4 = vpop.f32.mrf.mxu1 }
0x1567   : > { %v4206_v5 = vmul.f32 0.35355338, %v4202_v4  ;;  %v5965_v4 = vld [vmem:[%s7734_s8 + $0x10] sm:$0xff] }
0x1568   : > { %v6486_v6 = vpop.f32.mrf.mxu1 }
0x1569   : > { %v4207_v29 = vadd.f32 %v4206_v5, %v7430_v36 }
0x156b   : > { %v4208_v8 = vsel %vm1366_vm4, %v4207_v29, -inf }
0x156c   : > { %4209 = vmax.xlane.f32.xlu0 %v4208_v8  ;;  %v5970_v8 = vld [vmem:[%s7725_s23 + $0x78] sm:$0xff] }
0x15f5   : > { %v4210_v9 = vpop.xlane.xlu0 %4209 }
0x15f6   : > { %v4211_v10 = vsub.f32 %v4207_v29, %v4210_v9  ;;  %v5969_v9 = vld [vmem:[%s7725_s23 + $0x70] sm:$0xff] }
0x15f8   : > { %v4212_v11 = vmul.f32 1.442695, %v4211_v10  ;;  %v5968_v10 = vld [vmem:[%s7725_s23 + $0x68] sm:$0xff] }
0x15fa   : > { %6730 = vpow2.f32 %v4212_v11  ;;  %v5967_v11 = vld [vmem:[%s7725_s23 + $0x60] sm:$0xff] }
0x1607   : > { %v6731_v13 = vpop.eup %6730 }
0x1608   : > { %v4214_v15 = vsel %vm1366_vm4, %v6731_v13, 0.0 }
0x1609   : > { %4215 = vadd.xlane.f32.xlu1 %v4214_v15 }
0x1692   : > { %v4216_v21 = vpop.xlane.xlu1 %4215 }
0x1693   : > { %6732 = vrcp.f32 %v4216_v21 }
0x16a0   : > { %v6733_v22 = vpop.eup %6732 }
0x16a1   : > { %v4218_v3 = vmul.f32 %v6733_v22, %v6731_v13  ;;  %v5977_v13 = vld [vmem:[%s7724_s22 + $0x78] sm:$0xff] }
0x16a3   : > { %6490 = vmatmul.mubr.msk.f32.vlgmr.msra.gmra.mxu1 %vm1366_vm4, %v4218_v3 }
0x16a4   : > { %6498 = vmatpush3.msra.mxu1 %v3880_v14  ;;  %6499 = vmatprep.mubr.msk.f32.mxu1 %vm6842_vm1, %v6841_v7 }
0x16a5   : > { %6513 = vmatprep.subr.mxu1 %v6841_v7 }
0x16a7   : > { %6500 = vmatmul.mubr.msk.f32.vlgmr.msra.gmra.mxu1 %vm1366_vm4, %v3876_v52 }
0x16a8   : > { %6514 = vmatpush3.msra.mxu1 %v5951_v23  ;;  %6521 = vmatprep.mubr.msk.f32.mxu1 %vm6842_vm1, %v6841_v7  ;;  %v5979_v23 = vld [vmem:[%s7730_s3 + $0x3] ss:$0 sm:$0xff]  ;;  %s6001_s3 = sshll.u32 %s7040_s0, 7 }
0x16a9   : > { %6515 = vmatprep.subr.mxu1 %v6841_v7 }
0x16aa   : > { %6516 = vmatpush3.msra.mxu1 %v5950_v24 }
0x16ab   : > { %6517 = vmatprep.subr.mxu1 %v6841_v7 }
0x16ac   : > { %6518 = vmatpush3.msra.mxu1 %v5949_v25  ;;  %v5972_v25 = vld [vmem:[%s7731_s2 + $0x3] ss:$0 sm:$0xff]  ;;  %s7738_s2 = sld [smem:[#allocation26_spill]] }
0x16ad   : > { %6519 = vmatprep.subr.mxu1 %v6841_v7 }
0x16ae   : > { %6520 = vmatpush3.msra.mxu1 %v5948_v26 }
0x16af   : > { %6522 = vmatmul.mubr.msk.f32.vlgmr.msra.gmra.mxu1 %vm1065_vm0, %v7377_v59  ;;  %6535 = vmatprep.subr.mxu1 %v6841_v7 }
0x16b0   : > { %6537 = vmatprep.mubr.msk.f32.mxu1 %vm6842_vm1, %v6841_v7 }
0x1763   : > { %v4288_v28 = vpop.f32.mrf.mxu1 }
0x1764   : > { %6495 = vmatmul.mubr.msk.f32.vlgmr.msra.gmra.mxu0 %vm1366_vm4, %v4288_v28 }
0x1765   : > { %6503 = vmatpush3.msra.mxu0 %v5944_v27  ;;  %v6491_v31 = vpop.f32.mrf.mxu1  ;;  %6510 = vmatprep.mubr.msk.f32.mxu0 %vm6842_vm1, %v6841_v7 }
0x1766   : > { %6504 = vmatprep.subr.mxu0 %v6841_v7  ;;  %v5983_v31 = vld [vmem:[%s7729_s5 + $0x70] sm:$0xff] }
0x1767   : > { %6505 = vmatpush3.msra.mxu0 %v5943_v30  ;;  %v7503_v33 = vpop.f32.mrf.mxu1  ;;  %v5984_v30 = vld [vmem:[%s7729_s5 + $0x78] sm:$0xff] }
0x1768   : > { %6506 = vmatprep.subr.mxu0 %v6841_v7 }
0x1769   : > { %6507 = vmatpush3.msra.mxu0 %v5942_v32  ;;  %v6501_v35 = vpop.f32.mrf.mxu1  ;;  %v5982_v32 = vld [vmem:[%s7729_s5 + $0x68] sm:$0xff] }
0x176a   : > { %6508 = vmatprep.subr.mxu0 %v6841_v7 }
0x176b   : > { %6509 = vmatpush3.msra.mxu0 %v5941_v34 }
0x176c   : > { %6511 = vmatmul.mubr.msk.f32.vlgmr.msra.gmra.mxu0 %vm1065_vm0, %v7389_v12  ;;  %6524 = vmatprep.subr.mxu0 %v6841_v7 }
0x176d   : > { %6532 = vmatprep.mubr.msk.f32.mxu0 %vm6842_vm1, %v6841_v7  ;;  %6525 = vmatpush3.msra.mxu0 %v5958_v47 }
0x176e   : > { %6526 = vmatprep.subr.mxu0 %v6841_v7 }
0x176f   : > { %v4602_v1 = vpop.f32.mrf.mxu1  ;;  %6527 = vmatpush3.msra.mxu0 %v5957_v48 }
0x1770   : > { %v4603_v38 = vadd.f32 %v5953_v37, %v4602_v1  ;;  %6528 = vmatprep.subr.mxu0 %v6841_v7 }
0x1771   : > { %v6523_v39 = vpop.f32.mrf.mxu1  ;;  %6529 = vmatpush3.msra.mxu0 %v5956_v49 }
0x1772   : > { %6536 = vmatpush3.xpose.msk.msra.mxu1 %vm1366_vm4, %v4603_v38  ;;  %6530 = vmatprep.subr.mxu0 %v6841_v7 }
0x1773   : > { %6540 = vmatprep.subr.mxu1 %v6841_v7  ;;  %6531 = vmatpush3.msra.mxu0 %v5955_v50 }
0x1774   : > { %6533 = vmatmul.mubr.msk.f32.vlgmr.msra.gmra.mxu0 %vm1065_vm0, %v7377_v59  ;;  %6545 = vmatprep.subr.mxu0 %v6841_v7 }
0x1775   : > { %6547 = vmatprep.mubr.msk.f32.mxu0 %vm6842_vm1, %v6841_v7  ;;  %6546 = vmatpush3.msra.mxu0 %v5965_v4  ;;  %v5462_v4 = vld [vmem:[%s7736_s16 + $0x18] sm:$0xff] }
0x1776   : > { %6561 = vmatprep.subr.mxu0 %v6841_v7 }
0x1824   : > { %v7516_v40 = vpop.f32.mrf.mxu0 }
0x1825   : > { %v4437_v21 = vadd.f32 %v7503_v33, %v7516_v40  ;;  %v5981_v33 = vld [vmem:[%s7729_s5 + $0x60] sm:$0xff] }
0x1826   : > { %v6496_v41 = vpop.f32.mrf.mxu0 }
0x182c   : > { %v4519_v43 = vpop.f32.mrf.mxu0 }
0x182d   : > { %v4520_v44 = vadd.f32 %v5946_v42, %v4519_v43  ;;  %v5986_v43 = vld [vmem:[%s7732_s6 + $0x3] ss:$0 sm:$0xff] }
0x182e   : > { %v6512_v46 = vpop.f32.mrf.mxu0 }
0x182f   : > { %6538 = vmatmul.mubr.msk.f32.vlgmr.msra.gmra.mxu1 %vm1366_vm4, %v4520_v44 }
0x1830   : > { %6542 = vmatprep.mubr.msk.f32.mxu1 %vm6842_vm1, %v6841_v7 }
0x1834   : > { %v4685_v62 = vpop.f32.mrf.mxu0 }
0x1835   : > { %v4686_v63 = vadd.f32 %v5960_v61, %v4685_v62 }
0x1836   : > { %v6534_v2 = vpop.f32.mrf.mxu0 }
0x1837   : > { %6541 = vmatpush3.msra.mxu1 %v4686_v63 }
0x1838   : > { %6550 = vmatprep.subr.mxu1 %v6841_v7 }
0x18ef   : > { %v4761_v51 = vpop.f32.mrf.mxu1 }
0x18f0   : > { %v4765_v0 = vmul.f32 0.35355338, %v4761_v51 }
0x18f1   : > { %v6539_v52 = vpop.f32.mrf.mxu1 }
0x18f2   : > { %v4766_v53 = vadd.f32 %v4765_v0, %v7430_v36 }
0x18f4   : > { %v4767_v54 = vsel %vm1366_vm4, %v4766_v53, -inf }
0x18f5   : > { %4768 = vmax.xlane.f32.xlu0 %v4767_v54  ;;  %v5993_v54 = vld [vmem:[%s7735_s12] ss:$0 sm:$0xff]  ;;  %s7737_s12 = sld [smem:[#allocation25_spill]] }
0x197e   : > { %v4769_v55 = vpop.xlane.xlu0 %4768 }
0x197f   : > { %v4770_v56 = vsub.f32 %v4766_v53, %v4769_v55 }
0x1981   : > { %v4771_v57 = vmul.f32 1.442695, %v4770_v56 }
0x1983   : > { %6734 = vpow2.f32 %v4771_v57 }
0x1990   : > { %v6735_v58 = vpop.eup %6734 }
0x1991   : > { %v4773_v60 = vsel %vm1366_vm4, %v6735_v58, 0.0 }
0x1992   : > { %4774 = vadd.xlane.f32.xlu1 %v4773_v60 }
0x1a1b   : > { %v4775_v5 = vpop.xlane.xlu1 %4774 }
0x1a1c   : > { %6736 = vrcp.f32 %v4775_v5  ;;  %v5460_v5 = vld [vmem:[%s7736_s16 + $0x8] sm:$0xff] }
0x1a29   : > { %v6737_v6 = vpop.eup %6736 }
0x1a2a   : > { %v4777_v29 = vmul.f32 %v6737_v6, %v6735_v58  ;;  %v5459_v6 = vld [vmem:[%s7736_s16] sm:$0xff] }
0x1a2c   : > { %6543 = vmatmul.mubr.msk.f32.vlgmr.msra.gmra.mxu1 %vm1366_vm4, %v4777_v29  ;;  %v5551_v29 = vld [vmem:[%s7714_s9 + $0x38] sm:$0xff] }
0x1a2d   : > { %6551 = vmatpush3.msra.mxu1 %v5970_v8  ;;  %6558 = vmatprep.mubr.msk.f32.mxu1 %vm6842_vm1, %v6841_v7  ;;  %v5550_v8 = vld [vmem:[%s7714_s9 + $0x30] sm:$0xff] }
0x1a2e   : > { %6552 = vmatprep.subr.mxu1 %v6841_v7 }
0x1a2f   : > { %6553 = vmatpush3.msra.mxu1 %v5969_v9  ;;  %v5549_v9 = vld [vmem:[%s7714_s9 + $0x28] sm:$0xff] }
0x1a30   : > { %6554 = vmatprep.subr.mxu1 %v6841_v7 }
0x1a31   : > { %6555 = vmatpush3.msra.mxu1 %v5968_v10  ;;  %v5548_v10 = vld [vmem:[%s7714_s9 + $0x20] sm:$0xff] }
0x1a32   : > { %6556 = vmatprep.subr.mxu1 %v6841_v7 }
0x1a33   : > { %6557 = vmatpush3.msra.mxu1 %v5967_v11  ;;  %v5547_v11 = vld [vmem:[%s7714_s9 + $0x18] sm:$0xff] }
0x1a34   : > { %6559 = vmatmul.mubr.msk.f32.vlgmr.msra.gmra.mxu1 %vm1065_vm0, %v7389_v12  ;;  %6572 = vmatprep.subr.mxu1 %v6841_v7  ;;  %v5974_v12 = vld [vmem:[%s7724_s22 + $0x60] sm:$0xff] }
0x1a35   : > { %6580 = vmatprep.mubr.msk.f32.mxu1 %vm6842_vm1, %v6841_v7  ;;  %6573 = vmatpush3.msra.mxu1 %v5984_v30 }
0x1a36   : > { %6574 = vmatprep.subr.mxu1 %v6841_v7 }
0x1a37   : > { %6575 = vmatpush3.msra.mxu1 %v5983_v31 }
0x1a38   : > { %6576 = vmatprep.subr.mxu1 %v6841_v7 }
0x1a39   : > { %6577 = vmatpush3.msra.mxu1 %v5982_v32 }
0x1a3a   : > { %6578 = vmatprep.subr.mxu1 %v6841_v7 }
0x1a3b   : > { %6579 = vmatpush3.msra.mxu1 %v5981_v33 }
0x1a3c   : > { %6581 = vmatmul.mubr.msk.f32.vlgmr.msra.gmra.mxu1 %vm1065_vm0, %v7377_v59  ;;  %6593 = vmatprep.subr.mxu1 %v6841_v7 }
0x1a3d   : > { %6595 = vmatprep.mubr.msk.f32.mxu1 %vm6842_vm1, %v6841_v7 }
0x1aec   : > { %v4847_v15 = vpop.f32.mrf.mxu1 }
0x1aed   : > { %6548 = vmatmul.mubr.msk.f32.vlgmr.msra.gmra.mxu0 %vm1366_vm4, %v4847_v15 }
0x1aee   : > { %6562 = vmatpush3.msra.mxu0 %v5977_v13  ;;  %v6544_v17 = vpop.f32.mrf.mxu1  ;;  %6569 = vmatprep.mubr.msk.f32.mxu0 %vm6842_vm1, %v6841_v7 }
0x1aef   : > { %6563 = vmatprep.subr.mxu0 %v6841_v7 }
0x1af0   : > { %6564 = vmatpush3.msra.mxu0 %v5976_v16 }
0x1af1   : > { %6565 = vmatprep.subr.mxu0 %v6841_v7 }
0x1af2   : > { %6566 = vmatpush3.msra.mxu0 %v5975_v18 }
0x1af3   : > { %6567 = vmatprep.subr.mxu0 %v6841_v7 }
0x1af4   : > { %v5006_v19 = vpop.f32.mrf.mxu1  ;;  %6568 = vmatpush3.msra.mxu0 %v5974_v12 }
0x1af5   : > { %6570 = vmatmul.mubr.msk.f32.vlgmr.msra.gmra.mxu0 %vm1065_vm0, %v7377_v59  ;;  %6583 = vmatprep.subr.mxu0 %v6841_v7  ;;  %v5007_v28 = vadd.f32 %v5972_v25, %v5006_v19  ;;  %v5546_v25 = vld [vmem:[%s7714_s9 + $0x10] sm:$0xff] }
0x1af6   : > { %v6560_v20 = vpop.f32.mrf.mxu1  ;;  %6585 = vmatprep.mubr.msk.f32.mxu0 %vm6842_vm1, %v6841_v7 }
0x1afc   : > { %v5172_v44 = vpop.f32.mrf.mxu1 }
0x1afd   : > { %v5173_v46 = vadd.f32 %v5986_v43, %v5172_v44 }
0x1afe   : > { %v6582_v47 = vpop.f32.mrf.mxu1 }
0x1bad   : > { %v4922_v22 = vpop.f32.mrf.mxu0 }
0x1bae   : > { %v4926_v3 = vadd.f32 %v4922_v22, %v4437_v21  ;;  %v5994_v21 = vld [vmem:[%s7737_s12] ss:$0 sm:$0xff] }
0x1baf   : > { %v6549_v14 = vpop.f32.mrf.mxu0 }
0x1bb0   : > { %v5995_v14 = vld [vmem:[%s7738_s2] ss:$0 sm:$0xff]  ;;  %s1042_s2 = sand.u32 1, %s6798_s10  }
0x1bb1   : > { %s5782_s12 = sshll.u32 %s1042_s2, 3 }
0x1bb2   : > { %s1044_s5 = scalar_lea.vmem [#allocation2], %s5782_s12 }
0x1bb3   : > { %s5650_s6 = sshll.u32 %s1044_s5, 4  ;;  %s5651_s6 = int_to_ptr.vmem [resolvable:$true] %s5650_s6 }
0x1bb4   : > { %s6746_s13 = scalar_lea.vmem %s5651_s6, 128 }
0x1bb5   : > { %v5089_v24 = vpop.f32.mrf.mxu0  ;;  %p6747_p11 = scmp.ne.s32.totalorder %s5651_s6, %s6746_s13 }
0x1bb6   : > { %v5090_v26 = vadd.f32 %v5979_v23, %v5089_v24 }
0x1bb7   : > { %v6571_v27 = vpop.f32.mrf.mxu0  ;;  %p6748_p12 = pnand %p6747_p11, %p7057_p5 }
0x1bb8   : > { %6584 = vmatpush3.xpose.msk.msra.mxu0 %vm1366_vm4, %v5090_v26  ;;  %v5545_v26 = vld [vmem:[%s7714_s9 + $0x8] sm:$0xff]  ;;  %v5544_v27 = vld [vmem:[%s7714_s9] sm:$0xff]  ;;  %s5637_s9 = scalar_lea.sflag [#allocation3], %s1042_s2 }
0x1bb9   : > { %6588 = vmatprep.subr.mxu0 %v6841_v7  ;;  %p6749_p13 = pneg %p6748_p12 }
0x1bbb   : > { %6586 = vmatmul.mubr.msk.f32.vlgmr.msra.gmra.mxu0 %vm1366_vm4, %v5007_v28  ;;  %v5996_v28 = vld [vmem:[%s7002_s17] ss:$0 sm:$0xff] }
0x1bbc   : > { %6590 = vmatprep.mubr.msk.f32.mxu0 %vm6842_vm1, %v6841_v7  ;;  %6589 = vmatpush3.msra.mxu0 %v5173_v46 }
0x1bbd   : > { %6598 = vmatprep.subr.mxu0 %v6841_v7 }
0x1c7b   : > { %v5248_v34 = vpop.f32.mrf.mxu0 }
0x1c7c   : > { %v5252_v35 = vmul.f32 0.35355338, %v5248_v34 }
0x1c7d   : > { %v6587_v37 = vpop.f32.mrf.mxu0 }
0x1c7e   : > { %v5253_v1 = vadd.f32 %v5252_v35, %v7430_v36  ;;  %v5991_v36 = vld [vmem:[%s7734_s8 + $0x18] sm:$0xff]  ;;  %v5999_v35 = vld [vmem:[%s7012_s27] ss:$0 sm:$0xff]  ;;  %s5648_s8 = scalar_lea.hbm %s7017_s4, %s6001_s3 }
0x1c7f   : > { %6594 = vmatpush3.msra.mxu1 %v5991_v36 }
0x1c80   : > { %v5254_v38 = vsel %vm1366_vm4, %v5253_v1, -inf  ;;  %6609 = vmatprep.subr.mxu1 %v6841_v7 }
0x1c81   : > { %5255 = vmax.xlane.f32.xlu0 %v5254_v38 }
0x1d0a   : > { %v5256_v39 = vpop.xlane.xlu0 %5255 }
0x1d0b   : > { %v5257_v40 = vsub.f32 %v5253_v1, %v5256_v39 }
0x1d0d   : > { %v5258_v41 = vmul.f32 1.442695, %v5257_v40 }
0x1d0f   : > { %6738 = vpow2.f32 %v5258_v41 }
0x1d1c   : > { %v6739_v59 = vpop.eup %6738 }
0x1d1d   : > { %v5260_v42 = vsel %vm1366_vm4, %v6739_v59, 0.0 }
0x1d1e   : > { %5261 = vadd.xlane.f32.xlu1 %v5260_v42 }
0x1da7   : > { %v5262_v48 = vpop.xlane.xlu1 %5261 }
0x1da8   : > { %6740 = vrcp.f32 %v5262_v48 }
0x1db5   : > { %v6741_v49 = vpop.eup %6740 }
0x1db6   : > { %v5264_v50 = vmul.f32 %v6741_v49, %v6739_v59 }
0x1db8   : > { %6591 = vmatmul.mubr.msk.f32.vlgmr.msra.gmra.mxu0 %vm1366_vm4, %v5264_v50 }
0x1db9   : > { %6606 = vmatprep.mubr.msk.f32.mxu0 %vm6842_vm1, %v6841_v7  ;;  %6599 = vmatpush3.msra.mxu0 %v5462_v4 }
0x1dba   : > { %6600 = vmatprep.subr.mxu0 %v6841_v7 }
0x1e78   : > { %v5334_v51 = vpop.f32.mrf.mxu0 }
0x1e79   : > { %6596 = vmatmul.mubr.msk.f32.vlgmr.msra.gmra.mxu1 %vm1366_vm4, %v5334_v51 }
0x1e7a   : > { %v6592_v0 = vpop.f32.mrf.mxu0  ;;  %6625 = vmatprep.mubr.msk.f32.mxu1 %vm6842_vm1, %v6841_v7  ;;  %6610 = vmatpush3.msra.mxu1 %v5551_v29 }
0x1e7b   : > { %6611 = vmatprep.subr.mxu1 %v6841_v7 }
0x1e7c   : > { %6612 = vmatpush3.msra.mxu1 %v5550_v8 }
0x1e7d   : > { %6613 = vmatprep.subr.mxu1 %v6841_v7 }
0x1e7e   : > { %6614 = vmatpush3.msra.mxu1 %v5549_v9 }
0x1e7f   : > { %6615 = vmatprep.subr.mxu1 %v6841_v7 }
0x1e80   : > { %6616 = vmatpush3.msra.mxu1 %v5548_v10 }
0x1e81   : > { %6617 = vmatprep.subr.mxu1 %v6841_v7 }
0x1e82   : > { %6618 = vmatpush3.msra.mxu1 %v5547_v11 }
0x1e83   : > { %6619 = vmatprep.subr.mxu1 %v6841_v7 }
0x1e84   : > { %6620 = vmatpush3.msra.mxu1 %v5546_v25 }
0x1e85   : > { %6621 = vmatprep.subr.mxu1 %v6841_v7 }
0x1e86   : > { %6622 = vmatpush3.msra.mxu1 %v5545_v26 }
0x1e87   : > { %6623 = vmatprep.subr.mxu1 %v6841_v7 }
0x1e88   : > { %6624 = vmatpush3.msra.mxu1 %v5544_v27 }
0x1f39   : > { %v5409_v52 = vpop.f32.mrf.mxu1 }
0x1f3a   : > { %v5413_v53 = vadd.f32 %v5409_v52, %v4926_v3 }
0x1f3b   : > { %v6597_v55 = vpop.f32.mrf.mxu1 }
0x1f3c   : > { %v5414_v56 = vadd.f32 %v5413_v53, %v7357_v45  ;;  %v5461_v45 = vld [vmem:[%s7736_s16 + $0x10] sm:$0xff]  ;;  %s6750_s16 = sshll.u32 %s6843_s14, 4  ;;  %s6751_s16 = int_to_ptr.vmem [resolvable:$false] %s6750_s16 }
0x1f3d   : > { %6601 = vmatpush3.msra.mxu0 %v5461_v45  ;;  %s6752_s0 = scalar_lea.vmem %s6751_s16, 256  ;;  %p6753_p0 = scmp.lt.s32.totalorder %s5651_s6, %s6751_s16 }
0x1f3e   : > { %v7607_v57 = vadd.f32 %v5993_v54, %v5414_v56  ;;  %6602 = vmatprep.subr.mxu0 %v6841_v7  ;;  %p6754_p1 = scmp.lt.s32.totalorder %s6752_s0, %s6746_s13 }
0x1f3f   : > { %6603 = vmatpush3.msra.mxu0 %v5460_v5 }
0x1f40   : > { %v5423_v58 = vsel %vm1065_vm0, %v7607_v57, 0.0  ;;  %6604 = vmatprep.subr.mxu0 %v6841_v7  ;;  %p6755_p2 = por %p6754_p1, %p6753_p0 }
0x1f41   : > { %5424 = vadd.xlane.f32.xlu0 %v5423_v58  ;;  %6605 = vmatpush3.msra.mxu0 %v5459_v6 }
0x1f42   : > { %p6756_p3 = pnand %p6755_p2, %p6749_p13 }
0x1fca   : > { %v5425_v60 = vpop.xlane.xlu0 %5424 }
0x1fcb   : > { %v5426_v61 = vmul.f32 0.03125, %v5425_v60 }
0x1fcd   : > { %v5427_v62 = vsub.f32 %v7607_v57, %v5426_v61 }
0x1fcf   : > { %v5428_v63 = vmul.f32 %v5427_v62, %v5427_v62  ;;  %v5449_v22 = vmul.f32 %v5994_v21, %v5427_v62 }
0x1fd1   : > { %v5429_v2 = vsel %vm1065_vm0, %v5428_v63, 0.0 }
0x1fd2   : > { %5430 = vadd.xlane.f32.xlu1 %v5429_v2 }
0x205b   : > { %v5431_v13 = vpop.xlane.xlu1 %5430 }
0x205c   : > { %v5432_v15 = vmul.f32 0.032258064, %v5431_v13 }
0x205e   : > { %6742 = vrsqrt.f32 %v5432_v15  ;;  %vm5435_vm7 = vcmp.eq.f32.partialorder %v5432_v15, inf  ;;  %v5438_v18 = vand.u32 2147483648, %v5432_v15  ;;  %vm5437_vm8 = vcmp.eq.f32.partialorder %v5432_v15, 0.0 }
0x206b   : > { %v6743_v16 = vpop.eup %6742 }
0x206c   : > { %v5434_v17 = vmul.f32 %v6743_v16, %v5432_v15 }
0x206e   : > { %v5436_v12 = vsel %vm5435_vm7, %v5432_v15, %v5434_v17 }
0x206f   : > { %v5439_v19 = vsel %vm5437_vm8, %v5438_v18, %v5436_v12 }
0x2070   : > { %v5440_v20 = vadd.f32 1e-06, %v5439_v19 }
0x2072   : > { %6744 = vrcp.f32 %v5440_v20 }
0x207f   : > { %v6745_v3 = vpop.eup %6744 }
0x2080   : > { %v5450_v23 = vmul.f32 %v6745_v3, %v5449_v22 }
0x2082   : > { %v5458_v24 = vadd.f32 %v5995_v14, %v5450_v23 }
0x2084   : > { %6607 = vmatmul.mubr.msk.f32.vlgmr.msra.gmra.mxu0 %vm1065_vm0, %v5458_v24 }
0x2144   : > { %v5539_v30 = vpop.f32.mrf.mxu0 }
0x2145   : > { %v5540_v31 = vadd.f32 %v5996_v28, %v5539_v30 }
0x2146   : > { %v6608_v32 = vpop.f32.mrf.mxu0 }
0x2147   : > { %v5543_v33 = vmax.f32 %v5540_v31, 0.0 }
0x2149   : > { %6626 = vmatmul.mubr.msk.f32.vlgmr.msra.gmra.mxu1 %vm5552_vm9, %v5543_v33 }
0x2209   : > { %v5622_v34 = vpop.f32.mrf.mxu1 }
0x220a   : > { %v5626_v7 = vadd.f32 %v5622_v34, %v7607_v57 }
0x220b   : > { %v6627_v37 = vpop.f32.mrf.mxu1 }
0x220c   : > { %v5634_v1 = vadd.f32 %v5999_v35, %v5626_v7 }
0x220e   : > { %5635 = vst.msk [vmem:[%s1044_s5] sm:$0xff] %vm1065_vm0, %v5634_v1 }
0x220f   : > { %6759 = shalt.err (!%p6756_p3)
}
0x2210   : > { %s6760_s12 = scalar_lea.hbm %s5648_s8, 128  ;;  %s6764_s5 = scalar_lea.hbm %s7017_s4, 256 }
0x2211   : > { %p6761_p4 = scmp.ne.s32.totalorder %s5648_s8, %s6760_s12  ;;  %p6765_p9 = scmp.lt.s32.totalorder %s5648_s8, %s7017_s4 }
0x2212   : > { %p6766_p10 = scmp.lt.s32.totalorder %s6764_s5, %s6760_s12 }
0x2213   : > { %p6762_p7 = pnand %p6761_p4, %p7057_p5 }
0x2214   : > { %p6767_p11 = por %p6766_p10, %p6765_p9 }
0x2215   : > { %p6763_p8 = pneg %p6762_p7 }
0x2217   : > { %p6768_p12 = pnand %p6767_p11, %p6763_p8 }
0x2219   : > { %6771 = shalt.err (!%p6768_p12)
}
0x221a   : > { %6628 = dma.vmem_to_hbm [thread:$0]  (%p7057_p5), %s5651_s6, 128, %s5648_s8, %s5637_s9  }
0x221b PF: > { %p6634_p13 = scmp.ge.s32.totalorder %s6806_s15, 2  ;;  %s5662_s13 = sand.u32 1, %s6794_s7  }
0x221c   : > { %s5663_s14 = scalar_lea.sflag [#allocation3], %s5662_s13 }
0x221d   : > { %p6631_p0 = pnand %p6634_p13, %p7061_p6 }
0x221f   : > { %p6632_p1 = pneg %p6631_p0 }
0x2221   : > { %6789 = dma.done.wait (%p6632_p1), %s5663_s14, 128  }
0x2222   : > { %6791 = vsyncadd (%p6632_p1), %s5663_s14, 4294967168  ;;  %p77_p2 = scmp.ge.s32.totalorder %s7044_s18, 4   ;;  %s7739_s7 = smov %s6798_s10 }
0x2223   : > { %s7740_s10 = smov %s6802_s11  ;;  %s7741_s11 = smov %s7055_s26 }
0x2224   : > { %s7742_s15 = smov %s7044_s18  ;;  %79 = sbr.rel (!%p77_p2) target bundleno = 66 (0x42), region = 280 }
0x2229   :  { %5668 = vsyncpa [#allocation3], 1 }
0x222a   :  { %5670 = vsyncpa [#allocation3 + $0x1], 1 }

</bundles_post_ra>
